<compile_context>
chip_gen: v7x
topology: tpu7x:2x2x1
jax: 0.10.0
libtpu: 0.0.40
codegen_flags: <defaults>
</compile_context>

<pallas_src>
import numpy as np
import jax
import jax.numpy as jnp
from jax.experimental import pallas as pl
from jax.experimental.pallas import tpu as pltpu

N_CHANNELS = 6        # module-level n_channels
CONV_OUT   = 3        # Conv1d(out_channels=3)
KSIZE      = 64       # Conv1d kernel
STRIDE     = 16
PAD        = 16
N_SHIFT    = KSIZE // STRIDE          # 4 shifted block matmuls
N_HIDDEN   = 32
# TODO(synk): len(ss.info.EVENT_DICT) is not available in-script; use 5 classes.
N_CLASSES  = 5
LSTM_IN    = 1437     # nn.LSTM(1437, n_hidden) -> forces conv output 3*479
SEQ_IN     = 7680     # (7680 + 2*16 - 64)//16 + 1 = 479 ; 3*479 = 1437
BATCH      = 4
LANE       = 128


# ---------------------------------------------------------------------------
# Single fused Pallas kernel: conv1d + ReLU + LSTM + FC + log_softmax
# ---------------------------------------------------------------------------
def fused_net_kernel(xt_ref, wconv_ref, bconv_ref, w3_hbm, whh_ref, blstm_ref,
                     fcw_ref, fcb_ref, out_ref,
                     slab_scr, a_scr, w3_vmem, w3_sem):
    n_batch = out_ref.shape[0]                 # LSTM seq_len == original batch N
    n_cout  = wconv_ref.shape[1]               # 3 conv output channels
    n_shift = wconv_ref.shape[0]               # 4
    fp      = xt_ref.shape[1] // n_batch       # padded per-sample frame count (512)
    hid     = whh_ref.shape[0]                 # 32
    ax      = n_batch * fp                     # 2048 total lanes of the conv slab

    # Overlap the largest weight DMA (padded W_ih, bf16, ~384 KB) with the
    # conv stage: start now, wait just before the projection matmul.
    w3_cp = pltpu.make_async_copy(w3_hbm, w3_vmem, w3_sem)
    w3_cp.start()

    # ---- Conv1d as N_SHIFT lane-dense matmuls + shift-combine on the slab ----
    # part_s[o, n*fp + j] = sum_{c,r} w[o,c,16s+r] * x_pad[n, c, 16j + r]
    # conv[n,o,t]         = bias[o] + sum_s part_s[o, n*fp + t + s]
    x = xt_ref[...]                                                  # (96, N*fp) bf16
    slab_scr[...] = jnp.dot(wconv_ref[0], x,
                            preferred_element_type=jnp.float32)      # s = 0
    for s in range(1, n_shift):
        part = jnp.dot(wconv_ref[s], x, preferred_element_type=jnp.float32)
        # Lane-shifted accumulate; the s dropped tail lanes belong to the
        # zero-weighted frame-padding region (j >= 479) and are never consumed.
        slab_scr[:, :ax - s] = slab_scr[:, :ax - s] + part[:, s:]

    # conv bias + ReLU once on the whole (3, N*fp) slab
    slab_scr[...] = jnp.maximum(slab_scr[...] + bconv_ref[...], 0.0)

    # ---- relayout (3, N*fp) -> (N, 3*fp): 12 static, lane-aligned copies -----
    # a_scr[n, o*fp + j] = relu(conv)[n, o, j]   (j >= 479 is finite junk that
    # multiplies the zero-padded W_ih rows).
    for o in range(n_cout):
        for nb in range(n_batch):
            a_scr[nb:nb + 1, o * fp:(o + 1) * fp] = \
                slab_scr[o:o + 1, nb * fp:(nb + 1) * fp]

    # ---- hoisted LSTM input projection: ONE (N, 3*fp) @ (3*fp, 4H) bf16 matmul
    w3_cp.wait()
    gates_x = jnp.dot(a_scr[...].astype(jnp.bfloat16), w3_vmem[...],
                      preferred_element_type=jnp.float32) + blstm_ref[...]  # (N, 4H)

    # ---- LSTM recurrence (seq_len = N, batch = 1), fully unrolled -------------
    whh = whh_ref[...].astype(jnp.float32)                           # (H, 4H)
    h = jnp.zeros((1, hid), jnp.float32)
    c = jnp.zeros((1, hid), jnp.float32)
    hs = []
    for t in range(n_batch):
        g = gates_x[t:t + 1, :] + jnp.dot(h, whh,
                                          preferred_element_type=jnp.float32)
        sg = jax.nn.sigmoid(g)                 # one full-width EUP call
        th = jnp.tanh(g)                       # one full-width EUP call
        i_g = sg[:, 0 * hid:1 * hid]
        f_g = sg[:, 1 * hid:2 * hid]
        g_g = th[:, 2 * hid:3 * hid]
        o_g = sg[:, 3 * hid:4 * hid]
        c = f_g * c + i_g * g_g
        h = o_g * jnp.tanh(c)
        hs.append(h)
    h_all = jnp.concatenate(hs, axis=0)                              # (N, H)

    # ---- FC + masked log_softmax into a lane-dense (N, 128) output ------------
    logits = jnp.dot(h_all, fcw_ref[...].astype(jnp.float32),
                     preferred_element_type=jnp.float32) + fcb_ref[...]
    lane = jax.lax.broadcasted_iota(jnp.int32, logits.shape, 1)
    valid = lane < N_CLASSES
    zmax = jnp.max(jnp.where(valid, logits, -jnp.inf), axis=-1, keepdims=True)
    z = logits - zmax
    lse = jnp.log(jnp.sum(jnp.where(valid, jnp.exp(z), 0.0),
                          axis=-1, keepdims=True))
    out_ref[...] = z - lse


# ---------------------------------------------------------------------------
# Wrapper: minimal layout glue (bf16 cast + one pad + one transpose) + kernel
# ---------------------------------------------------------------------------
def net_forward(data, params):
    n, c, length = data.shape
    t_out = (length + 2 * PAD - KSIZE) // STRIDE + 1          # 479
    frames = t_out + N_SHIFT - 1                              # 482 valid frames
    frames_pad = ((frames + 127) // 128) * 128                # 512 (lane aligned)
    plen = frames_pad * STRIDE                                # 8192
    gate_w = 4 * N_HIDDEN

    # Transposed-frames layout in bf16:
    #   xt[c*16 + r, n*frames_pad + j] = x_pad[n, c, 16*j + r]
    # One pad + one transpose (XLA fuses them into a single copy).
    xb = data.astype(jnp.bfloat16)
    xp = jnp.pad(xb, ((0, 0), (0, 0), (PAD, plen - length - PAD)))
    xt = (xp.reshape(n, c, frames_pad, STRIDE)
            .transpose(1, 3, 0, 2)
            .reshape(c * STRIDE, n * frames_pad))             # (96, N*512) bf16

    # Conv weight as (N_SHIFT, 3, C*16): wconv[s, o, c*16 + r] = w[o, c, 16s + r]
    wconv = (params["conv_w"].reshape(CONV_OUT, c, N_SHIFT, STRIDE)
             .transpose(2, 0, 1, 3)
             .reshape(N_SHIFT, CONV_OUT, c * STRIDE)
             .astype(jnp.bfloat16))
    bconv = params["conv_b"].reshape(CONV_OUT, 1)             # (3, 1) f32

    # W_ih zero-padded per channel block 479 -> 512 rows, flattened to (1536, 128).
    w3 = params["w_ih_t"].reshape(CONV_OUT, t_out, gate_w)
    w3 = jnp.pad(w3, ((0, 0), (0, frames_pad - t_out), (0, 0)))
    w3 = w3.reshape(CONV_OUT * frames_pad, gate_w).astype(jnp.bfloat16)

    whh = params["w_hh_t"].astype(jnp.bfloat16)               # (32, 128)
    lstm_b = params["lstm_b"]                                 # (1, 128) f32
    fcw = jnp.pad(params["fc_w_t"],
                  ((0, 0), (0, LANE - N_CLASSES))).astype(jnp.bfloat16)  # (32, 128)
    fcb = jnp.pad(params["fc_b"][None, :], ((0, 0), (0, LANE - N_CLASSES)))

    def full_block(a):
        return pl.BlockSpec(a.shape, lambda i, nd=a.ndim: (0,) * nd)

    out = pl.pallas_call(
        fused_net_kernel,
        out_shape=jax.ShapeDtypeStruct((n, LANE), jnp.float32),
        grid=(1,),
        in_specs=[
            full_block(xt),                          # transposed frames (bf16)
            full_block(wconv),                       # conv weight (4, 3, 96) bf16
            full_block(bconv),                       # conv bias (3, 1) f32
            pl.BlockSpec(memory_space=pl.ANY),       # padded W_ih, manual DMA
            full_block(whh),                         # (32, 128) bf16
            full_block(lstm_b),                      # (1, 128) f32
            full_block(fcw),                         # (32, 128) bf16
            full_block(fcb),                         # (1, 128) f32
        ],
        out_specs=pl.BlockSpec((n, LANE), lambda i: (0, 0)),
        scratch_shapes=[
            pltpu.VMEM((CONV_OUT, n * frames_pad), jnp.float32),       # conv slab
            pltpu.VMEM((n, CONV_OUT * frames_pad), jnp.float32),       # proj LHS
            pltpu.VMEM((CONV_OUT * frames_pad, gate_w), jnp.bfloat16), # W_ih landing
            pltpu.SemaphoreType.DMA,                                   # W_ih DMA sem
        ],
        compiler_params=pltpu.CompilerParams(
            dimension_semantics=("arbitrary",)),
    )(xt, wconv, bconv, w3, whh, lstm_b, fcw, fcb)
    return out[:, :N_CLASSES]


# ---------------------------------------------------------------------------
# Pure-JAX reference (for correctness check only)
# ---------------------------------------------------------------------------
def _im2col_ref(data):
    n, c, length = data.shape
    x_pad = jnp.pad(data, ((0, 0), (0, 0), (PAD, PAD)))
    t_out = (length + 2 * PAD - KSIZE) // STRIDE + 1
    idx = (jnp.arange(t_out) * STRIDE)[:, None] + jnp.arange(KSIZE)[None, :]
    patches = x_pad[:, :, idx]                               # (N, C, T_out, K)
    patches = patches.transpose(0, 2, 1, 3).reshape(n * t_out, c * KSIZE)
    return patches, t_out


def net_reference(data, params):
    n, c, length = data.shape
    patches, t_out = _im2col_ref(data)
    conv = patches @ params["conv_w"].reshape(CONV_OUT, c * KSIZE).T + params["conv_b"][None, :]
    conv = jnp.maximum(conv, 0.0)
    x_seq = conv.reshape(n, t_out, CONV_OUT).transpose(0, 2, 1).reshape(n, 1, CONV_OUT * t_out)

    def step(carry, x_t):
        h, cc = carry
        gates = x_t @ params["w_ih_t"] + h @ params["w_hh_t"] + params["lstm_b"]
        H = N_HIDDEN
        i = jax.nn.sigmoid(gates[:, :H])
        f = jax.nn.sigmoid(gates[:, H:2 * H])
        g = jnp.tanh(gates[:, 2 * H:3 * H])
        o = jax.nn.sigmoid(gates[:, 3 * H:])
        cc = f * cc + i * g
        h = o * jnp.tanh(cc)
        return (h, cc), h

    h0 = jnp.zeros((1, N_HIDDEN), jnp.float32)
    _, hs = jax.lax.scan(step, (h0, h0), x_seq)
    h = hs.reshape(n, N_HIDDEN)
    logits = h @ params["fc_w_t"] + params["fc_b"][None, :]
    return jax.nn.log_softmax(logits, axis=1)


# ---------------------------------------------------------------------------
# Deterministic parameter init (PyTorch-style uniform fan-in scaling)
# ---------------------------------------------------------------------------
def init_params(key):
    ks = jax.random.split(key, 7)
    s_conv = 1.0 / np.sqrt(N_CHANNELS * KSIZE)
    conv_w = jax.random.uniform(ks[0], (CONV_OUT, N_CHANNELS, KSIZE), jnp.float32, -s_conv, s_conv)
    conv_b = jax.random.uniform(ks[1], (CONV_OUT,), jnp.float32, -s_conv, s_conv)
    s_lstm = 1.0 / np.sqrt(N_HIDDEN)
    w_ih = jax.random.uniform(ks[2], (4 * N_HIDDEN, LSTM_IN), jnp.float32, -s_lstm, s_lstm)
    w_hh = jax.random.uniform(ks[3], (4 * N_HIDDEN, N_HIDDEN), jnp.float32, -s_lstm, s_lstm)
    b_ih = jax.random.uniform(ks[4], (4 * N_HIDDEN,), jnp.float32, -s_lstm, s_lstm)
    b_hh = jax.random.uniform(ks[5], (4 * N_HIDDEN,), jnp.float32, -s_lstm, s_lstm)
    s_fc = 1.0 / np.sqrt(N_HIDDEN)
    fc_w = jax.random.uniform(ks[6], (N_CLASSES, N_HIDDEN), jnp.float32, -s_fc, s_fc)
    fc_b = jnp.zeros((N_CLASSES,), jnp.float32)
    return dict(
        conv_w=conv_w, conv_b=conv_b,
        w_ih_t=w_ih.T, w_hh_t=w_hh.T, lstm_b=(b_ih + b_hh)[None, :],
        fc_w_t=fc_w.T, fc_b=fc_b,
    )


if __name__ == "__main__":
    key = jax.random.PRNGKey(0)
    pkey, dkey = jax.random.split(key)
    params = init_params(pkey)
    # Shapes are pinned by the module itself: LSTM(1437, .) forces C=6, L=7680.
    data = jax.random.normal(dkey, (BATCH, N_CHANNELS, SEQ_IN), dtype=jnp.float32)

    out = jax.jit(net_forward)(data, params)
    out = jax.block_until_ready(out)

    ref = net_reference(data, params)
    # bf16 MXU operands (f32 accumulation / state): tolerance re-validated at 2e-2.
    np.testing.assert_allclose(np.asarray(out), np.asarray(ref), rtol=2e-2, atol=2e-2)

    print("KERNEL_OK")
</pallas_src>

<mosaic_0001>
module attributes {stable_mosaic.version = 11 : i64} {
  func.func @fused_net_kernel(%arg0: i32, %arg1: memref<96x2048xbf16, #tpu.memory_space<vmem>>, %arg2: memref<4x3x96xbf16, #tpu.memory_space<vmem>>, %arg3: memref<3x1xf32, #tpu.memory_space<vmem>>, %arg4: memref<1536x128xbf16, #tpu.memory_space<any>>, %arg5: memref<32x128xbf16, #tpu.memory_space<vmem>>, %arg6: memref<1x128xf32, #tpu.memory_space<vmem>>, %arg7: memref<32x128xbf16, #tpu.memory_space<vmem>>, %arg8: memref<1x128xf32, #tpu.memory_space<vmem>>, %arg9: memref<4x128xf32, #tpu.memory_space<vmem>>, %arg10: memref<3x2048xf32, #tpu.memory_space<vmem>>, %arg11: memref<4x1536xf32, #tpu.memory_space<vmem>>, %arg12: memref<1536x128xbf16, #tpu.memory_space<vmem>>, %arg13: memref<!tpu.dma_semaphore, #tpu.memory_space<semaphore_mem>>) attributes {dimension_semantics = [#tpu.dimension_semantics<arbitrary>], iteration_bounds = array<i64: 1>, scalar_prefetch = 0 : i64, scratch_operands = 4 : i64, tpu.core_type = #tpu.core_type<tc>, window_params = [{pipeline_mode = #tpu.pipeline_mode<synchronous>, transform_indices = @transform_0, window_bounds = array<i64: 96, 2048>}, {pipeline_mode = #tpu.pipeline_mode<synchronous>, transform_indices = @transform_1, window_bounds = array<i64: 4, 3, 96>}, {pipeline_mode = #tpu.pipeline_mode<synchronous>, transform_indices = @transform_2, window_bounds = array<i64: 3, 1>}, {}, {pipeline_mode = #tpu.pipeline_mode<synchronous>, transform_indices = @transform_4, window_bounds = array<i64: 32, 128>}, {pipeline_mode = #tpu.pipeline_mode<synchronous>, transform_indices = @transform_5, window_bounds = array<i64: 1, 128>}, {pipeline_mode = #tpu.pipeline_mode<synchronous>, transform_indices = @transform_6, window_bounds = array<i64: 32, 128>}, {pipeline_mode = #tpu.pipeline_mode<synchronous>, transform_indices = @transform_7, window_bounds = array<i64: 1, 128>}, {pipeline_mode = #tpu.pipeline_mode<synchronous>, transform_indices = @transform_8, window_bounds = array<i64: 4, 128>}]} {
    tpu.enqueue_dma source(%arg4 : memref<1536x128xbf16, #tpu.memory_space<any>>) target(%arg12 : memref<1536x128xbf16, #tpu.memory_space<vmem>>) target_semaphore(%arg13 : memref<!tpu.dma_semaphore, #tpu.memory_space<semaphore_mem>>)
    %c0 = arith.constant 0 : index
    %c0_0 = arith.constant 0 : index
    %0 = vector.load %arg1[%c0, %c0_0] : memref<96x2048xbf16, #tpu.memory_space<vmem>>, vector<96x2048xbf16>
    %c0_1 = arith.constant 0 : index
    %c0_2 = arith.constant 0 : index
    %c0_3 = arith.constant 0 : index
    %1 = vector.load %arg2[%c0_1, %c0_2, %c0_3] : memref<4x3x96xbf16, #tpu.memory_space<vmem>>, vector<1x3x96xbf16>
    %2 = vector.shape_cast %1 : vector<1x3x96xbf16> to vector<3x96xbf16>
    %cst = arith.constant dense<0.000000e+00> : vector<3x2048xf32>
    %3 = tpu.matmul %2, %0, %cst {dimension_numbers = #tpu.dot_dimension_numbers<[1], [0], [0], [1], [0, 0, 1, 1], [], []>} : vector<3x96xbf16>, vector<96x2048xbf16>, vector<3x2048xf32> -> vector<3x2048xf32>
    %c0_4 = arith.constant 0 : index
    %c0_5 = arith.constant 0 : index
    %4 = vector.load %arg10[%c0_4, %c0_5] : memref<3x2048xf32, #tpu.memory_space<vmem>>, vector<3x2048xf32>
    tpu.vector_store %arg10[%c0_4, %c0_5], %3 {strides = array<i32>} : memref<3x2048xf32, #tpu.memory_space<vmem>>, vector<3x2048xf32>,
    %c1 = arith.constant 1 : index
    %c0_6 = arith.constant 0 : index
    %c0_7 = arith.constant 0 : index
    %5 = vector.load %arg2[%c1, %c0_6, %c0_7] : memref<4x3x96xbf16, #tpu.memory_space<vmem>>, vector<1x3x96xbf16>
    %6 = vector.shape_cast %5 : vector<1x3x96xbf16> to vector<3x96xbf16>
    %cst_8 = arith.constant dense<0.000000e+00> : vector<3x2048xf32>
    %7 = tpu.matmul %6, %0, %cst_8 {dimension_numbers = #tpu.dot_dimension_numbers<[1], [0], [0], [1], [0, 0, 1, 1], [], []>} : vector<3x96xbf16>, vector<96x2048xbf16>, vector<3x2048xf32> -> vector<3x2048xf32>
    %c0_9 = arith.constant 0 : index
    %c0_10 = arith.constant 0 : index
    %8 = vector.load %arg10[%c0_9, %c0_10] : memref<3x2048xf32, #tpu.memory_space<vmem>>, vector<3x2047xf32>
    %9 = vector.extract_strided_slice %7 {offsets = [0, 1], sizes = [3, 2047], strides = [1, 1]} : vector<3x2048xf32> to vector<3x2047xf32>
    %10 = arith.addf %8, %9 : vector<3x2047xf32>
    %c0_11 = arith.constant 0 : index
    %c0_12 = arith.constant 0 : index
    %11 = vector.load %arg10[%c0_11, %c0_12] : memref<3x2048xf32, #tpu.memory_space<vmem>>, vector<3x2047xf32>
    tpu.vector_store %arg10[%c0_11, %c0_12], %10 {strides = array<i32>} : memref<3x2048xf32, #tpu.memory_space<vmem>>, vector<3x2047xf32>,
    %c2 = arith.constant 2 : index
    %c0_13 = arith.constant 0 : index
    %c0_14 = arith.constant 0 : index
    %12 = vector.load %arg2[%c2, %c0_13, %c0_14] : memref<4x3x96xbf16, #tpu.memory_space<vmem>>, vector<1x3x96xbf16>
    %13 = vector.shape_cast %12 : vector<1x3x96xbf16> to vector<3x96xbf16>
    %cst_15 = arith.constant dense<0.000000e+00> : vector<3x2048xf32>
    %14 = tpu.matmul %13, %0, %cst_15 {dimension_numbers = #tpu.dot_dimension_numbers<[1], [0], [0], [1], [0, 0, 1, 1], [], []>} : vector<3x96xbf16>, vector<96x2048xbf16>, vector<3x2048xf32> -> vector<3x2048xf32>
    %c0_16 = arith.constant 0 : index
    %c0_17 = arith.constant 0 : index
    %15 = vector.load %arg10[%c0_16, %c0_17] : memref<3x2048xf32, #tpu.memory_space<vmem>>, vector<3x2046xf32>
    %16 = vector.extract_strided_slice %14 {offsets = [0, 2], sizes = [3, 2046], strides = [1, 1]} : vector<3x2048xf32> to vector<3x2046xf32>
    %17 = arith.addf %15, %16 : vector<3x2046xf32>
    %c0_18 = arith.constant 0 : index
    %c0_19 = arith.constant 0 : index
    %18 = vector.load %arg10[%c0_18, %c0_19] : memref<3x2048xf32, #tpu.memory_space<vmem>>, vector<3x2046xf32>
    tpu.vector_store %arg10[%c0_18, %c0_19], %17 {strides = array<i32>} : memref<3x2048xf32, #tpu.memory_space<vmem>>, vector<3x2046xf32>,
    %c3 = arith.constant 3 : index
    %c0_20 = arith.constant 0 : index
    %c0_21 = arith.constant 0 : index
    %19 = vector.load %arg2[%c3, %c0_20, %c0_21] : memref<4x3x96xbf16, #tpu.memory_space<vmem>>, vector<1x3x96xbf16>
    %20 = vector.shape_cast %19 : vector<1x3x96xbf16> to vector<3x96xbf16>
    %cst_22 = arith.constant dense<0.000000e+00> : vector<3x2048xf32>
    %21 = tpu.matmul %20, %0, %cst_22 {dimension_numbers = #tpu.dot_dimension_numbers<[1], [0], [0], [1], [0, 0, 1, 1], [], []>} : vector<3x96xbf16>, vector<96x2048xbf16>, vector<3x2048xf32> -> vector<3x2048xf32>
    %c0_23 = arith.constant 0 : index
    %c0_24 = arith.constant 0 : index
    %22 = vector.load %arg10[%c0_23, %c0_24] : memref<3x2048xf32, #tpu.memory_space<vmem>>, vector<3x2045xf32>
    %23 = vector.extract_strided_slice %21 {offsets = [0, 3], sizes = [3, 2045], strides = [1, 1]} : vector<3x2048xf32> to vector<3x2045xf32>
    %24 = arith.addf %22, %23 : vector<3x2045xf32>
    %c0_25 = arith.constant 0 : index
    %c0_26 = arith.constant 0 : index
    %25 = vector.load %arg10[%c0_25, %c0_26] : memref<3x2048xf32, #tpu.memory_space<vmem>>, vector<3x2045xf32>
    tpu.vector_store %arg10[%c0_25, %c0_26], %24 {strides = array<i32>} : memref<3x2048xf32, #tpu.memory_space<vmem>>, vector<3x2045xf32>,
    %c0_27 = arith.constant 0 : index
    %c0_28 = arith.constant 0 : index
    %26 = vector.load %arg10[%c0_27, %c0_28] : memref<3x2048xf32, #tpu.memory_space<vmem>>, vector<3x2048xf32>
    %c0_29 = arith.constant 0 : index
    %c0_30 = arith.constant 0 : index
    %27 = vector.load %arg3[%c0_29, %c0_30] : memref<3x1xf32, #tpu.memory_space<vmem>>, vector<3x1xf32>
    %28 = vector.broadcast %27 : vector<3x1xf32> to vector<3x2048xf32>
    %29 = arith.addf %26, %28 : vector<3x2048xf32>
    %cst_31 = arith.constant 0.000000e+00 : f32
    %30 = vector.broadcast %cst_31 : f32 to vector<3x2048xf32>
    %31 = arith.maximumf %29, %30 : vector<3x2048xf32>
    %c0_32 = arith.constant 0 : index
    %c0_33 = arith.constant 0 : index
    %32 = vector.load %arg10[%c0_32, %c0_33] : memref<3x2048xf32, #tpu.memory_space<vmem>>, vector<3x2048xf32>
    tpu.vector_store %arg10[%c0_32, %c0_33], %31 {strides = array<i32>} : memref<3x2048xf32, #tpu.memory_space<vmem>>, vector<3x2048xf32>,
    %c0_34 = arith.constant 0 : index
    %c0_35 = arith.constant 0 : index
    %33 = vector.load %arg10[%c0_34, %c0_35] : memref<3x2048xf32, #tpu.memory_space<vmem>>, vector<1x512xf32>
    %c0_36 = arith.constant 0 : index
    %c0_37 = arith.constant 0 : index
    %34 = vector.load %arg11[%c0_36, %c0_37] : memref<4x1536xf32, #tpu.memory_space<vmem>>, vector<1x512xf32>
    tpu.vector_store %arg11[%c0_36, %c0_37], %33 {strides = array<i32>} : memref<4x1536xf32, #tpu.memory_space<vmem>>, vector<1x512xf32>,
    %c0_38 = arith.constant 0 : index
    %c512 = arith.constant 512 : index
    %35 = vector.load %arg10[%c0_38, %c512] : memref<3x2048xf32, #tpu.memory_space<vmem>>, vector<1x512xf32>
    %c1_39 = arith.constant 1 : index
    %c0_40 = arith.constant 0 : index
    %36 = vector.load %arg11[%c1_39, %c0_40] : memref<4x1536xf32, #tpu.memory_space<vmem>>, vector<1x512xf32>
    tpu.vector_store %arg11[%c1_39, %c0_40], %35 {strides = array<i32>} : memref<4x1536xf32, #tpu.memory_space<vmem>>, vector<1x512xf32>,
    %c0_41 = arith.constant 0 : index
    %c1024 = arith.constant 1024 : index
    %37 = vector.load %arg10[%c0_41, %c1024] : memref<3x2048xf32, #tpu.memory_space<vmem>>, vector<1x512xf32>
    %c2_42 = arith.constant 2 : index
    %c0_43 = arith.constant 0 : index
    %38 = vector.load %arg11[%c2_42, %c0_43] : memref<4x1536xf32, #tpu.memory_space<vmem>>, vector<1x512xf32>
    tpu.vector_store %arg11[%c2_42, %c0_43], %37 {strides = array<i32>} : memref<4x1536xf32, #tpu.memory_space<vmem>>, vector<1x512xf32>,
    %c0_44 = arith.constant 0 : index
    %c1536 = arith.constant 1536 : index
    %39 = vector.load %arg10[%c0_44, %c1536] : memref<3x2048xf32, #tpu.memory_space<vmem>>, vector<1x512xf32>
    %c3_45 = arith.constant 3 : index
    %c0_46 = arith.constant 0 : index
    %40 = vector.load %arg11[%c3_45, %c0_46] : memref<4x1536xf32, #tpu.memory_space<vmem>>, vector<1x512xf32>
    tpu.vector_store %arg11[%c3_45, %c0_46], %39 {strides = array<i32>} : memref<4x1536xf32, #tpu.memory_space<vmem>>, vector<1x512xf32>,
    %c1_47 = arith.constant 1 : index
    %c0_48 = arith.constant 0 : index
    %41 = vector.load %arg10[%c1_47, %c0_48] : memref<3x2048xf32, #tpu.memory_space<vmem>>, vector<1x512xf32>
    %c0_49 = arith.constant 0 : index
    %c512_50 = arith.constant 512 : index
    %42 = vector.load %arg11[%c0_49, %c512_50] : memref<4x1536xf32, #tpu.memory_space<vmem>>, vector<1x512xf32>
    tpu.vector_store %arg11[%c0_49, %c512_50], %41 {strides = array<i32>} : memref<4x1536xf32, #tpu.memory_space<vmem>>, vector<1x512xf32>,
    %c1_51 = arith.constant 1 : index
    %c512_52 = arith.constant 512 : index
    %43 = vector.load %arg10[%c1_51, %c512_52] : memref<3x2048xf32, #tpu.memory_space<vmem>>, vector<1x512xf32>
    %c1_53 = arith.constant 1 : index
    %c512_54 = arith.constant 512 : index
    %44 = vector.load %arg11[%c1_53, %c512_54] : memref<4x1536xf32, #tpu.memory_space<vmem>>, vector<1x512xf32>
    tpu.vector_store %arg11[%c1_53, %c512_54], %43 {strides = array<i32>} : memref<4x1536xf32, #tpu.memory_space<vmem>>, vector<1x512xf32>,
    %c1_55 = arith.constant 1 : index
    %c1024_56 = arith.constant 1024 : index
    %45 = vector.load %arg10[%c1_55, %c1024_56] : memref<3x2048xf32, #tpu.memory_space<vmem>>, vector<1x512xf32>
    %c2_57 = arith.constant 2 : index
    %c512_58 = arith.constant 512 : index
    %46 = vector.load %arg11[%c2_57, %c512_58] : memref<4x1536xf32, #tpu.memory_space<vmem>>, vector<1x512xf32>
    tpu.vector_store %arg11[%c2_57, %c512_58], %45 {strides = array<i32>} : memref<4x1536xf32, #tpu.memory_space<vmem>>, vector<1x512xf32>,
    %c1_59 = arith.constant 1 : index
    %c1536_60 = arith.constant 1536 : index
    %47 = vector.load %arg10[%c1_59, %c1536_60] : memref<3x2048xf32, #tpu.memory_space<vmem>>, vector<1x512xf32>
    %c3_61 = arith.constant 3 : index
    %c512_62 = arith.constant 512 : index
    %48 = vector.load %arg11[%c3_61, %c512_62] : memref<4x1536xf32, #tpu.memory_space<vmem>>, vector<1x512xf32>
    tpu.vector_store %arg11[%c3_61, %c512_62], %47 {strides = array<i32>} : memref<4x1536xf32, #tpu.memory_space<vmem>>, vector<1x512xf32>,
    %c2_63 = arith.constant 2 : index
    %c0_64 = arith.constant 0 : index
    %49 = vector.load %arg10[%c2_63, %c0_64] : memref<3x2048xf32, #tpu.memory_space<vmem>>, vector<1x512xf32>
    %c0_65 = arith.constant 0 : index
    %c1024_66 = arith.constant 1024 : index
    %50 = vector.load %arg11[%c0_65, %c1024_66] : memref<4x1536xf32, #tpu.memory_space<vmem>>, vector<1x512xf32>
    tpu.vector_store %arg11[%c0_65, %c1024_66], %49 {strides = array<i32>} : memref<4x1536xf32, #tpu.memory_space<vmem>>, vector<1x512xf32>,
    %c2_67 = arith.constant 2 : index
    %c512_68 = arith.constant 512 : index
    %51 = vector.load %arg10[%c2_67, %c512_68] : memref<3x2048xf32, #tpu.memory_space<vmem>>, vector<1x512xf32>
    %c1_69 = arith.constant 1 : index
    %c1024_70 = arith.constant 1024 : index
    %52 = vector.load %arg11[%c1_69, %c1024_70] : memref<4x1536xf32, #tpu.memory_space<vmem>>, vector<1x512xf32>
    tpu.vector_store %arg11[%c1_69, %c1024_70], %51 {strides = array<i32>} : memref<4x1536xf32, #tpu.memory_space<vmem>>, vector<1x512xf32>,
    %c2_71 = arith.constant 2 : index
    %c1024_72 = arith.constant 1024 : index
    %53 = vector.load %arg10[%c2_71, %c1024_72] : memref<3x2048xf32, #tpu.memory_space<vmem>>, vector<1x512xf32>
    %c2_73 = arith.constant 2 : index
    %c1024_74 = arith.constant 1024 : index
    %54 = vector.load %arg11[%c2_73, %c1024_74] : memref<4x1536xf32, #tpu.memory_space<vmem>>, vector<1x512xf32>
    tpu.vector_store %arg11[%c2_73, %c1024_74], %53 {strides = array<i32>} : memref<4x1536xf32, #tpu.memory_space<vmem>>, vector<1x512xf32>,
    %c2_75 = arith.constant 2 : index
    %c1536_76 = arith.constant 1536 : index
    %55 = vector.load %arg10[%c2_75, %c1536_76] : memref<3x2048xf32, #tpu.memory_space<vmem>>, vector<1x512xf32>
    %c3_77 = arith.constant 3 : index
    %c1024_78 = arith.constant 1024 : index
    %56 = vector.load %arg11[%c3_77, %c1024_78] : memref<4x1536xf32, #tpu.memory_space<vmem>>, vector<1x512xf32>
    tpu.vector_store %arg11[%c3_77, %c1024_78], %55 {strides = array<i32>} : memref<4x1536xf32, #tpu.memory_space<vmem>>, vector<1x512xf32>,
    tpu.wait_dma2 semaphore(%arg13 : memref<!tpu.dma_semaphore, #tpu.memory_space<semaphore_mem>>) src(%arg4 : memref<1536x128xbf16, #tpu.memory_space<any>>) dst(%arg12 : memref<1536x128xbf16, #tpu.memory_space<vmem>>)
    %c0_79 = arith.constant 0 : index
    %c0_80 = arith.constant 0 : index
    %57 = vector.load %arg11[%c0_79, %c0_80] : memref<4x1536xf32, #tpu.memory_space<vmem>>, vector<4x1536xf32>
    %58 = arith.truncf %57 : vector<4x1536xf32> to vector<4x1536xbf16>
    %c0_81 = arith.constant 0 : index
    %c0_82 = arith.constant 0 : index
    %59 = vector.load %arg12[%c0_81, %c0_82] : memref<1536x128xbf16, #tpu.memory_space<vmem>>, vector<1536x128xbf16>
    %cst_83 = arith.constant dense<0.000000e+00> : vector<4x128xf32>
    %60 = tpu.matmul %58, %59, %cst_83 {dimension_numbers = #tpu.dot_dimension_numbers<[1], [0], [0], [1], [0, 0, 1, 1], [], []>} : vector<4x1536xbf16>, vector<1536x128xbf16>, vector<4x128xf32> -> vector<4x128xf32>
    %c0_84 = arith.constant 0 : index
    %c0_85 = arith.constant 0 : index
    %61 = vector.load %arg6[%c0_84, %c0_85] : memref<1x128xf32, #tpu.memory_space<vmem>>, vector<1x128xf32>
    %62 = vector.broadcast %61 : vector<1x128xf32> to vector<4x128xf32>
    %63 = arith.addf %60, %62 : vector<4x128xf32>
    %c0_86 = arith.constant 0 : index
    %c0_87 = arith.constant 0 : index
    %64 = vector.load %arg5[%c0_86, %c0_87] : memref<32x128xbf16, #tpu.memory_space<vmem>>, vector<32x128xbf16>
    %65 = arith.extf %64 : vector<32x128xbf16> to vector<32x128xf32>
    %cst_88 = arith.constant 0.000000e+00 : f32
    %66 = vector.broadcast %cst_88 : f32 to vector<1x32xf32>
    %cst_89 = arith.constant 0.000000e+00 : f32
    %67 = vector.broadcast %cst_89 : f32 to vector<1x32xf32>
    %68 = vector.extract_strided_slice %63 {offsets = [0, 0], sizes = [1, 128], strides = [1, 1]} : vector<4x128xf32> to vector<1x128xf32>
    %cst_90 = arith.constant dense<0.000000e+00> : vector<1x128xf32>
    %69 = tpu.matmul %66, %65, %cst_90 {dimension_numbers = #tpu.dot_dimension_numbers<[1], [0], [0], [1], [0, 0, 1, 1], [], []>} : vector<1x32xf32>, vector<32x128xf32>, vector<1x128xf32> -> vector<1x128xf32>
    %70 = arith.addf %68, %69 : vector<1x128xf32>
    %71 = arith.negf %70 : vector<1x128xf32>
    %72 = math.exp %71 : vector<1x128xf32>
    %cst_91 = arith.constant 1.000000e+00 : f32
    %73 = vector.broadcast %cst_91 : f32 to vector<1x128xf32>
    %74 = arith.addf %73, %72 : vector<1x128xf32>
    %75 = arith.divf %73, %74 : vector<1x128xf32>
    %76 = math.tanh %70 : vector<1x128xf32>
    %77 = vector.extract_strided_slice %75 {offsets = [0, 0], sizes = [1, 32], strides = [1, 1]} : vector<1x128xf32> to vector<1x32xf32>
    %78 = vector.extract_strided_slice %75 {offsets = [0, 32], sizes = [1, 32], strides = [1, 1]} : vector<1x128xf32> to vector<1x32xf32>
    %79 = vector.extract_strided_slice %76 {offsets = [0, 64], sizes = [1, 32], strides = [1, 1]} : vector<1x128xf32> to vector<1x32xf32>
    %80 = vector.extract_strided_slice %75 {offsets = [0, 96], sizes = [1, 32], strides = [1, 1]} : vector<1x128xf32> to vector<1x32xf32>
    %81 = arith.mulf %78, %67 : vector<1x32xf32>
    %82 = arith.mulf %77, %79 : vector<1x32xf32>
    %83 = arith.addf %81, %82 : vector<1x32xf32>
    %84 = math.tanh %83 : vector<1x32xf32>
    %85 = arith.mulf %80, %84 : vector<1x32xf32>
    %86 = vector.extract_strided_slice %63 {offsets = [1, 0], sizes = [1, 128], strides = [1, 1]} : vector<4x128xf32> to vector<1x128xf32>
    %cst_92 = arith.constant dense<0.000000e+00> : vector<1x128xf32>
    %87 = tpu.matmul %85, %65, %cst_92 {dimension_numbers = #tpu.dot_dimension_numbers<[1], [0], [0], [1], [0, 0, 1, 1], [], []>} : vector<1x32xf32>, vector<32x128xf32>, vector<1x128xf32> -> vector<1x128xf32>
    %88 = arith.addf %86, %87 : vector<1x128xf32>
    %89 = arith.negf %88 : vector<1x128xf32>
    %90 = math.exp %89 : vector<1x128xf32>
    %cst_93 = arith.constant 1.000000e+00 : f32
    %91 = vector.broadcast %cst_93 : f32 to vector<1x128xf32>
    %92 = arith.addf %91, %90 : vector<1x128xf32>
    %93 = arith.divf %91, %92 : vector<1x128xf32>
    %94 = math.tanh %88 : vector<1x128xf32>
    %95 = vector.extract_strided_slice %93 {offsets = [0, 0], sizes = [1, 32], strides = [1, 1]} : vector<1x128xf32> to vector<1x32xf32>
    %96 = vector.extract_strided_slice %93 {offsets = [0, 32], sizes = [1, 32], strides = [1, 1]} : vector<1x128xf32> to vector<1x32xf32>
    %97 = vector.extract_strided_slice %94 {offsets = [0, 64], sizes = [1, 32], strides = [1, 1]} : vector<1x128xf32> to vector<1x32xf32>
    %98 = vector.extract_strided_slice %93 {offsets = [0, 96], sizes = [1, 32], strides = [1, 1]} : vector<1x128xf32> to vector<1x32xf32>
    %99 = arith.mulf %96, %83 : vector<1x32xf32>
    %100 = arith.mulf %95, %97 : vector<1x32xf32>
    %101 = arith.addf %99, %100 : vector<1x32xf32>
    %102 = math.tanh %101 : vector<1x32xf32>
    %103 = arith.mulf %98, %102 : vector<1x32xf32>
    %104 = vector.extract_strided_slice %63 {offsets = [2, 0], sizes = [1, 128], strides = [1, 1]} : vector<4x128xf32> to vector<1x128xf32>
    %cst_94 = arith.constant dense<0.000000e+00> : vector<1x128xf32>
    %105 = tpu.matmul %103, %65, %cst_94 {dimension_numbers = #tpu.dot_dimension_numbers<[1], [0], [0], [1], [0, 0, 1, 1], [], []>} : vector<1x32xf32>, vector<32x128xf32>, vector<1x128xf32> -> vector<1x128xf32>
    %106 = arith.addf %104, %105 : vector<1x128xf32>
    %107 = arith.negf %106 : vector<1x128xf32>
    %108 = math.exp %107 : vector<1x128xf32>
    %cst_95 = arith.constant 1.000000e+00 : f32
    %109 = vector.broadcast %cst_95 : f32 to vector<1x128xf32>
    %110 = arith.addf %109, %108 : vector<1x128xf32>
    %111 = arith.divf %109, %110 : vector<1x128xf32>
    %112 = math.tanh %106 : vector<1x128xf32>
    %113 = vector.extract_strided_slice %111 {offsets = [0, 0], sizes = [1, 32], strides = [1, 1]} : vector<1x128xf32> to vector<1x32xf32>
    %114 = vector.extract_strided_slice %111 {offsets = [0, 32], sizes = [1, 32], strides = [1, 1]} : vector<1x128xf32> to vector<1x32xf32>
    %115 = vector.extract_strided_slice %112 {offsets = [0, 64], sizes = [1, 32], strides = [1, 1]} : vector<1x128xf32> to vector<1x32xf32>
    %116 = vector.extract_strided_slice %111 {offsets = [0, 96], sizes = [1, 32], strides = [1, 1]} : vector<1x128xf32> to vector<1x32xf32>
    %117 = arith.mulf %114, %101 : vector<1x32xf32>
    %118 = arith.mulf %113, %115 : vector<1x32xf32>
    %119 = arith.addf %117, %118 : vector<1x32xf32>
    %120 = math.tanh %119 : vector<1x32xf32>
    %121 = arith.mulf %116, %120 : vector<1x32xf32>
    %122 = vector.extract_strided_slice %63 {offsets = [3, 0], sizes = [1, 128], strides = [1, 1]} : vector<4x128xf32> to vector<1x128xf32>
    %cst_96 = arith.constant dense<0.000000e+00> : vector<1x128xf32>
    %123 = tpu.matmul %121, %65, %cst_96 {dimension_numbers = #tpu.dot_dimension_numbers<[1], [0], [0], [1], [0, 0, 1, 1], [], []>} : vector<1x32xf32>, vector<32x128xf32>, vector<1x128xf32> -> vector<1x128xf32>
    %124 = arith.addf %122, %123 : vector<1x128xf32>
    %125 = arith.negf %124 : vector<1x128xf32>
    %126 = math.exp %125 : vector<1x128xf32>
    %cst_97 = arith.constant 1.000000e+00 : f32
    %127 = vector.broadcast %cst_97 : f32 to vector<1x128xf32>
    %128 = arith.addf %127, %126 : vector<1x128xf32>
    %129 = arith.divf %127, %128 : vector<1x128xf32>
    %130 = math.tanh %124 : vector<1x128xf32>
    %131 = vector.extract_strided_slice %129 {offsets = [0, 0], sizes = [1, 32], strides = [1, 1]} : vector<1x128xf32> to vector<1x32xf32>
    %132 = vector.extract_strided_slice %129 {offsets = [0, 32], sizes = [1, 32], strides = [1, 1]} : vector<1x128xf32> to vector<1x32xf32>
    %133 = vector.extract_strided_slice %130 {offsets = [0, 64], sizes = [1, 32], strides = [1, 1]} : vector<1x128xf32> to vector<1x32xf32>
    %134 = vector.extract_strided_slice %129 {offsets = [0, 96], sizes = [1, 32], strides = [1, 1]} : vector<1x128xf32> to vector<1x32xf32>
    %135 = arith.mulf %132, %119 : vector<1x32xf32>
    %136 = arith.mulf %131, %133 : vector<1x32xf32>
    %137 = arith.addf %135, %136 : vector<1x32xf32>
    %138 = math.tanh %137 : vector<1x32xf32>
    %139 = arith.mulf %134, %138 : vector<1x32xf32>
    %140 = tpu.concatenate %85, %103, %121, %139 in 0 : vector<1x32xf32>, vector<1x32xf32>, vector<1x32xf32>, vector<1x32xf32> -> vector<4x32xf32>
    %c0_98 = arith.constant 0 : index
    %c0_99 = arith.constant 0 : index
    %141 = vector.load %arg7[%c0_98, %c0_99] : memref<32x128xbf16, #tpu.memory_space<vmem>>, vector<32x128xbf16>
    %142 = arith.extf %141 : vector<32x128xbf16> to vector<32x128xf32>
    %cst_100 = arith.constant dense<0.000000e+00> : vector<4x128xf32>
    %143 = tpu.matmul %140, %142, %cst_100 {dimension_numbers = #tpu.dot_dimension_numbers<[1], [0], [0], [1], [0, 0, 1, 1], [], []>} : vector<4x32xf32>, vector<32x128xf32>, vector<4x128xf32> -> vector<4x128xf32>
    %c0_101 = arith.constant 0 : index
    %c0_102 = arith.constant 0 : index
    %144 = vector.load %arg8[%c0_101, %c0_102] : memref<1x128xf32, #tpu.memory_space<vmem>>, vector<1x128xf32>
    %145 = vector.broadcast %144 : vector<1x128xf32> to vector<4x128xf32>
    %146 = arith.addf %143, %145 : vector<4x128xf32>
    %147 = tpu.iota {dimensions = array<i32: 1>} : vector<4x128xi32>
    %c5_i32 = arith.constant 5 : i32
    %148 = vector.broadcast %c5_i32 : i32 to vector<4x128xi32>
    %149 = arith.cmpi slt, %147, %148 : vector<4x128xi32>
    %cst_103 = arith.constant 0xFF800000 : f32
    %150 = vector.broadcast %cst_103 : f32 to vector<4x128xf32>
    %151 = arith.select %149, %146, %150 : vector<4x128xi1>, vector<4x128xf32>
    %cst_104 = arith.constant dense<0xFF800000> : vector<4xf32>
    %152 = vector.multi_reduction <maximumf>, %151, %cst_104 [1] : vector<4x128xf32> to vector<4xf32>
    %153 = vector.shape_cast %152 : vector<4xf32> to vector<4x1xf32>
    %154 = vector.broadcast %153 : vector<4x1xf32> to vector<4x128xf32>
    %155 = arith.subf %146, %154 : vector<4x128xf32>
    %156 = math.exp %155 : vector<4x128xf32>
    %cst_105 = arith.constant 0.000000e+00 : f32
    %157 = vector.broadcast %cst_105 : f32 to vector<4x128xf32>
    %158 = arith.select %149, %156, %157 : vector<4x128xi1>, vector<4x128xf32>
    %cst_106 = arith.constant dense<0.000000e+00> : vector<4xf32>
    %159 = vector.multi_reduction <add>, %158, %cst_106 [1] : vector<4x128xf32> to vector<4xf32>
    %160 = vector.shape_cast %159 : vector<4xf32> to vector<4x1xf32>
    %161 = math.log %160 : vector<4x1xf32>
    %162 = vector.broadcast %161 : vector<4x1xf32> to vector<4x128xf32>
    %163 = arith.subf %155, %162 : vector<4x128xf32>
    %c0_107 = arith.constant 0 : index
    %c0_108 = arith.constant 0 : index
    %164 = vector.load %arg9[%c0_107, %c0_108] : memref<4x128xf32, #tpu.memory_space<vmem>>, vector<4x128xf32>
    tpu.vector_store %arg9[%c0_107, %c0_108], %163 {strides = array<i32>} : memref<4x128xf32, #tpu.memory_space<vmem>>, vector<4x128xf32>,
    return
  }
  func.func @transform_0(%arg0: i32) -> (i32, i32) {
    %c0_i32 = arith.constant 0 : i32
    %c0_i32_0 = arith.constant 0 : i32
    %c0_i32_1 = arith.constant 0 : i32
    return %c0_i32, %c0_i32_0 : i32, i32
  }
  func.func @transform_1(%arg0: i32) -> (i32, i32, i32) {
    %c0_i32 = arith.constant 0 : i32
    %c0_i32_0 = arith.constant 0 : i32
    %c0_i32_1 = arith.constant 0 : i32
    %c0_i32_2 = arith.constant 0 : i32
    return %c0_i32, %c0_i32_0, %c0_i32_1 : i32, i32, i32
  }
  func.func @transform_2(%arg0: i32) -> (i32, i32) {
    %c0_i32 = arith.constant 0 : i32
    %c0_i32_0 = arith.constant 0 : i32
    %c0_i32_1 = arith.constant 0 : i32
    return %c0_i32, %c0_i32_0 : i32, i32
  }
  func.func @transform_4(%arg0: i32) -> (i32, i32) {
    %c0_i32 = arith.constant 0 : i32
    %c0_i32_0 = arith.constant 0 : i32
    %c0_i32_1 = arith.constant 0 : i32
    return %c0_i32, %c0_i32_0 : i32, i32
  }
  func.func @transform_5(%arg0: i32) -> (i32, i32) {
    %c0_i32 = arith.constant 0 : i32
    %c0_i32_0 = arith.constant 0 : i32
    %c0_i32_1 = arith.constant 0 : i32
    return %c0_i32, %c0_i32_0 : i32, i32
  }
  func.func @transform_6(%arg0: i32) -> (i32, i32) {
    %c0_i32 = arith.constant 0 : i32
    %c0_i32_0 = arith.constant 0 : i32
    %c0_i32_1 = arith.constant 0 : i32
    return %c0_i32, %c0_i32_0 : i32, i32
  }
  func.func @transform_7(%arg0: i32) -> (i32, i32) {
    %c0_i32 = arith.constant 0 : i32
    %c0_i32_0 = arith.constant 0 : i32
    %c0_i32_1 = arith.constant 0 : i32
    return %c0_i32, %c0_i32_0 : i32, i32
  }
  func.func @transform_8(%arg0: i32) -> (i32, i32) {
    %c0_i32 = arith.constant 0 : i32
    %c0_i32_0 = arith.constant 0 : i32
    %c0_i32_1 = arith.constant 0 : i32
    return %c0_i32, %c0_i32_0 : i32, i32
  }
}

</mosaic_0001>

<bundles_post_ra>
// kernel: net_forward.1
= control target key start
LH: loop header
LB: loop body
LE: loop exit
PB: predicated region body
PF: predicated region fallthrough
CT: control target
= control target key end

     0   :  { %13 = vsyncpa [#allocation7], 0  ;;  %s5854_s0 = inlined_call_operand.vmem [shape: bf16[96,2048], index: 0, kind: input, shape index: {}]   ;;  %s5855_s1 = inlined_call_operand.vmem [shape: bf16[4,3,96], index: 1, kind: input, shape index: {}]   ;;  %s5856_s2 = inlined_call_operand.vmem [shape: f32[3,1], index: 2, kind: input, shape index: {}]   ;;  %s5857_s3 = inlined_call_operand.vmem [shape: bf16[1536,128], index: 3, kind: input, shape index: {}]   ;;  %s5858_s4 = inlined_call_operand.vmem [shape: bf16[32,128], index: 4, kind: input, shape index: {}]   ;;  %s5859_s5 = inlined_call_operand.vmem [shape: f32[1,128], index: 5, kind: input, shape index: {}]   ;;  %s5860_s6 = inlined_call_operand.vmem [shape: bf16[32,128], index: 6, kind: input, shape index: {}]   ;;  %s5861_s7 = inlined_call_operand.vmem [shape: f32[1,128], index: 7, kind: input, shape index: {}]   ;;  %s5862_s8 = inlined_call_operand.hbm [shape: f32[4,128], index: 8, kind: output, shape index: {}]  }
   0x1   :  { %v4092_v0 = vld [vmem:[%s5857_s3] sm:$0xff]  ;;  %v4097_v1 = vld [vmem:[%s5857_s3 + $0x8] sm:$0xff]  ;;  %v4102_v2 = vld [vmem:[%s5857_s3 + $0x10] sm:$0xff] }
   0x2   :  { %5975 = vst [vmem:[#allocation11_spill] sm:$0xff] %v4092_v0  ;;  %5976 = vst [vmem:[#allocation12_spill] sm:$0xff] %v4097_v1  ;;  %v4107_v3 = vld [vmem:[%s5857_s3 + $0x18] sm:$0xff]  ;;  %v4112_v4 = vld [vmem:[%s5857_s3 + $0x20] sm:$0xff] }
   0x3   :  { %5977 = vst [vmem:[#allocation13_spill] sm:$0xff] %v4102_v2  ;;  %5978 = vst [vmem:[#allocation14_spill] sm:$0xff] %v4107_v3  ;;  %v4117_v5 = vld [vmem:[%s5857_s3 + $0x28] sm:$0xff]  ;;  %v4122_v6 = vld [vmem:[%s5857_s3 + $0x30] sm:$0xff] }
   0x4   :  { %5979 = vst [vmem:[#allocation15_spill] sm:$0xff] %v4112_v4  ;;  %5980 = vst [vmem:[#allocation16_spill] sm:$0xff] %v4117_v5  ;;  %v4127_v7 = vld [vmem:[%s5857_s3 + $0x38] sm:$0xff]  ;;  %v4132_v8 = vld [vmem:[%s5857_s3 + $0x40] sm:$0xff] }
   0x5   :  { %5981 = vst [vmem:[#allocation17_spill] sm:$0xff] %v4122_v6  ;;  %5982 = vst [vmem:[#allocation18_spill] sm:$0xff] %v4127_v7  ;;  %v4137_v9 = vld [vmem:[%s5857_s3 + $0x48] sm:$0xff]  ;;  %v4142_v10 = vld [vmem:[%s5857_s3 + $0x50] sm:$0xff] }
   0x6   :  { %5983 = vst [vmem:[#allocation19_spill] sm:$0xff] %v4132_v8  ;;  %5984 = vst [vmem:[#allocation20_spill] sm:$0xff] %v4137_v9  ;;  %v4147_v11 = vld [vmem:[%s5857_s3 + $0x58] sm:$0xff]  ;;  %v4152_v12 = vld [vmem:[%s5857_s3 + $0x60] sm:$0xff] }
   0x7   :  { %5985 = vst [vmem:[#allocation21_spill] sm:$0xff] %v4142_v10  ;;  %5986 = vst [vmem:[#allocation22_spill] sm:$0xff] %v4147_v11  ;;  %v4157_v13 = vld [vmem:[%s5857_s3 + $0x68] sm:$0xff]  ;;  %v4162_v14 = vld [vmem:[%s5857_s3 + $0x70] sm:$0xff] }
   0x8   :  { %5987 = vst [vmem:[#allocation23_spill] sm:$0xff] %v4152_v12  ;;  %5988 = vst [vmem:[#allocation24_spill] sm:$0xff] %v4157_v13  ;;  %v4167_v15 = vld [vmem:[%s5857_s3 + $0x78] sm:$0xff]  ;;  %v4172_v16 = vld [vmem:[%s5857_s3 + $0x80] sm:$0xff] }
   0x9   :  { %5989 = vst [vmem:[#allocation25_spill] sm:$0xff] %v4162_v14  ;;  %5990 = vst [vmem:[#allocation26_spill] sm:$0xff] %v4167_v15  ;;  %v4177_v17 = vld [vmem:[%s5857_s3 + $0x88] sm:$0xff]  ;;  %v4182_v18 = vld [vmem:[%s5857_s3 + $0x90] sm:$0xff] }
   0xa   :  { %5991 = vst [vmem:[#allocation27_spill] sm:$0xff] %v4172_v16  ;;  %5992 = vst [vmem:[#allocation28_spill] sm:$0xff] %v4177_v17  ;;  %v4187_v19 = vld [vmem:[%s5857_s3 + $0x98] sm:$0xff]  ;;  %v4192_v20 = vld [vmem:[%s5857_s3 + $0xa0] sm:$0xff] }
   0xb   :  { %5993 = vst [vmem:[#allocation29_spill] sm:$0xff] %v4182_v18  ;;  %5994 = vst [vmem:[#allocation30_spill] sm:$0xff] %v4187_v19  ;;  %v4197_v21 = vld [vmem:[%s5857_s3 + $0xa8] sm:$0xff]  ;;  %v4202_v22 = vld [vmem:[%s5857_s3 + $0xb0] sm:$0xff] }
   0xc   :  { %5995 = vst [vmem:[#allocation31_spill] sm:$0xff] %v4192_v20  ;;  %5996 = vst [vmem:[#allocation32_spill] sm:$0xff] %v4197_v21  ;;  %v4207_v23 = vld [vmem:[%s5857_s3 + $0xb8] sm:$0xff]  ;;  %v4212_v24 = vld [vmem:[%s5857_s3 + $0xc0] sm:$0xff] }
   0xd   :  { %5997 = vst [vmem:[#allocation33_spill] sm:$0xff] %v4202_v22  ;;  %5998 = vst [vmem:[#allocation34_spill] sm:$0xff] %v4207_v23  ;;  %v4217_v25 = vld [vmem:[%s5857_s3 + $0xc8] sm:$0xff]  ;;  %v4222_v26 = vld [vmem:[%s5857_s3 + $0xd0] sm:$0xff] }
   0xe   :  { %5999 = vst [vmem:[#allocation35_spill] sm:$0xff] %v4212_v24  ;;  %6000 = vst [vmem:[#allocation36_spill] sm:$0xff] %v4217_v25  ;;  %v4227_v27 = vld [vmem:[%s5857_s3 + $0xd8] sm:$0xff]  ;;  %v4232_v28 = vld [vmem:[%s5857_s3 + $0xe0] sm:$0xff] }
   0xf   :  { %6001 = vst [vmem:[#allocation37_spill] sm:$0xff] %v4222_v26  ;;  %6002 = vst [vmem:[#allocation38_spill] sm:$0xff] %v4227_v27  ;;  %v4237_v29 = vld [vmem:[%s5857_s3 + $0xe8] sm:$0xff]  ;;  %v4242_v30 = vld [vmem:[%s5857_s3 + $0xf0] sm:$0xff] }
  0x10   :  { %6003 = vst [vmem:[#allocation39_spill] sm:$0xff] %v4232_v28  ;;  %6004 = vst [vmem:[#allocation40_spill] sm:$0xff] %v4237_v29  ;;  %v4247_v31 = vld [vmem:[%s5857_s3 + $0xf8] sm:$0xff]  ;;  %v4252_v32 = vld [vmem:[%s5857_s3 + $0x100] sm:$0xff] }
  0x11   :  { %6005 = vst [vmem:[#allocation41_spill] sm:$0xff] %v4242_v30  ;;  %6006 = vst [vmem:[#allocation42_spill] sm:$0xff] %v4247_v31  ;;  %v4257_v33 = vld [vmem:[%s5857_s3 + $0x108] sm:$0xff]  ;;  %v4262_v34 = vld [vmem:[%s5857_s3 + $0x110] sm:$0xff] }
  0x12   :  { %6007 = vst [vmem:[#allocation43_spill] sm:$0xff] %v4252_v32  ;;  %6008 = vst [vmem:[#allocation44_spill] sm:$0xff] %v4257_v33  ;;  %v4267_v35 = vld [vmem:[%s5857_s3 + $0x118] sm:$0xff]  ;;  %v4272_v36 = vld [vmem:[%s5857_s3 + $0x120] sm:$0xff] }
  0x13   :  { %6009 = vst [vmem:[#allocation45_spill] sm:$0xff] %v4262_v34  ;;  %6010 = vst [vmem:[#allocation46_spill] sm:$0xff] %v4267_v35  ;;  %v4277_v37 = vld [vmem:[%s5857_s3 + $0x128] sm:$0xff]  ;;  %v4282_v38 = vld [vmem:[%s5857_s3 + $0x130] sm:$0xff] }
  0x14   :  { %6011 = vst [vmem:[#allocation47_spill] sm:$0xff] %v4272_v36  ;;  %6012 = vst [vmem:[#allocation48_spill] sm:$0xff] %v4277_v37  ;;  %v4287_v39 = vld [vmem:[%s5857_s3 + $0x138] sm:$0xff]  ;;  %v4292_v40 = vld [vmem:[%s5857_s3 + $0x140] sm:$0xff] }
  0x15   :  { %6013 = vst [vmem:[#allocation49_spill] sm:$0xff] %v4282_v38  ;;  %6014 = vst [vmem:[#allocation50_spill] sm:$0xff] %v4287_v39  ;;  %v4297_v41 = vld [vmem:[%s5857_s3 + $0x148] sm:$0xff]  ;;  %v4302_v42 = vld [vmem:[%s5857_s3 + $0x150] sm:$0xff] }
  0x16   :  { %6015 = vst [vmem:[#allocation51_spill] sm:$0xff] %v4292_v40  ;;  %6016 = vst [vmem:[#allocation52_spill] sm:$0xff] %v4297_v41  ;;  %v4307_v43 = vld [vmem:[%s5857_s3 + $0x158] sm:$0xff]  ;;  %v4312_v44 = vld [vmem:[%s5857_s3 + $0x160] sm:$0xff] }
  0x17   :  { %6017 = vst [vmem:[#allocation53_spill] sm:$0xff] %v4302_v42  ;;  %6018 = vst [vmem:[#allocation54_spill] sm:$0xff] %v4307_v43  ;;  %v4317_v45 = vld [vmem:[%s5857_s3 + $0x168] sm:$0xff]  ;;  %v4322_v46 = vld [vmem:[%s5857_s3 + $0x170] sm:$0xff] }
  0x18   :  { %6019 = vst [vmem:[#allocation55_spill] sm:$0xff] %v4312_v44  ;;  %6020 = vst [vmem:[#allocation56_spill] sm:$0xff] %v4317_v45  ;;  %v4327_v47 = vld [vmem:[%s5857_s3 + $0x178] sm:$0xff]  ;;  %v4332_v48 = vld [vmem:[%s5857_s3 + $0x180] sm:$0xff] }
  0x19   :  { %6021 = vst [vmem:[#allocation57_spill] sm:$0xff] %v4322_v46  ;;  %6022 = vst [vmem:[#allocation58_spill] sm:$0xff] %v4327_v47  ;;  %v4337_v49 = vld [vmem:[%s5857_s3 + $0x188] sm:$0xff]  ;;  %v4342_v50 = vld [vmem:[%s5857_s3 + $0x190] sm:$0xff] }
  0x1a   :  { %6023 = vst [vmem:[#allocation59_spill] sm:$0xff] %v4332_v48  ;;  %6024 = vst [vmem:[#allocation60_spill] sm:$0xff] %v4337_v49  ;;  %v4347_v51 = vld [vmem:[%s5857_s3 + $0x198] sm:$0xff]  ;;  %v4352_v52 = vld [vmem:[%s5857_s3 + $0x1a0] sm:$0xff] }
  0x1b   :  { %6025 = vst [vmem:[#allocation61_spill] sm:$0xff] %v4342_v50  ;;  %6026 = vst [vmem:[#allocation62_spill] sm:$0xff] %v4347_v51  ;;  %v4357_v53 = vld [vmem:[%s5857_s3 + $0x1a8] sm:$0xff]  ;;  %v4362_v54 = vld [vmem:[%s5857_s3 + $0x1b0] sm:$0xff] }
  0x1c   :  { %6027 = vst [vmem:[#allocation63_spill] sm:$0xff] %v4352_v52  ;;  %6028 = vst [vmem:[#allocation64_spill] sm:$0xff] %v4357_v53  ;;  %v4367_v55 = vld [vmem:[%s5857_s3 + $0x1b8] sm:$0xff]  ;;  %v4372_v56 = vld [vmem:[%s5857_s3 + $0x1c0] sm:$0xff] }
  0x1d   :  { %6029 = vst [vmem:[#allocation65_spill] sm:$0xff] %v4362_v54  ;;  %6030 = vst [vmem:[#allocation66_spill] sm:$0xff] %v4367_v55  ;;  %v4377_v57 = vld [vmem:[%s5857_s3 + $0x1c8] sm:$0xff]  ;;  %v4382_v58 = vld [vmem:[%s5857_s3 + $0x1d0] sm:$0xff] }
  0x1e   :  { %6031 = vst [vmem:[#allocation67_spill] sm:$0xff] %v4372_v56  ;;  %6032 = vst [vmem:[#allocation68_spill] sm:$0xff] %v4377_v57  ;;  %v4387_v59 = vld [vmem:[%s5857_s3 + $0x1d8] sm:$0xff]  ;;  %v4392_v60 = vld [vmem:[%s5857_s3 + $0x1e0] sm:$0xff] }
  0x1f   :  { %6033 = vst [vmem:[#allocation69_spill] sm:$0xff] %v4382_v58  ;;  %6034 = vst [vmem:[#allocation70_spill] sm:$0xff] %v4387_v59  ;;  %v4397_v61 = vld [vmem:[%s5857_s3 + $0x1e8] sm:$0xff]  ;;  %v4402_v62 = vld [vmem:[%s5857_s3 + $0x1f0] sm:$0xff] }
  0x20   :  { %6035 = vst [vmem:[#allocation71_spill] sm:$0xff] %v4392_v60  ;;  %6036 = vst [vmem:[#allocation72_spill] sm:$0xff] %v4397_v61  ;;  %v4407_v63 = vld [vmem:[%s5857_s3 + $0x1f8] sm:$0xff]  ;;  %v4412_v55 = vld [vmem:[%s5857_s3 + $0x200] sm:$0xff] }
  0x21   :  { %6037 = vst [vmem:[#allocation73_spill] sm:$0xff] %v4402_v62  ;;  %6038 = vst [vmem:[#allocation74_spill] sm:$0xff] %v4407_v63  ;;  %v4417_v39 = vld [vmem:[%s5857_s3 + $0x208] sm:$0xff]  ;;  %v4422_v47 = vld [vmem:[%s5857_s3 + $0x210] sm:$0xff] }
  0x22   :  { %6039 = vst [vmem:[#allocation75_spill] sm:$0xff] %v4412_v55  ;;  %6040 = vst [vmem:[#allocation76_spill] sm:$0xff] %v4417_v39  ;;  %v4427_v54 = vld [vmem:[%s5857_s3 + $0x218] sm:$0xff]  ;;  %v4432_v63 = vld [vmem:[%s5857_s3 + $0x220] sm:$0xff] }
  0x23   :  { %6041 = vst [vmem:[#allocation77_spill] sm:$0xff] %v4422_v47  ;;  %6042 = vst [vmem:[#allocation78_spill] sm:$0xff] %v4427_v54  ;;  %v4437_v55 = vld [vmem:[%s5857_s3 + $0x228] sm:$0xff]  ;;  %v4442_v39 = vld [vmem:[%s5857_s3 + $0x230] sm:$0xff] }
  0x24   :  { %6043 = vst [vmem:[#allocation79_spill] sm:$0xff] %v4432_v63  ;;  %6044 = vst [vmem:[#allocation80_spill] sm:$0xff] %v4437_v55  ;;  %v4447_v47 = vld [vmem:[%s5857_s3 + $0x238] sm:$0xff]  ;;  %v4452_v54 = vld [vmem:[%s5857_s3 + $0x240] sm:$0xff] }
  0x25   :  { %6045 = vst [vmem:[#allocation81_spill] sm:$0xff] %v4442_v39  ;;  %6046 = vst [vmem:[#allocation82_spill] sm:$0xff] %v4447_v47  ;;  %v4457_v63 = vld [vmem:[%s5857_s3 + $0x248] sm:$0xff]  ;;  %v4462_v55 = vld [vmem:[%s5857_s3 + $0x250] sm:$0xff] }
  0x26   :  { %6047 = vst [vmem:[#allocation83_spill] sm:$0xff] %v4452_v54  ;;  %6048 = vst [vmem:[#allocation84_spill] sm:$0xff] %v4457_v63  ;;  %v4467_v39 = vld [vmem:[%s5857_s3 + $0x258] sm:$0xff]  ;;  %v4472_v47 = vld [vmem:[%s5857_s3 + $0x260] sm:$0xff] }
  0x27   :  { %6049 = vst [vmem:[#allocation85_spill] sm:$0xff] %v4462_v55  ;;  %6050 = vst [vmem:[#allocation86_spill] sm:$0xff] %v4467_v39  ;;  %v4477_v54 = vld [vmem:[%s5857_s3 + $0x268] sm:$0xff]  ;;  %v4482_v63 = vld [vmem:[%s5857_s3 + $0x270] sm:$0xff] }
  0x28   :  { %6051 = vst [vmem:[#allocation87_spill] sm:$0xff] %v4472_v47  ;;  %6052 = vst [vmem:[#allocation88_spill] sm:$0xff] %v4477_v54  ;;  %v4487_v55 = vld [vmem:[%s5857_s3 + $0x278] sm:$0xff]  ;;  %v4492_v39 = vld [vmem:[%s5857_s3 + $0x280] sm:$0xff] }
  0x29   :  { %6053 = vst [vmem:[#allocation89_spill] sm:$0xff] %v4482_v63  ;;  %6054 = vst [vmem:[#allocation90_spill] sm:$0xff] %v4487_v55  ;;  %v4497_v47 = vld [vmem:[%s5857_s3 + $0x288] sm:$0xff]  ;;  %v4502_v54 = vld [vmem:[%s5857_s3 + $0x290] sm:$0xff] }
  0x2a   :  { %6055 = vst [vmem:[#allocation91_spill] sm:$0xff] %v4492_v39  ;;  %6056 = vst [vmem:[#allocation92_spill] sm:$0xff] %v4497_v47  ;;  %v4507_v63 = vld [vmem:[%s5857_s3 + $0x298] sm:$0xff]  ;;  %v4512_v55 = vld [vmem:[%s5857_s3 + $0x2a0] sm:$0xff] }
  0x2b   :  { %6057 = vst [vmem:[#allocation93_spill] sm:$0xff] %v4502_v54  ;;  %6058 = vst [vmem:[#allocation94_spill] sm:$0xff] %v4507_v63  ;;  %v4517_v39 = vld [vmem:[%s5857_s3 + $0x2a8] sm:$0xff]  ;;  %v4522_v47 = vld [vmem:[%s5857_s3 + $0x2b0] sm:$0xff] }
  0x2c   :  { %6059 = vst [vmem:[#allocation95_spill] sm:$0xff] %v4512_v55  ;;  %6060 = vst [vmem:[#allocation96_spill] sm:$0xff] %v4517_v39  ;;  %v4527_v54 = vld [vmem:[%s5857_s3 + $0x2b8] sm:$0xff]  ;;  %v4532_v63 = vld [vmem:[%s5857_s3 + $0x2c0] sm:$0xff] }
  0x2d   :  { %6061 = vst [vmem:[#allocation97_spill] sm:$0xff] %v4522_v47  ;;  %6062 = vst [vmem:[#allocation98_spill] sm:$0xff] %v4527_v54  ;;  %v4537_v55 = vld [vmem:[%s5857_s3 + $0x2c8] sm:$0xff]  ;;  %v4542_v39 = vld [vmem:[%s5857_s3 + $0x2d0] sm:$0xff] }
  0x2e   :  { %6063 = vst [vmem:[#allocation99_spill] sm:$0xff] %v4532_v63  ;;  %6064 = vst [vmem:[#allocation100_spill] sm:$0xff] %v4537_v55  ;;  %v4547_v47 = vld [vmem:[%s5857_s3 + $0x2d8] sm:$0xff]  ;;  %v4552_v54 = vld [vmem:[%s5857_s3 + $0x2e0] sm:$0xff] }
  0x2f   :  { %6065 = vst [vmem:[#allocation101_spill] sm:$0xff] %v4542_v39  ;;  %6066 = vst [vmem:[#allocation102_spill] sm:$0xff] %v4547_v47  ;;  %v4557_v63 = vld [vmem:[%s5857_s3 + $0x2e8] sm:$0xff]  ;;  %v4562_v55 = vld [vmem:[%s5857_s3 + $0x2f0] sm:$0xff] }
  0x30   :  { %6067 = vst [vmem:[#allocation103_spill] sm:$0xff] %v4552_v54  ;;  %6068 = vst [vmem:[#allocation104_spill] sm:$0xff] %v4557_v63  ;;  %v4567_v39 = vld [vmem:[%s5857_s3 + $0x2f8] sm:$0xff] }
  0x31   :  { %6069 = vst [vmem:[#allocation105_spill] sm:$0xff] %v4562_v55  ;;  %6070 = vst [vmem:[#allocation106_spill] sm:$0xff] %v4567_v39 }
  0x32   :  { %260 = vsyncadd [#allocation5], 12288  ;;  %v261_v54 = vld [vmem:[%s5854_s0] sm:$0xff]  ;;  %v262_v55 = vld [vmem:[%s5854_s0 + $0x8] sm:$0xff]  ;;  %v5863_v46 = vmov 0   ;;  %vm838_vm0 = vcmask 785408  }
  0x33   :  { %v269_v47 = vld [vmem:[%s5854_s0 + $0x40] sm:$0xff]  ;;  %v270_v38 = vld [vmem:[%s5854_s0 + $0x48] sm:$0xff]  ;;  %874 = vmatprep.mubr.bf16.mxu0 %v5863_v46  ;;  %915 = vmatprep.mubr.bf16.mxu1 %v5863_v46  ;;  %v263_v56 = vld [vmem:[%s5854_s0 + $0x10] sm:$0xff]  ;;  %s4035_s13 = smov 126   ;;  %vm1599_vm1 = vcmask 1043456   ;;  %vm1601_vm2 = vcmask 1039360  }
  0x34   :  { %v4575_v63 = vcombine.high %v261_v54, %v269_v47  ;;  %v4583_v39 = vcombine.low %v261_v54, %v269_v47  ;;  %v277_v62 = vld [vmem:[%s5854_s0 + $0x80] sm:$0xff]  ;;  %v4590_v53 = vcombine.high %v262_v55, %v270_v38  ;;  %v4592_v37 = vcombine.low %v262_v55, %v270_v38  ;;  %v278_v47 = vld [vmem:[%s5854_s0 + $0x88] sm:$0xff]  ;;  %3964 = vset.pattern.permute.xlu0 %v5863_v46  ;;  %v279_v31 = vld [vmem:[%s5854_s0 + $0x90] sm:$0xff]  ;;  %s4036_s14 = smov 125  }
  0x35   :  { %v285_v61 = vld [vmem:[%s5854_s0 + $0xc0] sm:$0xff]  ;;  %v286_v54 = vld [vmem:[%s5854_s0 + $0xc8] sm:$0xff]  ;;  %v295_v14 = vld [vmem:[%s5854_s0 + $0x110] sm:$0xff]  ;;  %vm1639_vm3 = vcmask 1042432   ;;  %vm1640_vm4 = vcmask 1038340   ;;  %vm2033_vm6 = vcmask 1031168  }
  0x36   :  { %842 = vmatprep.subr.bf16.mxu0 %v4575_v63  ;;  %v4605_v45 = vcombine.high %v277_v62, %v285_v61  ;;  %v4607_v38 = vcombine.high %v278_v47, %v286_v54  ;;  %v293_v55 = vld [vmem:[%s5854_s0 + $0x100] sm:$0xff]  ;;  %v294_v36 = vld [vmem:[%s5854_s0 + $0x108] sm:$0xff]  ;;  %883 = vmatprep.subr.bf16.mxu1 %v4590_v53  ;;  %v4620_v46 = vcombine.low %v277_v62, %v285_v61  ;;  %v311_v13 = vld [vmem:[%s5854_s0 + $0x190] sm:$0xff]  ;;  %vm2071_vm7 = vcmask 1030148  }
  0x37   :  { %v301_v52 = vld [vmem:[%s5854_s0 + $0x140] sm:$0xff]  ;;  %843 = vmatpush1.bf16.msra.mxu0 %v4583_v39  ;;  %v302_v60 = vld [vmem:[%s5854_s0 + $0x148] sm:$0xff]  ;;  %884 = vmatpush1.bf16.msra.mxu1 %v4592_v37  ;;  %v4627_v44 = vcombine.low %v278_v47, %v286_v54  ;;  %v327_v19 = vld [vmem:[%s5854_s0 + $0x210] sm:$0xff]  ;;  %vm2464_vm9 = vcmask 1022976   ;;  %vm2502_vm10 = vcmask 1021956  }
  0x38   :  { %844 = vmatprep.subr.bf16.mxu0 %v4605_v45  ;;  %v4629_v51 = vcombine.high %v293_v55, %v301_v52  ;;  %885 = vmatprep.subr.bf16.mxu1 %v4607_v38  ;;  %v4632_v35 = vcombine.high %v294_v36, %v302_v60  ;;  %v309_v61 = vld [vmem:[%s5854_s0 + $0x180] sm:$0xff]  ;;  %v310_v59 = vld [vmem:[%s5854_s0 + $0x188] sm:$0xff]  ;;  %v4647_v54 = vcombine.low %v293_v55, %v301_v52  ;;  %v343_v18 = vld [vmem:[%s5854_s0 + $0x290] sm:$0xff] }
  0x39   :  { %v317_v62 = vld [vmem:[%s5854_s0 + $0x1c0] sm:$0xff]  ;;  %v318_v47 = vld [vmem:[%s5854_s0 + $0x1c8] sm:$0xff]  ;;  %v4651_v43 = vcombine.low %v294_v36, %v302_v60  ;;  %vm5578_vm5 = vmor %vm1640_vm4, %vm1639_vm3 }
  0x3a   :  { %v4653_v50 = vcombine.high %v309_v61, %v317_v62  ;;  %v4656_v34 = vcombine.high %v310_v59, %v318_v47  ;;  %v325_v58 = vld [vmem:[%s5854_s0 + $0x200] sm:$0xff]  ;;  %v326_v55 = vld [vmem:[%s5854_s0 + $0x208] sm:$0xff]  ;;  %v4671_v60 = vcombine.low %v309_v61, %v317_v62  ;;  %v4675_v42 = vcombine.low %v310_v59, %v318_v47  ;;  %vm2072_vm8 = vmor %vm2071_vm7, %vm1639_vm3 }
  0x3b   :  { %845 = vmatpush1.bf16.msra.mxu0 %v4620_v46  ;;  %886 = vmatpush1.bf16.msra.mxu1 %v4627_v44  ;;  %v333_v52 = vld [vmem:[%s5854_s0 + $0x240] sm:$0xff]  ;;  %v334_v36 = vld [vmem:[%s5854_s0 + $0x248] sm:$0xff]  ;;  %vm2503_vm11 = vmor %vm2502_vm10, %vm1639_vm3 }
  0x3c   :  { %846 = vmatprep.subr.bf16.mxu0 %v4629_v51  ;;  %887 = vmatprep.subr.bf16.mxu1 %v4632_v35  ;;  %v4677_v49 = vcombine.high %v325_v58, %v333_v52  ;;  %v4680_v33 = vcombine.high %v326_v55, %v334_v36  ;;  %v341_v57 = vld [vmem:[%s5854_s0 + $0x280] sm:$0xff]  ;;  %v342_v62 = vld [vmem:[%s5854_s0 + $0x288] sm:$0xff]  ;;  %v4695_v47 = vcombine.low %v325_v58, %v333_v52  ;;  %v271_v58 = vld [vmem:[%s5854_s0 + $0x50] sm:$0xff] }
  0x3d   :  { %v349_v61 = vld [vmem:[%s5854_s0 + $0x2c0] sm:$0xff]  ;;  %v350_v59 = vld [vmem:[%s5854_s0 + $0x2c8] sm:$0xff]  ;;  %v4699_v41 = vcombine.low %v326_v55, %v334_v36  ;;  %v264_v52 = vld [vmem:[%s5854_s0 + $0x18] sm:$0xff]  ;;  %v4725_v23 = vcombine.high %v263_v56, %v271_v58  ;;  %v4748_v15 = vcombine.low %v263_v56, %v271_v58 }
  0x3e   :  { %v4701_v48 = vcombine.high %v341_v57, %v349_v61  ;;  %v4704_v32 = vcombine.high %v342_v62, %v350_v59  ;;  %v272_v55 = vld [vmem:[%s5854_s0 + $0x58] sm:$0xff]  ;;  %v4719_v36 = vcombine.low %v341_v57, %v349_v61  ;;  %v4723_v40 = vcombine.low %v342_v62, %v350_v59  ;;  %v287_v57 = vld [vmem:[%s5854_s0 + $0xd0] sm:$0xff]  ;;  %v4746_v59 = vld [vmem:[%s5855_s1] sm:$0x3] }
  0x3f   :  { %847 = vmatpush1.bf16.msra.mxu0 %v4647_v54  ;;  %888 = vmatpush1.bf16.msra.mxu1 %v4651_v43  ;;  %v4728_v7 = vcombine.high %v264_v52, %v272_v55  ;;  %v280_v61 = vld [vmem:[%s5854_s0 + $0x98] sm:$0xff]  ;;  %6071 = vst [vmem:[#allocation107_spill] sm:$0xff] %v4748_v15  ;;  %v4752_v22 = vcombine.low %v264_v52, %v272_v55  ;;  %v303_v56 = vld [vmem:[%s5854_s0 + $0x150] sm:$0xff]  ;;  %v265_v17 = vld [vmem:[%s5854_s0 + $0x20] sm:$0xff] }
  0x40   :  { %848 = vmatprep.subr.bf16.mxu0 %v4653_v50  ;;  %889 = vmatprep.subr.bf16.mxu1 %v4656_v34  ;;  %v288_v62 = vld [vmem:[%s5854_s0 + $0xd8] sm:$0xff]  ;;  %v4754_v6 = vcombine.high %v279_v31, %v287_v57  ;;  %v4776_v55 = vcombine.low %v279_v31, %v287_v57  ;;  %v4782_v5 = vcombine.high %v295_v14, %v303_v56  ;;  %v319_v31 = vld [vmem:[%s5854_s0 + $0x1d0] sm:$0xff]  ;;  %v6079_v57 = vmov 0   ;;  %v281_v16 = vld [vmem:[%s5854_s0 + $0xa0] sm:$0xff] }
  0x41   :  { %6072 = vst [vmem:[#allocation108_spill] sm:$0xff] %v4752_v22  ;;  %v4757_v30 = vcombine.high %v280_v61, %v288_v62  ;;  %v296_v58 = vld [vmem:[%s5854_s0 + $0x118] sm:$0xff]  ;;  %v4780_v21 = vcombine.low %v280_v61, %v288_v62  ;;  %v4802_v20 = vcombine.low %v295_v14, %v303_v56  ;;  %v4808_v28 = vcombine.high %v311_v13, %v319_v31  ;;  %v335_v14 = vld [vmem:[%s5854_s0 + $0x250] sm:$0xff] }
  0x42   :  { %6073 = vst [vmem:[#allocation109_spill] sm:$0xff] %v4754_v6  ;;  %v304_v52 = vld [vmem:[%s5854_s0 + $0x158] sm:$0xff]  ;;  %6075 = vst [vmem:[#allocation111_spill] sm:$0xff] %v4776_v55  ;;  %v4832_v27 = vcombine.high %v327_v19, %v335_v14 }
  0x43   :  { %849 = vmatpush1.bf16.msra.mxu0 %v4671_v60  ;;  %890 = vmatpush1.bf16.msra.mxu1 %v4675_v42  ;;  %6074 = vst [vmem:[#allocation110_spill] sm:$0xff] %v4757_v30  ;;  %6076 = vst [vmem:[#allocation112_spill] sm:$0xff] %v4780_v21  ;;  %v4785_v29 = vcombine.high %v296_v58, %v304_v52  ;;  %v312_v61 = vld [vmem:[%s5854_s0 + $0x198] sm:$0xff]  ;;  %v4806_v4 = vcombine.low %v296_v58, %v304_v52 }
  0x44   :  { %850 = vmatprep.subr.bf16.mxu0 %v4677_v49  ;;  %891 = vmatprep.subr.bf16.mxu1 %v4680_v33  ;;  %6077 = vst [vmem:[#allocation113_spill] sm:$0xff] %v4782_v5  ;;  %v320_v62 = vld [vmem:[%s5854_s0 + $0x1d8] sm:$0xff]  ;;  %6080 = vst [vmem:[#allocation115_spill] sm:$0xff] %v4802_v20  ;;  %v4826_v52 = vcombine.low %v311_v13, %v319_v31  ;;  %v351_v13 = vld [vmem:[%s5854_s0 + $0x2d0] sm:$0xff] }
  0x45   :  { %6078 = vst [vmem:[#allocation114_spill] sm:$0xff] %v4785_v29  ;;  %6081 = vst [vmem:[#allocation116_spill] sm:$0xff] %v4806_v4  ;;  %v4811_v12 = vcombine.high %v312_v61, %v320_v62  ;;  %v328_v56 = vld [vmem:[%s5854_s0 + $0x218] sm:$0xff]  ;;  %v4830_v3 = vcombine.low %v312_v61, %v320_v62  ;;  %v4850_v62 = vcombine.low %v327_v19, %v335_v14  ;;  %v273_v19 = vld [vmem:[%s5854_s0 + $0x60] sm:$0xff] }
  0x46   :  { %6082 = vst [vmem:[#allocation117_spill] sm:$0xff] %v4808_v28  ;;  %v336_v58 = vld [vmem:[%s5854_s0 + $0x258] sm:$0xff]  ;;  %6084 = vst [vmem:[#allocation119_spill] sm:$0xff] %v4826_v52  ;;  %v4856_v26 = vcombine.high %v343_v18, %v351_v13  ;;  %v266_v14 = vld [vmem:[%s5854_s0 + $0x28] sm:$0xff]  ;;  %v4880_v25 = vcombine.high %v265_v17, %v273_v19 }
  0x47   :  { %851 = vmatpush1.bf16.msra.mxu0 %v4695_v47  ;;  %892 = vmatpush1.bf16.msra.mxu1 %v4699_v41  ;;  %6083 = vst [vmem:[#allocation118_spill] sm:$0xff] %v4811_v12  ;;  %6085 = vst [vmem:[#allocation120_spill] sm:$0xff] %v4830_v3  ;;  %v4835_v11 = vcombine.high %v328_v56, %v336_v58  ;;  %v344_v31 = vld [vmem:[%s5854_s0 + $0x298] sm:$0xff]  ;;  %v4854_v2 = vcombine.low %v328_v56, %v336_v58  ;;  %v274_v56 = vld [vmem:[%s5854_s0 + $0x68] sm:$0xff] }
  0x48   :  { %852 = vmatprep.subr.bf16.mxu0 %v4701_v48  ;;  %893 = vmatprep.subr.bf16.mxu1 %v4704_v32  ;;  %6086 = vst [vmem:[#allocation121_spill] sm:$0xff] %v4832_v27  ;;  %v352_v61 = vld [vmem:[%s5854_s0 + $0x2d8] sm:$0xff]  ;;  %6088 = vst [vmem:[#allocation123_spill] sm:$0xff] %v4850_v62  ;;  %v4874_v58 = vcombine.low %v343_v18, %v351_v13  ;;  %v4883_v9 = vcombine.high %v266_v14, %v274_v56  ;;  %v289_v18 = vld [vmem:[%s5854_s0 + $0xe0] sm:$0xff] }
  0x49   :  { %6087 = vst [vmem:[#allocation122_spill] sm:$0xff] %v4835_v11  ;;  %6089 = vst [vmem:[#allocation124_spill] sm:$0xff] %v4854_v2  ;;  %v4859_v10 = vcombine.high %v344_v31, %v352_v61  ;;  %v4878_v1 = vcombine.low %v344_v31, %v352_v61  ;;  %v282_v13 = vld [vmem:[%s5854_s0 + $0xa8] sm:$0xff]  ;;  %v4898_v61 = vcombine.low %v265_v17, %v273_v19  ;;  %v305_v17 = vld [vmem:[%s5854_s0 + $0x160] sm:$0xff] }
  0x4a   :  { %6090 = vst [vmem:[#allocation125_spill] sm:$0xff] %v4856_v26  ;;  %6092 = vst [vmem:[#allocation127_spill] sm:$0xff] %v4874_v58  ;;  %v290_v31 = vld [vmem:[%s5854_s0 + $0xe8] sm:$0xff]  ;;  %v4902_v0 = vcombine.low %v266_v14, %v274_v56  ;;  %v4904_v24 = vcombine.high %v281_v16, %v289_v18  ;;  %v4926_v56 = vcombine.low %v281_v16, %v289_v18  ;;  %v321_v16 = vld [vmem:[%s5854_s0 + $0x1e0] sm:$0xff] }
  0x4b   :  { %853 = vmatpush1.bf16.msra.mxu0 %v4719_v36  ;;  %894 = vmatpush1.bf16.msra.mxu1 %v4723_v40  ;;  %6091 = vst [vmem:[#allocation126_spill] sm:$0xff] %v4859_v10  ;;  %6093 = vst [vmem:[#allocation128_spill] sm:$0xff] %v4878_v1  ;;  %v4907_v8 = vcombine.high %v282_v13, %v290_v31  ;;  %v298_v19 = vld [vmem:[%s5854_s0 + $0x128] sm:$0xff] }
  0x4c   :  { %924 = vmatprep.subr.bf16.mxu0 %v4725_v23  ;;  %965 = vmatprep.subr.bf16.mxu1 %v4728_v7  ;;  %6094 = vst [vmem:[#allocation129_spill] sm:$0xff] %v4880_v25  ;;  %6095 = vst [vmem:[#allocation130_spill] sm:$0xff] %v4883_v9  ;;  %v306_v14 = vld [vmem:[%s5854_s0 + $0x168] sm:$0xff] }
  0x4d   :  { %6096 = vst [vmem:[#allocation131_spill] sm:$0xff] %v4898_v61  ;;  %6097 = vst [vmem:[#allocation132_spill] sm:$0xff] %v4902_v0  ;;  %v314_v18 = vld [vmem:[%s5854_s0 + $0x1a8] sm:$0xff] }
  0x4e   :  { %3647 = vmatmul.mubr.msk.bf16.vlgmr.msra.gmra.mrb[0].mxu0 %vm838_vm0, %v4746_v59  ;;  %3648 = vmatmul.mubr.msk.bf16.vlgmr.msra.gmra.mrb[0].mxu1 %vm838_vm0, %v4746_v59  ;;  %6098 = vst [vmem:[#allocation133_spill] sm:$0xff] %v4904_v24  ;;  %6099 = vst [vmem:[#allocation134_spill] sm:$0xff] %v4907_v8 }
  0x4f   :  { %925 = vmatpush1.bf16.msra.mxu0 %v4748_v15  ;;  %966 = vmatpush1.bf16.msra.mxu1 %v4752_v22  ;;  %6100 = vst [vmem:[#allocation135_spill] sm:$0xff] %v4926_v56 }
  0x50   :  { %926 = vmatprep.subr.bf16.mxu0 %v4754_v6  ;;  %967 = vmatprep.subr.bf16.mxu1 %v4757_v30 }
  0x51   :  { %956 = vmatprep.mubr.bf16.mxu0 %v6079_v57  ;;  %997 = vmatprep.mubr.bf16.mxu1 %v6079_v57 }
  0x53   :  { %927 = vmatpush1.bf16.msra.mxu0 %v4776_v55  ;;  %968 = vmatpush1.bf16.msra.mxu1 %v4780_v21 }
  0x54   :  { %928 = vmatprep.subr.bf16.mxu0 %v4782_v5  ;;  %969 = vmatprep.subr.bf16.mxu1 %v4785_v29 }
  0x57   :  { %929 = vmatpush1.bf16.msra.mxu0 %v4802_v20  ;;  %970 = vmatpush1.bf16.msra.mxu1 %v4806_v4 }
  0x58   :  { %930 = vmatprep.subr.bf16.mxu0 %v4808_v28  ;;  %971 = vmatprep.subr.bf16.mxu1 %v4811_v12 }
  0x5b   :  { %931 = vmatpush1.bf16.msra.mxu0 %v4826_v52  ;;  %972 = vmatpush1.bf16.msra.mxu1 %v4830_v3 }
  0x5c   :  { %932 = vmatprep.subr.bf16.mxu0 %v4832_v27  ;;  %973 = vmatprep.subr.bf16.mxu1 %v4835_v11 }
  0x5f   :  { %933 = vmatpush1.bf16.msra.mxu0 %v4850_v62  ;;  %974 = vmatpush1.bf16.msra.mxu1 %v4854_v2 }
  0x60   :  { %934 = vmatprep.subr.bf16.mxu0 %v4856_v26  ;;  %975 = vmatprep.subr.bf16.mxu1 %v4859_v10  ;;  %v297_v10 = vld [vmem:[%s5854_s0 + $0x120] sm:$0xff] }
  0x63   :  { %935 = vmatpush1.bf16.msra.mxu0 %v4874_v58  ;;  %976 = vmatpush1.bf16.msra.mxu1 %v4878_v1  ;;  %v4935_v1 = vcombine.high %v298_v19, %v306_v14  ;;  %v313_v58 = vld [vmem:[%s5854_s0 + $0x1a0] sm:$0xff] }
  0x64   :  { %1006 = vmatprep.subr.bf16.mxu0 %v4880_v25  ;;  %1047 = vmatprep.subr.bf16.mxu1 %v4883_v9  ;;  %v4930_v9 = vcombine.low %v282_v13, %v290_v31  ;;  %v4932_v25 = vcombine.high %v297_v10, %v305_v17  ;;  %v322_v13 = vld [vmem:[%s5854_s0 + $0x1e8] sm:$0xff]  ;;  %v4952_v31 = vcombine.low %v297_v10, %v305_v17  ;;  %v337_v10 = vld [vmem:[%s5854_s0 + $0x260] sm:$0xff] }
  0x65   :  { %6103 = vst [vmem:[#allocation138_spill] sm:$0xff] %v4935_v1  ;;  %v330_v17 = vld [vmem:[%s5854_s0 + $0x228] sm:$0xff] }
  0x66   :  { %3649 = vmatmul.mubr.msk.bf16.vlgmr.msra.gmra.mrb[4].mxu0 %vm838_vm0, %v4746_v59  ;;  %3650 = vmatmul.mubr.msk.bf16.vlgmr.msra.gmra.mrb[4].mxu1 %vm838_vm0, %v4746_v59  ;;  %6101 = vst [vmem:[#allocation136_spill] sm:$0xff] %v4930_v9  ;;  %6102 = vst [vmem:[#allocation137_spill] sm:$0xff] %v4932_v25 }
  0x67   :  { %1007 = vmatpush1.bf16.msra.mxu0 %v4898_v61  ;;  %1048 = vmatpush1.bf16.msra.mxu1 %v4902_v0  ;;  %6104 = vst [vmem:[#allocation139_spill] sm:$0xff] %v4952_v31  ;;  %v4961_v0 = vcombine.high %v314_v18, %v322_v13  ;;  %v329_v61 = vld [vmem:[%s5854_s0 + $0x220] sm:$0xff] }
  0x68   :  { %1008 = vmatprep.subr.bf16.mxu0 %v4904_v24  ;;  %1049 = vmatprep.subr.bf16.mxu1 %v4907_v8  ;;  %v4956_v8 = vcombine.low %v298_v19, %v306_v14  ;;  %v4958_v24 = vcombine.high %v313_v58, %v321_v16  ;;  %v338_v19 = vld [vmem:[%s5854_s0 + $0x268] sm:$0xff]  ;;  %v4976_v14 = vcombine.low %v313_v58, %v321_v16  ;;  %v353_v58 = vld [vmem:[%s5854_s0 + $0x2e0] sm:$0xff] }
  0x69   :  { %1038 = vmatprep.mubr.bf16.mxu0 %v6079_v57  ;;  %1079 = vmatprep.mubr.bf16.mxu1 %v6079_v57  ;;  %6107 = vst [vmem:[#allocation142_spill] sm:$0xff] %v4961_v0  ;;  %v346_v16 = vld [vmem:[%s5854_s0 + $0x2a8] sm:$0xff] }
  0x6a   :  { %6105 = vst [vmem:[#allocation140_spill] sm:$0xff] %v4956_v8  ;;  %6106 = vst [vmem:[#allocation141_spill] sm:$0xff] %v4958_v24 }
  0x6b   :  { %1009 = vmatpush1.bf16.msra.mxu0 %v4926_v56  ;;  %1050 = vmatpush1.bf16.msra.mxu1 %v4930_v9  ;;  %6108 = vst [vmem:[#allocation143_spill] sm:$0xff] %v4976_v14  ;;  %v4985_v9 = vcombine.high %v330_v17, %v338_v19  ;;  %v345_v56 = vld [vmem:[%s5854_s0 + $0x2a0] sm:$0xff] }
  0x6c   :  { %1010 = vmatprep.subr.bf16.mxu0 %v4932_v25  ;;  %1051 = vmatprep.subr.bf16.mxu1 %v4935_v1  ;;  %v4980_v1 = vcombine.low %v314_v18, %v322_v13  ;;  %v4982_v25 = vcombine.high %v329_v61, %v337_v10  ;;  %v354_v18 = vld [vmem:[%s5854_s0 + $0x2e8] sm:$0xff]  ;;  %v5000_v13 = vcombine.low %v329_v61, %v337_v10  ;;  %v275_v61 = vld [vmem:[%s5854_s0 + $0x70] sm:$0xff]  ;;  %v268_v10 = vld [vmem:[%s5854_s0 + $0x38] sm:$0xff] }
  0x6d   :  { %6111 = vst [vmem:[#allocation146_spill] sm:$0xff] %v4985_v9 }
  0x6e   :  { %6109 = vst [vmem:[#allocation144_spill] sm:$0xff] %v4980_v1  ;;  %6110 = vst [vmem:[#allocation145_spill] sm:$0xff] %v4982_v25 }
  0x6f   :  { %1011 = vmatpush1.bf16.msra.mxu0 %v4952_v31  ;;  %1052 = vmatpush1.bf16.msra.mxu1 %v4956_v8  ;;  %6112 = vst [vmem:[#allocation147_spill] sm:$0xff] %v5000_v13  ;;  %v5009_v8 = vcombine.high %v346_v16, %v354_v18  ;;  %v267_v31 = vld [vmem:[%s5854_s0 + $0x30] sm:$0xff] }
  0x70   :  { %1012 = vmatprep.subr.bf16.mxu0 %v4958_v24  ;;  %1053 = vmatprep.subr.bf16.mxu1 %v4961_v0  ;;  %v5004_v0 = vcombine.low %v330_v17, %v338_v19  ;;  %v5006_v24 = vcombine.high %v345_v56, %v353_v58  ;;  %v276_v17 = vld [vmem:[%s5854_s0 + $0x78] sm:$0xff]  ;;  %v5024_v19 = vcombine.low %v345_v56, %v353_v58  ;;  %v291_v56 = vld [vmem:[%s5854_s0 + $0xf0] sm:$0xff] }
  0x71   :  { %6115 = vst [vmem:[#allocation150_spill] sm:$0xff] %v5009_v8  ;;  %v284_v58 = vld [vmem:[%s5854_s0 + $0xb8] sm:$0xff] }
  0x72   :  { %6113 = vst [vmem:[#allocation148_spill] sm:$0xff] %v5004_v0  ;;  %6114 = vst [vmem:[#allocation149_spill] sm:$0xff] %v5006_v24 }
  0x73   :  { %1013 = vmatpush1.bf16.msra.mxu0 %v4976_v14  ;;  %1054 = vmatpush1.bf16.msra.mxu1 %v4980_v1  ;;  %6116 = vst [vmem:[#allocation151_spill] sm:$0xff] %v5024_v19  ;;  %v5033_v1 = vcombine.high %v268_v10, %v276_v17  ;;  %v283_v14 = vld [vmem:[%s5854_s0 + $0xb0] sm:$0xff] }
  0x74   :  { %1014 = vmatprep.subr.bf16.mxu0 %v4982_v25  ;;  %1055 = vmatprep.subr.bf16.mxu1 %v4985_v9  ;;  %v5028_v9 = vcombine.low %v346_v16, %v354_v18  ;;  %v5030_v25 = vcombine.high %v267_v31, %v275_v61  ;;  %v292_v16 = vld [vmem:[%s5854_s0 + $0xf8] sm:$0xff]  ;;  %v5048_v18 = vcombine.low %v267_v31, %v275_v61  ;;  %v307_v31 = vld [vmem:[%s5854_s0 + $0x170] sm:$0xff] }
  0x75   :  { %6119 = vst [vmem:[#allocation154_spill] sm:$0xff] %v5033_v1  ;;  %v300_v61 = vld [vmem:[%s5854_s0 + $0x138] sm:$0xff] }
  0x76   :  { %6117 = vst [vmem:[#allocation152_spill] sm:$0xff] %v5028_v9  ;;  %6118 = vst [vmem:[#allocation153_spill] sm:$0xff] %v5030_v25 }
  0x77   :  { %1015 = vmatpush1.bf16.msra.mxu0 %v5000_v13  ;;  %1056 = vmatpush1.bf16.msra.mxu1 %v5004_v0  ;;  %6120 = vst [vmem:[#allocation155_spill] sm:$0xff] %v5048_v18  ;;  %v5057_v0 = vcombine.high %v284_v58, %v292_v16  ;;  %v299_v13 = vld [vmem:[%s5854_s0 + $0x130] sm:$0xff] }
  0x78   :  { %1016 = vmatprep.subr.bf16.mxu0 %v5006_v24  ;;  %1057 = vmatprep.subr.bf16.mxu1 %v5009_v8  ;;  %v5052_v8 = vcombine.low %v268_v10, %v276_v17  ;;  %v5054_v24 = vcombine.high %v283_v14, %v291_v56  ;;  %v308_v10 = vld [vmem:[%s5854_s0 + $0x178] sm:$0xff]  ;;  %v5076_v17 = vcombine.low %v283_v14, %v291_v56  ;;  %v323_v14 = vld [vmem:[%s5854_s0 + $0x1f0] sm:$0xff] }
  0x79   :  { %6123 = vst [vmem:[#allocation158_spill] sm:$0xff] %v5057_v0  ;;  %v316_v56 = vld [vmem:[%s5854_s0 + $0x1b8] sm:$0xff] }
  0x7a   :  { %6121 = vst [vmem:[#allocation156_spill] sm:$0xff] %v5052_v8  ;;  %6122 = vst [vmem:[#allocation157_spill] sm:$0xff] %v5054_v24 }
  0x7b   :  { %1017 = vmatpush1.bf16.msra.mxu0 %v5024_v19  ;;  %1058 = vmatpush1.bf16.msra.mxu1 %v5028_v9  ;;  %6124 = vst [vmem:[#allocation159_spill] sm:$0xff] %v5076_v17  ;;  %v5085_v9 = vcombine.high %v300_v61, %v308_v10  ;;  %v315_v19 = vld [vmem:[%s5854_s0 + $0x1b0] sm:$0xff] }
  0x7c   :  { %1088 = vmatprep.subr.bf16.mxu0 %v5030_v25  ;;  %1129 = vmatprep.subr.bf16.mxu1 %v5033_v1  ;;  %v5080_v1 = vcombine.low %v284_v58, %v292_v16  ;;  %v5082_v25 = vcombine.high %v299_v13, %v307_v31  ;;  %v324_v58 = vld [vmem:[%s5854_s0 + $0x1f8] sm:$0xff]  ;;  %v5102_v16 = vcombine.low %v299_v13, %v307_v31  ;;  %v339_v13 = vld [vmem:[%s5854_s0 + $0x270] sm:$0xff] }
  0x7d   :  { %6127 = vst [vmem:[#allocation162_spill] sm:$0xff] %v5085_v9  ;;  %v332_v31 = vld [vmem:[%s5854_s0 + $0x238] sm:$0xff] }
  0x7e   :  { %3651 = vmatmul.mubr.msk.bf16.vlgmr.msra.gmra.mrb[8].mxu0 %vm838_vm0, %v4746_v59  ;;  %3652 = vmatmul.mubr.msk.bf16.vlgmr.msra.gmra.mrb[8].mxu1 %vm838_vm0, %v4746_v59  ;;  %6125 = vst [vmem:[#allocation160_spill] sm:$0xff] %v5080_v1  ;;  %6126 = vst [vmem:[#allocation161_spill] sm:$0xff] %v5082_v25 }
  0x7f   :  { %1089 = vmatpush1.bf16.msra.mxu0 %v5048_v18  ;;  %1130 = vmatpush1.bf16.msra.mxu1 %v5052_v8  ;;  %6128 = vst [vmem:[#allocation163_spill] sm:$0xff] %v5102_v16  ;;  %v5111_v8 = vcombine.high %v316_v56, %v324_v58  ;;  %v331_v18 = vld [vmem:[%s5854_s0 + $0x230] sm:$0xff] }
  0x80   :  { %1090 = vmatprep.subr.bf16.mxu0 %v5054_v24  ;;  %1131 = vmatprep.subr.bf16.mxu1 %v5057_v0  ;;  %v5106_v0 = vcombine.low %v300_v61, %v308_v10  ;;  %v5108_v24 = vcombine.high %v315_v19, %v323_v14  ;;  %v340_v61 = vld [vmem:[%s5854_s0 + $0x278] sm:$0xff]  ;;  %v5126_v10 = vcombine.low %v315_v19, %v323_v14  ;;  %v355_v19 = vld [vmem:[%s5854_s0 + $0x2f0] sm:$0xff] }
  0x81   :  { %1120 = vmatprep.mubr.bf16.mxu0 %v6079_v57  ;;  %1161 = vmatprep.mubr.bf16.mxu1 %v6079_v57  ;;  %6131 = vst [vmem:[#allocation166_spill] sm:$0xff] %v5111_v8  ;;  %v348_v14 = vld [vmem:[%s5854_s0 + $0x2b8] sm:$0xff] }
  0x82   :  { %6129 = vst [vmem:[#allocation164_spill] sm:$0xff] %v5106_v0  ;;  %6130 = vst [vmem:[#allocation165_spill] sm:$0xff] %v5108_v24 }
  0x83   :  { %1091 = vmatpush1.bf16.msra.mxu0 %v5076_v17  ;;  %1132 = vmatpush1.bf16.msra.mxu1 %v5080_v1  ;;  %v5135_v1 = vcombine.high %v332_v31, %v340_v61  ;;  %v347_v17 = vld [vmem:[%s5854_s0 + $0x2b0] sm:$0xff] }
  0x84   :  { %1092 = vmatprep.subr.bf16.mxu0 %v5082_v25  ;;  %1133 = vmatprep.subr.bf16.mxu1 %v5085_v9  ;;  %v5130_v9 = vcombine.low %v316_v56, %v324_v58  ;;  %v5132_v25 = vcombine.high %v331_v18, %v339_v13  ;;  %v356_v56 = vld [vmem:[%s5854_s0 + $0x2f8] sm:$0xff]  ;;  %v5150_v58 = vcombine.low %v331_v18, %v339_v13 }
  0x85   :  { %6133 = vst [vmem:[#allocation168_spill] sm:$0xff] %v5135_v1  ;;  %v5166_v18 = vcombine.low %v348_v14, %v356_v56  ;;  %v6136_v13 = vld [vmem:[#allocation127_spill] sm:$0xff] }
  0x86   :  { %6132 = vst [vmem:[#allocation167_spill] sm:$0xff] %v5132_v25 }
  0x87   :  { %1093 = vmatpush1.bf16.msra.mxu0 %v5102_v16  ;;  %1134 = vmatpush1.bf16.msra.mxu1 %v5106_v0  ;;  %v5159_v0 = vcombine.high %v348_v14, %v356_v56  ;;  %v5162_v16 = vcombine.low %v347_v17, %v355_v19  ;;  %v6140_v14 = vld [vmem:[#allocation131_spill] sm:$0xff]  ;;  %v6141_v56 = vld [vmem:[#allocation132_spill] sm:$0xff] }
  0x88   :  { %1094 = vmatprep.subr.bf16.mxu0 %v5108_v24  ;;  %1135 = vmatprep.subr.bf16.mxu1 %v5111_v8  ;;  %v5154_v8 = vcombine.low %v332_v31, %v340_v61  ;;  %v5156_v24 = vcombine.high %v347_v17, %v355_v19  ;;  %v6135_v17 = vld [vmem:[#allocation126_spill] sm:$0xff]  ;;  %v6137_v31 = vld [vmem:[#allocation128_spill] sm:$0xff]  ;;  %v6138_v61 = vld [vmem:[#allocation129_spill] sm:$0xff] }
  0x89   :  { %v6139_v19 = vld [vmem:[#allocation130_spill] sm:$0xff] }
  0x8a   :  { %6134 = vst [vmem:[#allocation169_spill] sm:$0xff] %v5156_v24 }
  0x8b   :  { %1095 = vmatpush1.bf16.msra.mxu0 %v5126_v10  ;;  %1136 = vmatpush1.bf16.msra.mxu1 %v5130_v9 }
  0x8c   :  { %1096 = vmatprep.subr.bf16.mxu0 %v5132_v25  ;;  %1137 = vmatprep.subr.bf16.mxu1 %v5135_v1 }
  0x8f   :  { %1097 = vmatpush1.bf16.msra.mxu0 %v5150_v58  ;;  %1138 = vmatpush1.bf16.msra.mxu1 %v5154_v8 }
  0x90   :  { %1098 = vmatprep.subr.bf16.mxu0 %v5156_v24  ;;  %1139 = vmatprep.subr.bf16.mxu1 %v5159_v0 }
  0x93   :  { %1099 = vmatpush1.bf16.msra.mxu0 %v5162_v16  ;;  %1140 = vmatpush1.bf16.msra.mxu1 %v5166_v18 }
  0x94   :  { %1215 = vmatprep.subr.bf16.mxu0 %v4575_v63  ;;  %1256 = vmatprep.subr.bf16.mxu1 %v4590_v53 }
  0x96   :  { %3653 = vmatmul.mubr.msk.bf16.vlgmr.msra.gmra.mrb[12].mxu0 %vm838_vm0, %v4746_v59  ;;  %3654 = vmatmul.mubr.msk.bf16.vlgmr.msra.gmra.mrb[12].mxu1 %vm838_vm0, %v4746_v59  ;;  %v5203_v59 = vld [vmem:[%s5855_s1 + $0x2] sm:$0x3] }
  0x97   :  { %1216 = vmatpush1.bf16.msra.mxu0 %v4583_v39  ;;  %1257 = vmatpush1.bf16.msra.mxu1 %v4592_v37 }
  0x98   :  { %1217 = vmatprep.subr.bf16.mxu0 %v4605_v45  ;;  %1258 = vmatprep.subr.bf16.mxu1 %v4607_v38 }
  0x99   :  { %1247 = vmatprep.mubr.bf16.mxu0 %v6079_v57  ;;  %1288 = vmatprep.mubr.bf16.mxu1 %v6079_v57 }
  0x9b   :  { %1218 = vmatpush1.bf16.msra.mxu0 %v4620_v46  ;;  %1259 = vmatpush1.bf16.msra.mxu1 %v4627_v44 }
  0x9c   :  { %1219 = vmatprep.subr.bf16.mxu0 %v4629_v51  ;;  %1260 = vmatprep.subr.bf16.mxu1 %v4632_v35 }
  0x9f   :  { %1220 = vmatpush1.bf16.msra.mxu0 %v4647_v54  ;;  %1261 = vmatpush1.bf16.msra.mxu1 %v4651_v43 }
  0xa0   :  { %1221 = vmatprep.subr.bf16.mxu0 %v4653_v50  ;;  %1262 = vmatprep.subr.bf16.mxu1 %v4656_v34 }
  0xa3   :  { %1222 = vmatpush1.bf16.msra.mxu0 %v4671_v60  ;;  %1263 = vmatpush1.bf16.msra.mxu1 %v4675_v42 }
  0xa4   :  { %1223 = vmatprep.subr.bf16.mxu0 %v4677_v49  ;;  %1264 = vmatprep.subr.bf16.mxu1 %v4680_v33 }
  0xa7   :  { %1224 = vmatpush1.bf16.msra.mxu0 %v4695_v47  ;;  %1265 = vmatpush1.bf16.msra.mxu1 %v4699_v41 }
  0xa8   :  { %1225 = vmatprep.subr.bf16.mxu0 %v4701_v48  ;;  %1266 = vmatprep.subr.bf16.mxu1 %v4704_v32 }
  0xab   :  { %1226 = vmatpush1.bf16.msra.mxu0 %v4719_v36  ;;  %1267 = vmatpush1.bf16.msra.mxu1 %v4723_v40 }
  0xac   :  { %1297 = vmatprep.subr.bf16.mxu0 %v4725_v23  ;;  %1338 = vmatprep.subr.bf16.mxu1 %v4728_v7 }
  0xae   :  { %3656 = vmatmul.mubr.msk.bf16.vlgmr.msra.gmra.mrb[16].mxu0 %vm838_vm0, %v5203_v59  ;;  %3657 = vmatmul.mubr.msk.bf16.vlgmr.msra.gmra.mrb[16].mxu1 %vm838_vm0, %v5203_v59 }
  0xaf   :  { %1298 = vmatpush1.bf16.msra.mxu0 %v4748_v15  ;;  %1339 = vmatpush1.bf16.msra.mxu1 %v4752_v22 }
  0xb0   :  { %1299 = vmatprep.subr.bf16.mxu0 %v4754_v6  ;;  %1340 = vmatprep.subr.bf16.mxu1 %v4757_v30 }
  0xb1   :  { %1329 = vmatprep.mubr.bf16.mxu0 %v6079_v57  ;;  %1370 = vmatprep.mubr.bf16.mxu1 %v6079_v57 }
  0xb3   :  { %1300 = vmatpush1.bf16.msra.mxu0 %v4776_v55  ;;  %1341 = vmatpush1.bf16.msra.mxu1 %v4780_v21 }
  0xb4   :  { %1301 = vmatprep.subr.bf16.mxu0 %v4782_v5  ;;  %1342 = vmatprep.subr.bf16.mxu1 %v4785_v29 }
  0xb7   :  { %1302 = vmatpush1.bf16.msra.mxu0 %v4802_v20  ;;  %1343 = vmatpush1.bf16.msra.mxu1 %v4806_v4 }
  0xb8   :  { %1303 = vmatprep.subr.bf16.mxu0 %v4808_v28  ;;  %1344 = vmatprep.subr.bf16.mxu1 %v4811_v12 }
  0xbb   :  { %1304 = vmatpush1.bf16.msra.mxu0 %v4826_v52  ;;  %1345 = vmatpush1.bf16.msra.mxu1 %v4830_v3 }
  0xbc   :  { %1305 = vmatprep.subr.bf16.mxu0 %v4832_v27  ;;  %1346 = vmatprep.subr.bf16.mxu1 %v4835_v11  ;;  %v6154_v11 = vld [vmem:[#allocation145_spill] sm:$0xff] }
  0xbf   :  { %1306 = vmatpush1.bf16.msra.mxu0 %v4850_v62  ;;  %1347 = vmatpush1.bf16.msra.mxu1 %v4854_v2  ;;  %v6148_v2 = vld [vmem:[#allocation139_spill] sm:$0xff]  ;;  %v6153_v62 = vld [vmem:[#allocation144_spill] sm:$0xff] }
  0xc0   :  { %1307 = vmatprep.subr.bf16.mxu0 %v4856_v26  ;;  %1348 = vmatprep.subr.bf16.mxu1 %v6135_v17  ;;  %v6142_v26 = vld [vmem:[#allocation133_spill] sm:$0xff]  ;;  %v6143_v17 = vld [vmem:[#allocation134_spill] sm:$0xff] }
  0xc3   :  { %1308 = vmatpush1.bf16.msra.mxu0 %v6136_v13  ;;  %1349 = vmatpush1.bf16.msra.mxu1 %v6137_v31  ;;  %v6146_v31 = vld [vmem:[#allocation137_spill] sm:$0xff]  ;;  %v6147_v13 = vld [vmem:[#allocation138_spill] sm:$0xff] }
  0xc4   :  { %1379 = vmatprep.subr.bf16.mxu0 %v6138_v61  ;;  %1420 = vmatprep.subr.bf16.mxu1 %v6139_v19  ;;  %v6144_v61 = vld [vmem:[#allocation135_spill] sm:$0xff]  ;;  %v6145_v19 = vld [vmem:[#allocation136_spill] sm:$0xff] }
  0xc6   :  { %3658 = vmatmul.mubr.msk.bf16.vlgmr.msra.gmra.mrb[20].mxu0 %vm838_vm0, %v5203_v59  ;;  %3659 = vmatmul.mubr.msk.bf16.vlgmr.msra.gmra.mrb[20].mxu1 %vm838_vm0, %v5203_v59 }
  0xc7   :  { %1380 = vmatpush1.bf16.msra.mxu0 %v6140_v14  ;;  %1421 = vmatpush1.bf16.msra.mxu1 %v6141_v56  ;;  %v6149_v14 = vld [vmem:[#allocation140_spill] sm:$0xff]  ;;  %v6150_v56 = vld [vmem:[#allocation141_spill] sm:$0xff] }
  0xc8   :  { %1381 = vmatprep.subr.bf16.mxu0 %v6142_v26  ;;  %1422 = vmatprep.subr.bf16.mxu1 %v6143_v17  ;;  %v6151_v26 = vld [vmem:[#allocation142_spill] sm:$0xff]  ;;  %v6152_v17 = vld [vmem:[#allocation143_spill] sm:$0xff] }
  0xc9   :  { %1411 = vmatprep.mubr.bf16.mxu0 %v6079_v57  ;;  %1452 = vmatprep.mubr.bf16.mxu1 %v6079_v57 }
  0xcb   :  { %1382 = vmatpush1.bf16.msra.mxu0 %v6144_v61  ;;  %1423 = vmatpush1.bf16.msra.mxu1 %v6145_v19  ;;  %v6155_v61 = vld [vmem:[#allocation146_spill] sm:$0xff]  ;;  %v6156_v19 = vld [vmem:[#allocation147_spill] sm:$0xff] }
  0xcc   :  { %1383 = vmatprep.subr.bf16.mxu0 %v6146_v31  ;;  %1424 = vmatprep.subr.bf16.mxu1 %v6147_v13  ;;  %v6157_v31 = vld [vmem:[#allocation148_spill] sm:$0xff]  ;;  %v6158_v13 = vld [vmem:[#allocation149_spill] sm:$0xff] }
  0xcf   :  { %1384 = vmatpush1.bf16.msra.mxu0 %v6148_v2  ;;  %1425 = vmatpush1.bf16.msra.mxu1 %v6149_v14  ;;  %v6159_v2 = vld [vmem:[#allocation150_spill] sm:$0xff]  ;;  %v6160_v14 = vld [vmem:[#allocation151_spill] sm:$0xff] }
  0xd0   :  { %1385 = vmatprep.subr.bf16.mxu0 %v6150_v56  ;;  %1426 = vmatprep.subr.bf16.mxu1 %v6151_v26  ;;  %v6161_v56 = vld [vmem:[#allocation152_spill] sm:$0xff]  ;;  %v6162_v26 = vld [vmem:[#allocation153_spill] sm:$0xff] }
  0xd3   :  { %1386 = vmatpush1.bf16.msra.mxu0 %v6152_v17  ;;  %1427 = vmatpush1.bf16.msra.mxu1 %v6153_v62  ;;  %v6163_v17 = vld [vmem:[#allocation154_spill] sm:$0xff] }
  0xd4   :  { %1387 = vmatprep.subr.bf16.mxu0 %v6154_v11  ;;  %1428 = vmatprep.subr.bf16.mxu1 %v6155_v61  ;;  %v6172_v61 = vld [vmem:[#allocation163_spill] sm:$0xff] }
  0xd7   :  { %1388 = vmatpush1.bf16.msra.mxu0 %v6156_v19  ;;  %1429 = vmatpush1.bf16.msra.mxu1 %v6157_v31  ;;  %v6164_v19 = vld [vmem:[#allocation155_spill] sm:$0xff]  ;;  %v6165_v31 = vld [vmem:[#allocation156_spill] sm:$0xff] }
  0xd8   :  { %1389 = vmatprep.subr.bf16.mxu0 %v6158_v13  ;;  %1430 = vmatprep.subr.bf16.mxu1 %v6159_v2  ;;  %v6166_v13 = vld [vmem:[#allocation157_spill] sm:$0xff]  ;;  %v6167_v2 = vld [vmem:[#allocation158_spill] sm:$0xff] }
  0xdb   :  { %1390 = vmatpush1.bf16.msra.mxu0 %v6160_v14  ;;  %1431 = vmatpush1.bf16.msra.mxu1 %v6161_v56  ;;  %v6170_v56 = vld [vmem:[#allocation161_spill] sm:$0xff]  ;;  %v6171_v14 = vld [vmem:[#allocation162_spill] sm:$0xff] }
  0xdc   :  { %1461 = vmatprep.subr.bf16.mxu0 %v6162_v26  ;;  %1502 = vmatprep.subr.bf16.mxu1 %v6163_v17  ;;  %v6168_v26 = vld [vmem:[#allocation159_spill] sm:$0xff]  ;;  %v6169_v17 = vld [vmem:[#allocation160_spill] sm:$0xff] }
  0xde   :  { %3660 = vmatmul.mubr.msk.bf16.vlgmr.msra.gmra.mrb[24].mxu0 %vm838_vm0, %v5203_v59  ;;  %3661 = vmatmul.mubr.msk.bf16.vlgmr.msra.gmra.mrb[24].mxu1 %vm838_vm0, %v5203_v59 }
  0xdf   :  { %1462 = vmatpush1.bf16.msra.mxu0 %v6164_v19  ;;  %1503 = vmatpush1.bf16.msra.mxu1 %v6165_v31  ;;  %v6173_v19 = vld [vmem:[#allocation164_spill] sm:$0xff]  ;;  %v6174_v31 = vld [vmem:[#allocation165_spill] sm:$0xff] }
  0xe0   :  { %1463 = vmatprep.subr.bf16.mxu0 %v6166_v13  ;;  %1504 = vmatprep.subr.bf16.mxu1 %v6167_v2  ;;  %v6175_v13 = vld [vmem:[#allocation166_spill] sm:$0xff] }
  0xe1   :  { %1493 = vmatprep.mubr.bf16.mxu0 %v6079_v57  ;;  %1534 = vmatprep.mubr.bf16.mxu1 %v6079_v57 }
  0xe3   :  { %1464 = vmatpush1.bf16.msra.mxu0 %v6168_v26  ;;  %1505 = vmatpush1.bf16.msra.mxu1 %v6169_v17 }
  0xe4   :  { %1465 = vmatprep.subr.bf16.mxu0 %v6170_v56  ;;  %1506 = vmatprep.subr.bf16.mxu1 %v6171_v14 }
  0xe7   :  { %1466 = vmatpush1.bf16.msra.mxu0 %v6172_v61  ;;  %1507 = vmatpush1.bf16.msra.mxu1 %v6173_v19 }
  0xe8   :  { %1467 = vmatprep.subr.bf16.mxu0 %v6174_v31  ;;  %1508 = vmatprep.subr.bf16.mxu1 %v6175_v13 }
  0xeb   :  { %1468 = vmatpush1.bf16.msra.mxu0 %v5126_v10  ;;  %1509 = vmatpush1.bf16.msra.mxu1 %v5130_v9 }
  0xec   :  { %1469 = vmatprep.subr.bf16.mxu0 %v5132_v25  ;;  %1510 = vmatprep.subr.bf16.mxu1 %v5135_v1 }
  0xef   :  { %1470 = vmatpush1.bf16.msra.mxu0 %v5150_v58  ;;  %1511 = vmatpush1.bf16.msra.mxu1 %v5154_v8 }
  0xf0   :  { %1471 = vmatprep.subr.bf16.mxu0 %v5156_v24  ;;  %1512 = vmatprep.subr.bf16.mxu1 %v5159_v0 }
  0xf3   :  { %1472 = vmatpush1.bf16.msra.mxu0 %v5162_v16  ;;  %1513 = vmatpush1.bf16.msra.mxu1 %v5166_v18 }
  0xf4   :  { %1648 = vmatprep.subr.bf16.mxu0 %v4575_v63  ;;  %1689 = vmatprep.subr.bf16.mxu1 %v4590_v53 }
  0xf6   :  { %3662 = vmatmul.mubr.msk.bf16.vlgmr.msra.gmra.mrb[28].mxu0 %vm838_vm0, %v5203_v59  ;;  %3663 = vmatmul.mubr.msk.bf16.vlgmr.msra.gmra.mrb[28].mxu1 %vm838_vm0, %v5203_v59  ;;  %v5328_v59 = vld [vmem:[%s5855_s1 + $0x4] sm:$0x3] }
  0xf7   :  { %1649 = vmatpush1.bf16.msra.mxu0 %v4583_v39  ;;  %1690 = vmatpush1.bf16.msra.mxu1 %v4592_v37 }
  0xf8   :  { %1650 = vmatprep.subr.bf16.mxu0 %v4605_v45  ;;  %1691 = vmatprep.subr.bf16.mxu1 %v4607_v38 }
  0xf9   :  { %1680 = vmatprep.mubr.bf16.mxu0 %v6079_v57  ;;  %1721 = vmatprep.mubr.bf16.mxu1 %v6079_v57 }
  0xfb   :  { %1651 = vmatpush1.bf16.msra.mxu0 %v4620_v46  ;;  %1692 = vmatpush1.bf16.msra.mxu1 %v4627_v44 }
  0xfc   :  { %1652 = vmatprep.subr.bf16.mxu0 %v4629_v51  ;;  %1693 = vmatprep.subr.bf16.mxu1 %v4632_v35 }
  0xff   :  { %1653 = vmatpush1.bf16.msra.mxu0 %v4647_v54  ;;  %1694 = vmatpush1.bf16.msra.mxu1 %v4651_v43 }
 0x100   :  { %1654 = vmatprep.subr.bf16.mxu0 %v4653_v50  ;;  %1695 = vmatprep.subr.bf16.mxu1 %v4656_v34 }
 0x103   :  { %1655 = vmatpush1.bf16.msra.mxu0 %v4671_v60  ;;  %1696 = vmatpush1.bf16.msra.mxu1 %v4675_v42 }
 0x104   :  { %1656 = vmatprep.subr.bf16.mxu0 %v4677_v49  ;;  %1697 = vmatprep.subr.bf16.mxu1 %v4680_v33 }
 0x107   :  { %1657 = vmatpush1.bf16.msra.mxu0 %v4695_v47  ;;  %1698 = vmatpush1.bf16.msra.mxu1 %v4699_v41 }
 0x108   :  { %1658 = vmatprep.subr.bf16.mxu0 %v4701_v48  ;;  %1699 = vmatprep.subr.bf16.mxu1 %v4704_v32 }
 0x10b   :  { %1659 = vmatpush1.bf16.msra.mxu0 %v4719_v36  ;;  %1700 = vmatpush1.bf16.msra.mxu1 %v4723_v40 }
 0x10c   :  { %1730 = vmatprep.subr.bf16.mxu0 %v4725_v23  ;;  %1771 = vmatprep.subr.bf16.mxu1 %v4728_v7 }
 0x10e   :  { %3665 = vmatmul.mubr.msk.bf16.vlgmr.msra.gmra.mrb[32].mxu0 %vm838_vm0, %v5328_v59  ;;  %3666 = vmatmul.mubr.msk.bf16.vlgmr.msra.gmra.mrb[32].mxu1 %vm838_vm0, %v5328_v59 }
 0x10f   :  { %1731 = vmatpush1.bf16.msra.mxu0 %v4748_v15  ;;  %1772 = vmatpush1.bf16.msra.mxu1 %v4752_v22  ;;  %v6182_v22 = vld [vmem:[#allocation128_spill] sm:$0xff] }
 0x110   :  { %1732 = vmatprep.subr.bf16.mxu0 %v4754_v6  ;;  %1773 = vmatprep.subr.bf16.mxu1 %v4757_v30 }
 0x111   :  { %1762 = vmatprep.mubr.bf16.mxu0 %v6079_v57  ;;  %1803 = vmatprep.mubr.bf16.mxu1 %v6079_v57 }
 0x113   :  { %1733 = vmatpush1.bf16.msra.mxu0 %v4776_v55  ;;  %1774 = vmatpush1.bf16.msra.mxu1 %v4780_v21  ;;  %v6176_v55 = vld [vmem:[#allocation122_spill] sm:$0xff]  ;;  %v6177_v21 = vld [vmem:[#allocation123_spill] sm:$0xff] }
 0x114   :  { %1734 = vmatprep.subr.bf16.mxu0 %v4782_v5  ;;  %1775 = vmatprep.subr.bf16.mxu1 %v4785_v29  ;;  %v6178_v5 = vld [vmem:[#allocation124_spill] sm:$0xff]  ;;  %v6179_v29 = vld [vmem:[#allocation125_spill] sm:$0xff] }
 0x117   :  { %1735 = vmatpush1.bf16.msra.mxu0 %v4802_v20  ;;  %1776 = vmatpush1.bf16.msra.mxu1 %v4806_v4  ;;  %v6180_v4 = vld [vmem:[#allocation126_spill] sm:$0xff] }
 0x118   :  { %1736 = vmatprep.subr.bf16.mxu0 %v4808_v28  ;;  %1777 = vmatprep.subr.bf16.mxu1 %v4811_v12 }
 0x11b   :  { %1737 = vmatpush1.bf16.msra.mxu0 %v4826_v52  ;;  %1778 = vmatpush1.bf16.msra.mxu1 %v4830_v3  ;;  %v6181_v52 = vld [vmem:[#allocation127_spill] sm:$0xff] }
 0x11c   :  { %1738 = vmatprep.subr.bf16.mxu0 %v4832_v27  ;;  %1779 = vmatprep.subr.bf16.mxu1 %v6176_v55 }
 0x11f   :  { %1739 = vmatpush1.bf16.msra.mxu0 %v6177_v21  ;;  %1780 = vmatpush1.bf16.msra.mxu1 %v6178_v5  ;;  %v6183_v21 = vld [vmem:[#allocation129_spill] sm:$0xff]  ;;  %v6184_v5 = vld [vmem:[#allocation130_spill] sm:$0xff] }
 0x120   :  { %1740 = vmatprep.subr.bf16.mxu0 %v6179_v29  ;;  %1781 = vmatprep.subr.bf16.mxu1 %v6180_v4 }
 0x121   :  { %v876_v20 = vpop.f32.mrb[0].mxu0  ;;  %v917_v30 = vpop.f32.mrb[0].mxu1 }
 0x122   :  { %v878_v28 = vpop.f32.mrb[1].mxu0  ;;  %v919_v3 = vpop.f32.mrb[1].mxu1 }
 0x123   :  { %v1186_v12 = vcombine.low %v876_v20, %v878_v28  ;;  %v880_v6 = vpop.f32.mrb[2].mxu0  ;;  %1741 = vmatpush1.bf16.msra.mxu0 %v6181_v52  ;;  %1782 = vmatpush1.bf16.msra.mxu1 %v6182_v22  ;;  %v1187_v55 = vcombine.low %v917_v30, %v919_v3  ;;  %v921_v15 = vpop.f32.mrb[2].mxu1  ;;  %v6186_v20 = vld [vmem:[#allocation132_spill] sm:$0xff]  ;;  %v6188_v3 = vld [vmem:[#allocation134_spill] sm:$0xff]  ;;  %v6191_v28 = vld [vmem:[#allocation137_spill] sm:$0xff] }
 0x124   :  { %v881_v27 = vpop.f32.mrb[3].mxu0  ;;  %1812 = vmatprep.subr.bf16.mxu0 %v6183_v21  ;;  %1853 = vmatprep.subr.bf16.mxu1 %v6184_v5  ;;  %v922_v29 = vpop.f32.mrb[3].mxu1  ;;  %v6185_v6 = vld [vmem:[#allocation131_spill] sm:$0xff]  ;;  %v6190_v15 = vld [vmem:[#allocation136_spill] sm:$0xff] }
 0x125   :  { %1202 = vst [vmem:[#allocation2] sm:$0x77] %v1186_v12  ;;  %1203 = vst [vmem:[#allocation2 + $0x8] sm:$0x77] %v1187_v55  ;;  %v6187_v27 = vld [vmem:[#allocation133_spill] sm:$0xff]  ;;  %v6189_v12 = vld [vmem:[#allocation135_spill] sm:$0xff] }
 0x126   :  { %3667 = vmatmul.mubr.msk.bf16.vlgmr.msra.gmra.mrb[36].mxu0 %vm838_vm0, %v5328_v59  ;;  %3668 = vmatmul.mubr.msk.bf16.vlgmr.msra.gmra.mrb[36].mxu1 %vm838_vm0, %v5328_v59  ;;  %v6192_v29 = vld [vmem:[#allocation138_spill] sm:$0xff]  ;;  %v6193_v30 = vld [vmem:[#allocation139_spill] sm:$0xff]  ;;  %v6194_v55 = vld [vmem:[#allocation140_spill] sm:$0xff] }
 0x127   :  { %1813 = vmatpush1.bf16.msra.mxu0 %v6185_v6  ;;  %1854 = vmatpush1.bf16.msra.mxu1 %v6186_v20  ;;  %v6195_v20 = vld [vmem:[#allocation141_spill] sm:$0xff]  ;;  %v6204_v21 = vld [vmem:[#allocation152_spill] sm:$0xff] }
 0x128   :  { %1814 = vmatprep.subr.bf16.mxu0 %v6187_v27  ;;  %1855 = vmatprep.subr.bf16.mxu1 %v6188_v3  ;;  %v6196_v27 = vld [vmem:[#allocation142_spill] sm:$0xff]  ;;  %v6197_v3 = vld [vmem:[#allocation143_spill] sm:$0xff] }
 0x129   :  { %1844 = vmatprep.mubr.bf16.mxu0 %v6079_v57  ;;  %1885 = vmatprep.mubr.bf16.mxu1 %v6079_v57 }
 0x12b   :  { %1815 = vmatpush1.bf16.msra.mxu0 %v6189_v12  ;;  %1856 = vmatpush1.bf16.msra.mxu1 %v6190_v15  ;;  %v6198_v12 = vld [vmem:[#allocation146_spill] sm:$0xff]  ;;  %v6199_v15 = vld [vmem:[#allocation147_spill] sm:$0xff] }
 0x12c   :  { %1816 = vmatprep.subr.bf16.mxu0 %v6191_v28  ;;  %1857 = vmatprep.subr.bf16.mxu1 %v6192_v29  ;;  %v6200_v28 = vld [vmem:[#allocation148_spill] sm:$0xff]  ;;  %v6201_v29 = vld [vmem:[#allocation149_spill] sm:$0xff] }
 0x12f   :  { %1817 = vmatpush1.bf16.msra.mxu0 %v6193_v30  ;;  %1858 = vmatpush1.bf16.msra.mxu1 %v6194_v55  ;;  %v6202_v55 = vld [vmem:[#allocation150_spill] sm:$0xff] }
 0x130   :  { %1818 = vmatprep.subr.bf16.mxu0 %v6195_v20  ;;  %1859 = vmatprep.subr.bf16.mxu1 %v6196_v27 }
 0x133   :  { %1819 = vmatpush1.bf16.msra.mxu0 %v6197_v3  ;;  %1860 = vmatpush1.bf16.msra.mxu1 %v6153_v62  ;;  %v6203_v3 = vld [vmem:[#allocation151_spill] sm:$0xff] }
 0x134   :  { %1820 = vmatprep.subr.bf16.mxu0 %v6154_v11  ;;  %1861 = vmatprep.subr.bf16.mxu1 %v6198_v12 }
 0x137   :  { %1821 = vmatpush1.bf16.msra.mxu0 %v6199_v15  ;;  %1862 = vmatpush1.bf16.msra.mxu1 %v6200_v28  ;;  %v6205_v15 = vld [vmem:[#allocation153_spill] sm:$0xff]  ;;  %v6206_v28 = vld [vmem:[#allocation154_spill] sm:$0xff] }
 0x138   :  { %1822 = vmatprep.subr.bf16.mxu0 %v6201_v29  ;;  %1863 = vmatprep.subr.bf16.mxu1 %v6202_v55 }
 0x139   :  { %v958_v30 = vpop.f32.mrb[4].mxu0  ;;  %v999_v6 = vpop.f32.mrb[4].mxu1 }
 0x13a   :  { %v960_v20 = vpop.f32.mrb[5].mxu0  ;;  %v1001_v62 = vpop.f32.mrb[5].mxu1 }
 0x13b   :  { %v1188_v27 = vcombine.low %v958_v30, %v960_v20  ;;  %v962_v5 = vpop.f32.mrb[6].mxu0  ;;  %1823 = vmatpush1.bf16.msra.mxu0 %v6203_v3  ;;  %1864 = vmatpush1.bf16.msra.mxu1 %v6204_v21  ;;  %v1189_v12 = vcombine.low %v999_v6, %v1001_v62  ;;  %v1003_v22 = vpop.f32.mrb[6].mxu1  ;;  %v6208_v20 = vld [vmem:[#allocation156_spill] sm:$0xff] }
 0x13c   :  { %v963_v11 = vpop.f32.mrb[7].mxu0  ;;  %1894 = vmatprep.subr.bf16.mxu0 %v6205_v15  ;;  %1935 = vmatprep.subr.bf16.mxu1 %v6206_v28  ;;  %v1004_v29 = vpop.f32.mrb[7].mxu1  ;;  %v6207_v5 = vld [vmem:[#allocation155_spill] sm:$0xff] }
 0x13d   :  { %1204 = vst [vmem:[#allocation2 + $0x10] sm:$0x77] %v1188_v27  ;;  %1205 = vst [vmem:[#allocation2 + $0x18] sm:$0x77] %v1189_v12  ;;  %v6209_v11 = vld [vmem:[#allocation157_spill] sm:$0xff] }
 0x13e   :  { %3669 = vmatmul.mubr.msk.bf16.vlgmr.msra.gmra.mrb[40].mxu0 %vm838_vm0, %v5328_v59  ;;  %3670 = vmatmul.mubr.msk.bf16.vlgmr.msra.gmra.mrb[40].mxu1 %vm838_vm0, %v5328_v59 }
 0x13f   :  { %1895 = vmatpush1.bf16.msra.mxu0 %v6207_v5  ;;  %1936 = vmatpush1.bf16.msra.mxu1 %v6208_v20 }
 0x140   :  { %1896 = vmatprep.subr.bf16.mxu0 %v6209_v11  ;;  %1937 = vmatprep.subr.bf16.mxu1 %v6167_v2 }
 0x141   :  { %1926 = vmatprep.mubr.bf16.mxu0 %v6079_v57  ;;  %1967 = vmatprep.mubr.bf16.mxu1 %v6079_v57 }
 0x143   :  { %1897 = vmatpush1.bf16.msra.mxu0 %v6168_v26  ;;  %1938 = vmatpush1.bf16.msra.mxu1 %v6169_v17 }
 0x144   :  { %1898 = vmatprep.subr.bf16.mxu0 %v6170_v56  ;;  %1939 = vmatprep.subr.bf16.mxu1 %v6171_v14 }
 0x147   :  { %1899 = vmatpush1.bf16.msra.mxu0 %v6172_v61  ;;  %1940 = vmatpush1.bf16.msra.mxu1 %v6173_v19 }
 0x148   :  { %1900 = vmatprep.subr.bf16.mxu0 %v6174_v31  ;;  %1941 = vmatprep.subr.bf16.mxu1 %v6175_v13 }
 0x14b   :  { %1901 = vmatpush1.bf16.msra.mxu0 %v5126_v10  ;;  %1942 = vmatpush1.bf16.msra.mxu1 %v5130_v9 }
 0x14c   :  { %1902 = vmatprep.subr.bf16.mxu0 %v5132_v25  ;;  %1943 = vmatprep.subr.bf16.mxu1 %v5135_v1 }
 0x14f   :  { %1903 = vmatpush1.bf16.msra.mxu0 %v5150_v58  ;;  %1944 = vmatpush1.bf16.msra.mxu1 %v5154_v8 }
 0x150   :  { %1904 = vmatprep.subr.bf16.mxu0 %v5156_v24  ;;  %1945 = vmatprep.subr.bf16.mxu1 %v5159_v0 }
 0x151   :  { %v1040_v22 = vpop.f32.mrb[8].mxu0  ;;  %v1081_v6 = vpop.f32.mrb[8].mxu1 }
 0x152   :  { %v1042_v62 = vpop.f32.mrb[9].mxu0  ;;  %v1083_v29 = vpop.f32.mrb[9].mxu1 }
 0x153   :  { %v1190_v27 = vcombine.low %v1040_v22, %v1042_v62  ;;  %v1044_v12 = vpop.f32.mrb[10].mxu0  ;;  %1905 = vmatpush1.bf16.msra.mxu0 %v5162_v16  ;;  %1946 = vmatpush1.bf16.msra.mxu1 %v5166_v18  ;;  %v1191_v1 = vcombine.low %v1081_v6, %v1083_v29  ;;  %v1085_v25 = vpop.f32.mrb[10].mxu1 }
 0x154   :  { %v1045_v30 = vpop.f32.mrb[11].mxu0  ;;  %2079 = vmatprep.subr.bf16.mxu0 %v4575_v63  ;;  %2120 = vmatprep.subr.bf16.mxu1 %v4590_v53  ;;  %v1086_v24 = vpop.f32.mrb[11].mxu1  ;;  %v6221_v53 = vld [vmem:[#allocation118_spill] sm:$0xff]  ;;  %v6222_v63 = vld [vmem:[#allocation119_spill] sm:$0xff] }
 0x155   :  { %1206 = vst [vmem:[#allocation2 + $0x20] sm:$0x77] %v1190_v27  ;;  %1207 = vst [vmem:[#allocation2 + $0x28] sm:$0x77] %v1191_v1  ;;  %v6229_v30 = vld [vmem:[#allocation128_spill] sm:$0xff] }
 0x156   :  { %3671 = vmatmul.mubr.msk.bf16.vlgmr.msra.gmra.mrb[44].mxu0 %vm838_vm0, %v5328_v59  ;;  %3672 = vmatmul.mubr.msk.bf16.vlgmr.msra.gmra.mrb[44].mxu1 %vm838_vm0, %v5328_v59  ;;  %v6228_v59 = vld [vmem:[#allocation125_spill] sm:$0xff] }
 0x157   :  { %2080 = vmatpush1.bf16.msra.mxu0 %v4583_v39  ;;  %2121 = vmatpush1.bf16.msra.mxu1 %v4592_v37 }
 0x158   :  { %2081 = vmatprep.subr.bf16.mxu0 %v4605_v45  ;;  %2122 = vmatprep.subr.bf16.mxu1 %v4607_v38  ;;  %v6213_v45 = vld [vmem:[#allocation110_spill] sm:$0xff]  ;;  %v6223_v38 = vld [vmem:[#allocation120_spill] sm:$0xff] }
 0x159   :  { %2111 = vmatprep.mubr.bf16.mxu0 %v6079_v57  ;;  %2152 = vmatprep.mubr.bf16.mxu1 %v6079_v57 }
 0x15b   :  { %2082 = vmatpush1.bf16.msra.mxu0 %v4620_v46  ;;  %2123 = vmatpush1.bf16.msra.mxu1 %v4627_v44  ;;  %v6211_v44 = vld [vmem:[#allocation108_spill] sm:$0xff]  ;;  %v6216_v46 = vld [vmem:[#allocation113_spill] sm:$0xff] }
 0x15c   :  { %2083 = vmatprep.subr.bf16.mxu0 %v4629_v51  ;;  %2124 = vmatprep.subr.bf16.mxu1 %v4632_v35  ;;  %v6220_v51 = vld [vmem:[#allocation117_spill] sm:$0xff] }
 0x15f   :  { %2084 = vmatpush1.bf16.msra.mxu0 %v4647_v54  ;;  %2125 = vmatpush1.bf16.msra.mxu1 %v4651_v43  ;;  %v6210_v43 = vld [vmem:[#allocation107_spill] sm:$0xff]  ;;  %v6224_v54 = vld [vmem:[#allocation121_spill] sm:$0xff] }
 0x160   :  { %2085 = vmatprep.subr.bf16.mxu0 %v4653_v50  ;;  %2126 = vmatprep.subr.bf16.mxu1 %v4656_v34  ;;  %v6219_v50 = vld [vmem:[#allocation116_spill] sm:$0xff] }
 0x163   :  { %2086 = vmatpush1.bf16.msra.mxu0 %v4671_v60  ;;  %2127 = vmatpush1.bf16.msra.mxu1 %v4675_v42  ;;  %v6225_v60 = vld [vmem:[#allocation122_spill] sm:$0xff] }
 0x164   :  { %2087 = vmatprep.subr.bf16.mxu0 %v4677_v49  ;;  %2128 = vmatprep.subr.bf16.mxu1 %v4680_v33  ;;  %v5453_v33 = vld [vmem:[%s5855_s1 + $0x6] sm:$0x3]  ;;  %v6218_v49 = vld [vmem:[#allocation115_spill] sm:$0xff]  ;;  %s4034_s1 = smov 127  }
 0x167   :  { %2088 = vmatpush1.bf16.msra.mxu0 %v4695_v47  ;;  %2129 = vmatpush1.bf16.msra.mxu1 %v4699_v41  ;;  %v6226_v47 = vld [vmem:[#allocation123_spill] sm:$0xff] }
 0x168   :  { %2089 = vmatprep.subr.bf16.mxu0 %v4701_v48  ;;  %2130 = vmatprep.subr.bf16.mxu1 %v4704_v32  ;;  %v6217_v48 = vld [vmem:[#allocation114_spill] sm:$0xff] }
 0x169   :  { %v1122_v1 = vpop.f32.mrb[12].mxu0  ;;  %v1163_v25 = vpop.f32.mrb[12].mxu1 }
 0x16a   :  { %v1124_v24 = vpop.f32.mrb[13].mxu0  ;;  %v1165_v37 = vpop.f32.mrb[13].mxu1 }
 0x16b   :  { %v1192_v34 = vcombine.low %v1122_v1, %v1124_v24  ;;  %v1126_v35 = vpop.f32.mrb[14].mxu0  ;;  %2090 = vmatpush1.bf16.msra.mxu0 %v4719_v36  ;;  %2131 = vmatpush1.bf16.msra.mxu1 %v4723_v40  ;;  %v1193_v41 = vcombine.low %v1163_v25, %v1165_v37  ;;  %v1167_v42 = vpop.f32.mrb[14].mxu1  ;;  %v6212_v40 = vld [vmem:[#allocation109_spill] sm:$0xff]  ;;  %v6227_v36 = vld [vmem:[#allocation124_spill] sm:$0xff] }
 0x16c   :  { %v1127_v39 = vpop.f32.mrb[15].mxu0  ;;  %2161 = vmatprep.subr.bf16.mxu0 %v4725_v23  ;;  %2202 = vmatprep.subr.bf16.mxu1 %v4728_v7  ;;  %v1168_v32 = vpop.f32.mrb[15].mxu1  ;;  %v6214_v7 = vld [vmem:[#allocation111_spill] sm:$0xff]  ;;  %v6215_v23 = vld [vmem:[#allocation112_spill] sm:$0xff]  ;;  %v6231_v35 = vld [vmem:[#allocation130_spill] sm:$0xff] }
 0x16d   :  { %1208 = vst [vmem:[#allocation2 + $0x30] sm:$0x77] %v1192_v34  ;;  %1209 = vst [vmem:[#allocation2 + $0x38] sm:$0x77] %v1193_v41  ;;  %v6230_v34 = vld [vmem:[#allocation129_spill] sm:$0xff]  ;;  %v6233_v37 = vld [vmem:[#allocation132_spill] sm:$0xff] }
 0x16e   :  { %3674 = vmatmul.mubr.msk.bf16.vlgmr.msra.gmra.mrb[48].mxu0 %vm838_vm0, %v5453_v33  ;;  %3675 = vmatmul.mubr.msk.bf16.vlgmr.msra.gmra.mrb[48].mxu1 %vm838_vm0, %v5453_v33  ;;  %v6234_v39 = vld [vmem:[#allocation133_spill] sm:$0xff]  ;;  %v6235_v41 = vld [vmem:[#allocation134_spill] sm:$0xff]  ;;  %v6236_v42 = vld [vmem:[#allocation135_spill] sm:$0xff] }
 0x16f   :  { %2162 = vmatpush1.bf16.msra.mxu0 %v6210_v43  ;;  %2203 = vmatpush1.bf16.msra.mxu1 %v6211_v44  ;;  %v6237_v32 = vld [vmem:[#allocation136_spill] sm:$0xff]  ;;  %v6238_v43 = vld [vmem:[#allocation137_spill] sm:$0xff]  ;;  %v6239_v44 = vld [vmem:[#allocation138_spill] sm:$0xff] }
 0x170   :  { %2163 = vmatprep.subr.bf16.mxu0 %v6212_v40  ;;  %2204 = vmatprep.subr.bf16.mxu1 %v6213_v45  ;;  %v6240_v40 = vld [vmem:[#allocation139_spill] sm:$0xff]  ;;  %v6241_v45 = vld [vmem:[#allocation140_spill] sm:$0xff] }
 0x171   :  { %2193 = vmatprep.mubr.bf16.mxu0 %v6079_v57  ;;  %2234 = vmatprep.mubr.bf16.mxu1 %v6079_v57 }
 0x173   :  { %2164 = vmatpush1.bf16.msra.mxu0 %v6214_v7  ;;  %2205 = vmatpush1.bf16.msra.mxu1 %v6215_v23  ;;  %v6242_v7 = vld [vmem:[#allocation141_spill] sm:$0xff]  ;;  %v6243_v23 = vld [vmem:[#allocation142_spill] sm:$0xff] }
 0x174   :  { %2165 = vmatprep.subr.bf16.mxu0 %v6216_v46  ;;  %2206 = vmatprep.subr.bf16.mxu1 %v6217_v48  ;;  %v6244_v46 = vld [vmem:[#allocation143_spill] sm:$0xff]  ;;  %v6245_v48 = vld [vmem:[#allocation144_spill] sm:$0xff] }
 0x177   :  { %2166 = vmatpush1.bf16.msra.mxu0 %v6218_v49  ;;  %2207 = vmatpush1.bf16.msra.mxu1 %v6219_v50  ;;  %v6246_v49 = vld [vmem:[#allocation145_spill] sm:$0xff]  ;;  %v6247_v50 = vld [vmem:[#allocation146_spill] sm:$0xff] }
 0x178   :  { %2167 = vmatprep.subr.bf16.mxu0 %v6220_v51  ;;  %2208 = vmatprep.subr.bf16.mxu1 %v6221_v53  ;;  %v6248_v51 = vld [vmem:[#allocation147_spill] sm:$0xff]  ;;  %v6249_v53 = vld [vmem:[#allocation148_spill] sm:$0xff] }
 0x17b   :  { %2168 = vmatpush1.bf16.msra.mxu0 %v6222_v63  ;;  %2209 = vmatpush1.bf16.msra.mxu1 %v6223_v38  ;;  %v6250_v63 = vld [vmem:[#allocation149_spill] sm:$0xff] }
 0x17c   :  { %2169 = vmatprep.subr.bf16.mxu0 %v6224_v54  ;;  %2210 = vmatprep.subr.bf16.mxu1 %v6225_v60 }
 0x17f   :  { %2170 = vmatpush1.bf16.msra.mxu0 %v6226_v47  ;;  %2211 = vmatpush1.bf16.msra.mxu1 %v6227_v36 }
 0x180   :  { %2171 = vmatprep.subr.bf16.mxu0 %v6228_v59  ;;  %2212 = vmatprep.subr.bf16.mxu1 %v6180_v4 }
 0x181   :  { %v1249_v22 = vpop.f32.mrb[16].mxu0  ;;  %v1290_v6 = vpop.f32.mrb[16].mxu1 }
 0x182   :  { %v1251_v62 = vpop.f32.mrb[17].mxu0  ;;  %v1292_v29 = vpop.f32.mrb[17].mxu1 }
 0x183   :  { %v1567_v27 = vcombine.low %v1249_v22, %v1251_v62  ;;  %v1253_v12 = vpop.f32.mrb[18].mxu0  ;;  %2172 = vmatpush1.bf16.msra.mxu0 %v6181_v52  ;;  %2213 = vmatpush1.bf16.msra.mxu1 %v6229_v30  ;;  %v1568_v24 = vcombine.low %v1290_v6, %v1292_v29  ;;  %v1294_v25 = vpop.f32.mrb[18].mxu1  ;;  %v6232_v52 = vld [vmem:[#allocation131_spill] sm:$0xff] }
 0x184   :  { %v1254_v1 = vpop.f32.mrb[19].mxu0  ;;  %2243 = vmatprep.subr.bf16.mxu0 %v6230_v34  ;;  %2284 = vmatprep.subr.bf16.mxu1 %v6231_v35  ;;  %v1295_v4 = vpop.f32.mrb[19].mxu1 }
 0x185   :  { %1575 = vrot.lane.b32.xlu0 %v1567_v27, %s4034_s1 }
 0x186   :  { %3676 = vmatmul.mubr.msk.bf16.vlgmr.msra.gmra.mrb[52].mxu0 %vm838_vm0, %v5453_v33  ;;  %3677 = vmatmul.mubr.msk.bf16.vlgmr.msra.gmra.mrb[52].mxu1 %vm838_vm0, %v5453_v33 }
 0x187   :  { %2244 = vmatpush1.bf16.msra.mxu0 %v6232_v52  ;;  %2285 = vmatpush1.bf16.msra.mxu1 %v6233_v37 }
 0x188   :  { %2245 = vmatprep.subr.bf16.mxu0 %v6234_v39  ;;  %2286 = vmatprep.subr.bf16.mxu1 %v6235_v41 }
 0x189   :  { %1577 = vrot.lane.b32.xlu0 %v1568_v24, %s4034_s1  ;;  %2275 = vmatprep.mubr.bf16.mxu0 %v6079_v57 }
 0x18a   :  { %2316 = vmatprep.mubr.bf16.mxu1 %v6079_v57 }
 0x18b   :  { %2246 = vmatpush1.bf16.msra.mxu0 %v6236_v42  ;;  %2287 = vmatpush1.bf16.msra.mxu1 %v6237_v32 }
 0x18c   :  { %2247 = vmatprep.subr.bf16.mxu0 %v6238_v43  ;;  %2288 = vmatprep.subr.bf16.mxu1 %v6239_v44 }
 0x18f   :  { %2248 = vmatpush1.bf16.msra.mxu0 %v6240_v40  ;;  %2289 = vmatpush1.bf16.msra.mxu1 %v6241_v45 }
 0x190   :  { %2249 = vmatprep.subr.bf16.mxu0 %v6242_v7  ;;  %2290 = vmatprep.subr.bf16.mxu1 %v6243_v23 }
 0x193   :  { %2250 = vmatpush1.bf16.msra.mxu0 %v6244_v46  ;;  %2291 = vmatpush1.bf16.msra.mxu1 %v6245_v48  ;;  %v1543_v48 = vld [vmem:[#allocation2] sm:$0x77] }
 0x194   :  { %2251 = vmatprep.subr.bf16.mxu0 %v6246_v49  ;;  %2292 = vmatprep.subr.bf16.mxu1 %v6247_v50 }
 0x197   :  { %2252 = vmatpush1.bf16.msra.mxu0 %v6248_v51  ;;  %2293 = vmatpush1.bf16.msra.mxu1 %v6249_v53 }
 0x198   :  { %2253 = vmatprep.subr.bf16.mxu0 %v6250_v63  ;;  %2294 = vmatprep.subr.bf16.mxu1 %v6202_v55 }
 0x199   :  { %v1331_v38 = vpop.f32.mrb[20].mxu0  ;;  %v1372_v60 = vpop.f32.mrb[20].mxu1 }
 0x19a   :  { %v1333_v54 = vpop.f32.mrb[21].mxu0  ;;  %v1374_v59 = vpop.f32.mrb[21].mxu1 }
 0x19b   :  { %v1569_v47 = vcombine.low %v1331_v38, %v1333_v54  ;;  %v1335_v36 = vpop.f32.mrb[22].mxu0  ;;  %2254 = vmatpush1.bf16.msra.mxu0 %v6203_v3  ;;  %2295 = vmatpush1.bf16.msra.mxu1 %v6204_v21  ;;  %v1570_v62 = vcombine.low %v1372_v60, %v1374_v59  ;;  %v1376_v6 = vpop.f32.mrb[22].mxu1  ;;  %v6252_v21 = vld [vmem:[#allocation168_spill] sm:$0xff] }
 0x19c   :  { %v1336_v22 = vpop.f32.mrb[23].mxu0  ;;  %2325 = vmatprep.subr.bf16.mxu0 %v6205_v15  ;;  %2366 = vmatprep.subr.bf16.mxu1 %v6206_v28  ;;  %v1377_v27 = vpop.f32.mrb[23].mxu1 }
 0x19d   :  { %1579 = vrot.lane.b32.xlu1 %v1569_v47, %s4034_s1  ;;  %v1544_v47 = vld [vmem:[#allocation2 + $0x8] sm:$0x77] }
 0x19e   :  { %3678 = vmatmul.mubr.msk.bf16.vlgmr.msra.gmra.mrb[56].mxu0 %vm838_vm0, %v5453_v33  ;;  %3679 = vmatmul.mubr.msk.bf16.vlgmr.msra.gmra.mrb[56].mxu1 %vm838_vm0, %v5453_v33 }
 0x19f   :  { %2326 = vmatpush1.bf16.msra.mxu0 %v6207_v5  ;;  %2367 = vmatpush1.bf16.msra.mxu1 %v6208_v20 }
 0x1a0   :  { %2327 = vmatprep.subr.bf16.mxu0 %v6209_v11  ;;  %2368 = vmatprep.subr.bf16.mxu1 %v6167_v2  ;;  %v6251_v2 = vld [vmem:[#allocation167_spill] sm:$0xff] }
 0x1a1   :  { %1581 = vrot.lane.b32.xlu1 %v1570_v62, %s4034_s1  ;;  %2357 = vmatprep.mubr.bf16.mxu0 %v6079_v57 }
 0x1a2   :  { %2398 = vmatprep.mubr.bf16.mxu1 %v6079_v57 }
 0x1a3   :  { %2328 = vmatpush1.bf16.msra.mxu0 %v6168_v26  ;;  %2369 = vmatpush1.bf16.msra.mxu1 %v6169_v17  ;;  %v6253_v26 = vld [vmem:[#allocation169_spill] sm:$0xff] }
 0x1a4   :  { %2329 = vmatprep.subr.bf16.mxu0 %v6170_v56  ;;  %2370 = vmatprep.subr.bf16.mxu1 %v6171_v14 }
 0x1a7   :  { %2330 = vmatpush1.bf16.msra.mxu0 %v6172_v61  ;;  %2371 = vmatpush1.bf16.msra.mxu1 %v6173_v19 }
 0x1a8   :  { %2331 = vmatprep.subr.bf16.mxu0 %v6174_v31  ;;  %2372 = vmatprep.subr.bf16.mxu1 %v6175_v13 }
 0x1ab   :  { %2332 = vmatpush1.bf16.msra.mxu0 %v5126_v10  ;;  %2373 = vmatpush1.bf16.msra.mxu1 %v5130_v9 }
 0x1ac   :  { %2333 = vmatprep.subr.bf16.mxu0 %v6251_v2  ;;  %2374 = vmatprep.subr.bf16.mxu1 %v6252_v21 }
 0x1af   :  { %2334 = vmatpush1.bf16.msra.mxu0 %v5150_v58  ;;  %2375 = vmatpush1.bf16.msra.mxu1 %v5154_v8 }
 0x1b0   :  { %2335 = vmatprep.subr.bf16.mxu0 %v6253_v26  ;;  %2376 = vmatprep.subr.bf16.mxu1 %v5159_v0 }
 0x1b1   :  { %v1413_v57 = vpop.f32.mrb[24].mxu0  ;;  %v1454_v17 = vpop.f32.mrb[24].mxu1 }
 0x1b2   :  { %v1415_v31 = vpop.f32.mrb[25].mxu0  ;;  %v1456_v61 = vpop.f32.mrb[25].mxu1 }
 0x1b3   :  { %v1571_v13 = vcombine.low %v1413_v57, %v1415_v31  ;;  %v1417_v10 = vpop.f32.mrb[26].mxu0  ;;  %2336 = vmatpush1.bf16.msra.mxu0 %v5162_v16  ;;  %v1572_v9 = vcombine.low %v1454_v17, %v1456_v61  ;;  %2377 = vmatpush1.bf16.msra.mxu1 %v5166_v18  ;;  %v1458_v14 = vpop.f32.mrb[26].mxu1 }
 0x1b4   :  { %v1418_v19 = vpop.f32.mrb[27].mxu0  ;;  %v1459_v8 = vpop.f32.mrb[27].mxu1 }
 0x1b5   :  { %1583 = vrot.lane.b32.xlu0 %v1571_v13, %s4034_s1  ;;  %1585 = vrot.lane.b32.xlu1 %v1572_v9, %s4034_s1  ;;  %v1545_v13 = vld [vmem:[#allocation2 + $0x10] sm:$0x77] }
 0x1b6   :  { %3680 = vmatmul.mubr.msk.bf16.vlgmr.msra.gmra.mrb[60].mxu0 %vm838_vm0, %v5453_v33  ;;  %3681 = vmatmul.mubr.msk.bf16.vlgmr.msra.gmra.mrb[60].mxu1 %vm838_vm0, %v5453_v33 }
 0x1c9   :  { %v1495_v0 = vpop.f32.mrb[28].mxu0  ;;  %v1536_v58 = vpop.f32.mrb[28].mxu1 }
 0x1ca   :  { %v1497_v56 = vpop.f32.mrb[29].mxu0  ;;  %v1538_v3 = vpop.f32.mrb[29].mxu1 }
 0x1cb   :  { %v1573_v16 = vcombine.low %v1495_v0, %v1497_v56  ;;  %v1499_v15 = vpop.f32.mrb[30].mxu0  ;;  %v1574_v18 = vcombine.low %v1536_v58, %v1538_v3  ;;  %v1540_v55 = vpop.f32.mrb[30].mxu1  ;;  %v1546_v3 = vld [vmem:[#allocation2 + $0x18] sm:$0x77] }
 0x1cc   :  { %v1500_v28 = vpop.f32.mrb[31].mxu0  ;;  %v1541_v5 = vpop.f32.mrb[31].mxu1 }
 0x1cd   :  { %1587 = vrot.lane.b32.xlu0 %v1573_v16, %s4034_s1  ;;  %1589 = vrot.lane.b32.xlu1 %v1574_v18, %s4034_s1 }
 0x1e1   :  { %v1682_v20 = vpop.f32.mrb[32].mxu0  ;;  %v1723_v11 = vpop.f32.mrb[32].mxu1 }
 0x1e2   :  { %v1684_v12 = vpop.f32.mrb[33].mxu0  ;;  %v1725_v30 = vpop.f32.mrb[33].mxu1 }
 0x1e3   :  { %v2000_v29 = vcombine.low %v1682_v20, %v1684_v12  ;;  %v1686_v33 = vpop.f32.mrb[34].mxu0  ;;  %v2001_v1 = vcombine.low %v1723_v11, %v1725_v30  ;;  %v1727_v25 = vpop.f32.mrb[34].mxu1  ;;  %v1547_v20 = vld [vmem:[#allocation2 + $0x20] sm:$0x77] }
 0x1e4   :  { %v1687_v24 = vpop.f32.mrb[35].mxu0  ;;  %v1728_v34 = vpop.f32.mrb[35].mxu1 }
 0x1e5   :  { %2008 = vrot.lane.b32.xlu0 %v2000_v29, %s4035_s13  ;;  %2010 = vrot.lane.b32.xlu1 %v2001_v1, %s4035_s13 }
 0x1f7   :  { %v1576_v35 = vpop.permute.xlu0 %1575 }
 0x1f8   :  { %v1591_v32 = vrot.slane %v1576_v35, 4 }
 0x1f9   :  { %v1764_v4 = vpop.f32.mrb[36].mxu0  ;;  %v1805_v52 = vpop.f32.mrb[36].mxu1 }
 0x1fa   :  { %v1766_v37 = vpop.f32.mrb[37].mxu0  ;;  %v1807_v41 = vpop.f32.mrb[37].mxu1 }
 0x1fb   :  { %v2002_v39 = vcombine.low %v1764_v4, %v1766_v37  ;;  %v1578_v42 = vpop.permute.xlu0 %1577  ;;  %v2003_v43 = vcombine.low %v1805_v52, %v1807_v41  ;;  %v1768_v40 = vpop.f32.mrb[38].mxu0 }
 0x1fc   :  { %v1592_v44 = vrot.slane %v1578_v42, 4  ;;  %v1809_v45 = vpop.f32.mrb[38].mxu1  ;;  %v1769_v7 = vpop.f32.mrb[39].mxu0 }
 0x1fd   :  { %2012 = vrot.lane.b32.xlu0 %v2002_v39, %s4035_s13  ;;  %v1810_v23 = vpop.f32.mrb[39].mxu1  ;;  %2014 = vrot.lane.b32.xlu1 %v2003_v43, %s4035_s13 }
 0x1fe   :  { %v1600_v46 = vsel %vm1599_vm1, %v1591_v32, %v1592_v44 }
 0x1ff   :  { %v1602_v49 = vsel %vm1601_vm2, %v1576_v35, %v1600_v46 }
 0x200   :  { %v1624_v50 = vadd.f32 %v1602_v49, %v1543_v48  ;;  %v1549_v49 = vld [vmem:[#allocation2 + $0x30] sm:$0x77] }
 0x202   :  { %1632 = vst [vmem:[#allocation2] sm:$0x77] %v1624_v50 }
 0x20f   :  { %v1580_v51 = vpop.permute.xlu1 %1579 }
 0x210   :  { %v1593_v53 = vrot.slane %v1580_v51, 4 }
 0x211   :  { %v1846_v63 = vpop.f32.mrb[40].mxu0  ;;  %v1887_v54 = vpop.f32.mrb[40].mxu1 }
 0x212   :  { %v1603_v38 = vsel %vm1599_vm1, %v1592_v44, %v1593_v53  ;;  %v1848_v60 = vpop.f32.mrb[41].mxu0  ;;  %v1889_v22 = vpop.f32.mrb[41].mxu1  ;;  %v1548_v44 = vld [vmem:[#allocation2 + $0x28] sm:$0x77] }
 0x213   :  { %v1604_v36 = vsel %vm1601_vm2, %v1578_v42, %v1603_v38  ;;  %v2004_v59 = vcombine.low %v1846_v63, %v1848_v60  ;;  %v1582_v62 = vpop.permute.xlu1 %1581  ;;  %v2005_v27 = vcombine.low %v1887_v54, %v1889_v22  ;;  %v1850_v21 = vpop.f32.mrb[42].mxu0  ;;  %v1550_v42 = vld [vmem:[#allocation2 + $0x38] sm:$0x77] }
 0x214   :  { %v1625_v6 = vadd.f32 %v1604_v36, %v1544_v47  ;;  %v1594_v2 = vrot.slane %v1582_v62, 4  ;;  %v1891_v26 = vpop.f32.mrb[42].mxu1  ;;  %v1851_v57 = vpop.f32.mrb[43].mxu0 }
 0x215   :  { %2016 = vrot.lane.b32.xlu0 %v2004_v59, %s4035_s13  ;;  %v1892_v17 = vpop.f32.mrb[43].mxu1  ;;  %2018 = vrot.lane.b32.xlu1 %v2005_v27, %s4035_s13 }
 0x216   :  { %1633 = vst [vmem:[#allocation2 + $0x8] sm:$0x77] %v1625_v6  ;;  %v1605_v31 = vsel %vm1599_vm1, %v1593_v53, %v1594_v2  ;;  %v1976_v17 = vld [vmem:[#allocation2] sm:$0x77] }
 0x217   :  { %v1606_v61 = vsel %vm1601_vm2, %v1580_v51, %v1605_v31 }
 0x218   :  { %v1626_v10 = vadd.f32 %v1606_v61, %v1545_v13 }
 0x21a   :  { %1634 = vst [vmem:[#allocation2 + $0x10] sm:$0x77] %v1626_v10 }
 0x227   :  { %v1584_v9 = vpop.permute.xlu0 %1583  ;;  %v1586_v19 = vpop.permute.xlu1 %1585 }
 0x228   :  { %v1595_v14 = vrot.slane %v1584_v9, 4  ;;  %v1596_v8 = vrot.slane %v1586_v19, 4 }
 0x229   :  { %v1928_v0 = vpop.f32.mrb[44].mxu0  ;;  %v1969_v56 = vpop.f32.mrb[44].mxu1 }
 0x22a   :  { %v1607_v58 = vsel %vm1599_vm1, %v1594_v2, %v1595_v14  ;;  %v1930_v16 = vpop.f32.mrb[45].mxu0  ;;  %v1609_v18 = vsel %vm1599_vm1, %v1595_v14, %v1596_v8  ;;  %v1971_v55 = vpop.f32.mrb[45].mxu1 }
 0x22b   :  { %v1608_v15 = vsel %vm1601_vm2, %v1582_v62, %v1607_v58  ;;  %v2006_v28 = vcombine.low %v1928_v0, %v1930_v16  ;;  %v1932_v5 = vpop.f32.mrb[46].mxu0  ;;  %v1610_v11 = vsel %vm1601_vm2, %v1584_v9, %v1609_v18  ;;  %v2007_v29 = vcombine.low %v1969_v56, %v1971_v55  ;;  %v1973_v33 = vpop.f32.mrb[46].mxu1  ;;  %v1977_v18 = vld [vmem:[#allocation2 + $0x8] sm:$0x77] }
 0x22c   :  { %v1627_v12 = vadd.f32 %v1608_v15, %v1546_v3  ;;  %v1933_v30 = vpop.f32.mrb[47].mxu0  ;;  %v1628_v1 = vadd.f32 %v1610_v11, %v1547_v20  ;;  %v1974_v24 = vpop.f32.mrb[47].mxu1 }
 0x22d   :  { %2020 = vrot.lane.b32.xlu0 %v2006_v28, %s4035_s13  ;;  %2022 = vrot.lane.b32.xlu1 %v2007_v29, %s4035_s13 }
 0x22e   :  { %1635 = vst [vmem:[#allocation2 + $0x18] sm:$0x77] %v1627_v12  ;;  %1636 = vst [vmem:[#allocation2 + $0x20] sm:$0x77] %v1628_v1  ;;  %v1978_v12 = vld [vmem:[#allocation2 + $0x10] sm:$0x77] }
 0x23f   :  { %v1588_v25 = vpop.permute.xlu0 %1587  ;;  %v1590_v34 = vpop.permute.xlu1 %1589 }
 0x240   :  { %v1597_v35 = vrot.slane %v1588_v25, 4  ;;  %v1598_v4 = vrot.slane %v1590_v34, 4 }
 0x241   :  { %v2113_v52 = vpop.f32.mrb[48].mxu0  ;;  %v2154_v39 = vpop.f32.mrb[48].mxu1 }
 0x242   :  { %v1611_v37 = vsel %vm1599_vm1, %v1596_v8, %v1597_v35  ;;  %v2115_v41 = vpop.f32.mrb[49].mxu0  ;;  %v1615_v43 = vsel %vm1601_vm2, %v1590_v34, %v1598_v4  ;;  %v1613_v45 = vsel %vm1599_vm1, %v1597_v35, %v1598_v4  ;;  %v2156_v23 = vpop.f32.mrb[49].mxu1 }
 0x243   :  { %v1612_v40 = vsel %vm1601_vm2, %v1586_v19, %v1611_v37  ;;  %v2431_v7 = vcombine.low %v2113_v52, %v2115_v41  ;;  %v2117_v46 = vpop.f32.mrb[50].mxu0  ;;  %v1631_v48 = vadd.f32 %v1615_v43, %v1550_v42  ;;  %v1614_v50 = vsel %vm1601_vm2, %v1588_v25, %v1613_v45  ;;  %v2158_v38 = vpop.f32.mrb[50].mxu1  ;;  %v1979_v43 = vld [vmem:[#allocation2 + $0x18] sm:$0x77] }
 0x244   :  { %v1629_v51 = vadd.f32 %v1612_v40, %v1548_v44  ;;  %v2432_v53 = vcombine.low %v2154_v39, %v2156_v23  ;;  %v2118_v63 = vpop.f32.mrb[51].mxu0  ;;  %v1630_v54 = vadd.f32 %v1614_v50, %v1549_v49  ;;  %v2159_v60 = vpop.f32.mrb[51].mxu1  ;;  %v1980_v46 = vld [vmem:[#allocation2 + $0x20] sm:$0x77] }
 0x245   :  { %2439 = vrot.lane.b32.xlu0 %v2431_v7, %s4036_s14  ;;  %1642 = vst.msk [vmem:[#allocation2 + $0x38] sm:$0x77] %vm5578_vm5, %v1631_v48 }
 0x246   :  { %1637 = vst [vmem:[#allocation2 + $0x28] sm:$0x77] %v1629_v51  ;;  %2441 = vrot.lane.b32.xlu1 %v2432_v53, %s4036_s14  ;;  %1638 = vst [vmem:[#allocation2 + $0x30] sm:$0x77] %v1630_v54  ;;  %v2513_v54 = vld [vmem:[%s5856_s2] sm:$0x7] }
 0x257   :  { %v2009_v47 = vpop.permute.xlu0 %2008  ;;  %v2011_v36 = vpop.permute.xlu1 %2010 }
 0x258   :  { %v2024_v59 = vrot.slane %v2009_v47, 4  ;;  %v2025_v22 = vrot.slane %v2011_v36, 4 }
 0x259   :  { %v2195_v62 = vpop.f32.mrb[52].mxu0  ;;  %v2236_v6 = vpop.f32.mrb[52].mxu1 }
 0x25a   :  { %v2197_v27 = vpop.f32.mrb[53].mxu0  ;;  %v2032_v2 = vsel %vm1599_vm1, %v2024_v59, %v2025_v22  ;;  %v2238_v26 = vpop.f32.mrb[53].mxu1 }
 0x25b   :  { %v2433_v21 = vcombine.low %v2195_v62, %v2197_v27  ;;  %v2199_v57 = vpop.f32.mrb[54].mxu0  ;;  %v2034_v31 = vsel %vm2033_vm6, %v2009_v47, %v2032_v2  ;;  %v2434_v13 = vcombine.low %v2236_v6, %v2238_v26  ;;  %v2240_v10 = vpop.f32.mrb[54].mxu1  ;;  %v1983_v62 = vld [vmem:[#allocation2 + $0x38] sm:$0x77]  ;;  %v1981_v27 = vld [vmem:[#allocation2 + $0x28] sm:$0x77] }
 0x25c   :  { %v2200_v61 = vpop.f32.mrb[55].mxu0  ;;  %v2056_v9 = vadd.f32 %v2034_v31, %v1976_v17  ;;  %v2241_v19 = vpop.f32.mrb[55].mxu1  ;;  %v1982_v57 = vld [vmem:[#allocation2 + $0x30] sm:$0x77] }
 0x25d   :  { %2443 = vrot.lane.b32.xlu0 %v2433_v21, %s4036_s14  ;;  %2445 = vrot.lane.b32.xlu1 %v2434_v13, %s4036_s14 }
 0x25e   :  { %2064 = vst [vmem:[#allocation2] sm:$0x77] %v2056_v9 }
 0x26f   :  { %v2013_v14 = vpop.permute.xlu0 %2012  ;;  %v2015_v8 = vpop.permute.xlu1 %2014 }
 0x270   :  { %v2026_v0 = vrot.slane %v2013_v14, 4  ;;  %v2027_v58 = vrot.slane %v2015_v8, 4 }
 0x271   :  { %v2277_v56 = vpop.f32.mrb[56].mxu0  ;;  %v2318_v3 = vpop.f32.mrb[56].mxu1 }
 0x272   :  { %v2035_v16 = vsel %vm1599_vm1, %v2025_v22, %v2026_v0  ;;  %v2279_v15 = vpop.f32.mrb[57].mxu0  ;;  %v2037_v55 = vsel %vm1599_vm1, %v2026_v0, %v2027_v58  ;;  %v2320_v20 = vpop.f32.mrb[57].mxu1 }
 0x273   :  { %v2036_v28 = vsel %vm2033_vm6, %v2011_v36, %v2035_v16  ;;  %v2435_v5 = vcombine.low %v2277_v56, %v2279_v15  ;;  %v2281_v11 = vpop.f32.mrb[58].mxu0  ;;  %v2038_v29 = vsel %vm2033_vm6, %v2013_v14, %v2037_v55  ;;  %v2436_v33 = vcombine.low %v2318_v3, %v2320_v20  ;;  %v2322_v24 = vpop.f32.mrb[58].mxu1 }
 0x274   :  { %v2057_v30 = vadd.f32 %v2036_v28, %v1977_v18  ;;  %v2282_v1 = vpop.f32.mrb[59].mxu0  ;;  %v2058_v25 = vadd.f32 %v2038_v29, %v1978_v12  ;;  %v2323_v34 = vpop.f32.mrb[59].mxu1 }
 0x275   :  { %2447 = vrot.lane.b32.xlu0 %v2435_v5, %s4036_s14  ;;  %2449 = vrot.lane.b32.xlu1 %v2436_v33, %s4036_s14 }
 0x276   :  { %2065 = vst [vmem:[#allocation2 + $0x8] sm:$0x77] %v2057_v30  ;;  %2066 = vst [vmem:[#allocation2 + $0x10] sm:$0x77] %v2058_v25 }
 0x27d   :  { %v2408_v28 = vld [vmem:[#allocation2 + $0x8] sm:$0x77]  ;;  %v2409_v20 = vld [vmem:[#allocation2 + $0x10] sm:$0x77] }
 0x287   :  { %v2017_v35 = vpop.permute.xlu0 %2016  ;;  %v2019_v4 = vpop.permute.xlu1 %2018 }
 0x288   :  { %v2028_v52 = vrot.slane %v2017_v35, 4  ;;  %v2029_v37 = vrot.slane %v2019_v4, 4 }
 0x289   :  { %v2359_v39 = vpop.f32.mrb[60].mxu0  ;;  %v2400_v42 = vpop.f32.mrb[60].mxu1 }
 0x28a   :  { %v2039_v41 = vsel %vm1599_vm1, %v2027_v58, %v2028_v52  ;;  %v2361_v32 = vpop.f32.mrb[61].mxu0  ;;  %v2041_v40 = vsel %vm1599_vm1, %v2028_v52, %v2029_v37  ;;  %v2402_v7 = vpop.f32.mrb[61].mxu1 }
 0x28b   :  { %v2040_v44 = vsel %vm2033_vm6, %v2015_v8, %v2039_v41  ;;  %v2437_v45 = vcombine.low %v2359_v39, %v2361_v32  ;;  %v2363_v23 = vpop.f32.mrb[62].mxu0  ;;  %v2042_v48 = vsel %vm2033_vm6, %v2017_v35, %v2041_v40  ;;  %v2438_v50 = vcombine.low %v2400_v42, %v2402_v7  ;;  %v2404_v53 = vpop.f32.mrb[62].mxu1  ;;  %v2407_v8 = vld [vmem:[#allocation2] sm:$0x77] }
 0x28c   :  { %v2059_v49 = vadd.f32 %v2040_v44, %v1979_v43  ;;  %v2364_v51 = vpop.f32.mrb[63].mxu0  ;;  %v2060_v63 = vadd.f32 %v2042_v48, %v1980_v46  ;;  %v2405_v38 = vpop.f32.mrb[63].mxu1 }
 0x28d   :  { %2451 = vrot.lane.b32.xlu0 %v2437_v45, %s4036_s14  ;;  %2453 = vrot.lane.b32.xlu1 %v2438_v50, %s4036_s14  ;;  %v4037_v38 = vmov 839922192  }
 0x28e   :  { %2067 = vst [vmem:[#allocation2 + $0x18] sm:$0x77] %v2059_v49  ;;  %2068 = vst [vmem:[#allocation2 + $0x20] sm:$0x77] %v2060_v63 }
 0x291   :  { %2516 = vperm.xlu0 %3964, %v2513_v54   ;;  %v2519_v54 = vunpack.c.l.s4 %v4037_v38 }
 0x295   :  { %v2410_v34 = vld [vmem:[#allocation2 + $0x18] sm:$0x77]  ;;  %v2411_v52 = vld [vmem:[#allocation2 + $0x20] sm:$0x77] }
 0x29f   :  { %v2021_v60 = vpop.permute.xlu0 %2020  ;;  %v2023_v47 = vpop.permute.xlu1 %2022 }
 0x2a0   :  { %v2030_v36 = vrot.slane %v2021_v60, 4  ;;  %v2031_v59 = vrot.slane %v2023_v47, 4 }
 0x2a2   :  { %v2043_v22 = vsel %vm1599_vm1, %v2029_v37, %v2030_v36  ;;  %v2047_v6 = vsel %vm2033_vm6, %v2023_v47, %v2031_v59  ;;  %v2045_v21 = vsel %vm1599_vm1, %v2030_v36, %v2031_v59  ;;  %v2520_v47 = vunpack.c.0.s8 %v2519_v54 }
 0x2a3   :  { %v2044_v2 = vsel %vm2033_vm6, %v2019_v4, %v2043_v22  ;;  %v2063_v26 = vadd.f32 %v2047_v6, %v1983_v62  ;;  %v2046_v17 = vsel %vm2033_vm6, %v2021_v60, %v2045_v21  ;;  %v2521_v60 = vlaneseq }
 0x2a4   :  { %v2061_v31 = vadd.f32 %v2044_v2, %v1981_v27  ;;  %v2062_v13 = vadd.f32 %v2046_v17, %v1982_v57 }
 0x2a5   :  { %2073 = vst.msk [vmem:[#allocation2 + $0x38] sm:$0x77] %vm2072_vm8, %v2063_v26  ;;  %v2522_v36 = vshrl.u32 %v2521_v60, 7  ;;  %vm5633_vm12 = vcmp.lt.s32.totalorder %v2521_v60, 512 }
 0x2a6   :  { %2069 = vst [vmem:[#allocation2 + $0x28] sm:$0x77] %v2061_v31  ;;  %2070 = vst [vmem:[#allocation2 + $0x30] sm:$0x77] %v2062_v13 }
 0x2a7   :  { %v2523_v59 = vsub.s32 %v2520_v47, %v2522_v36 }
 0x2ac   :  { %v2414_v45 = vld [vmem:[#allocation2 + $0x38] sm:$0x77] }
 0x2ad   :  { %v2412_v23 = vld [vmem:[#allocation2 + $0x28] sm:$0x77]  ;;  %v2413_v50 = vld [vmem:[#allocation2 + $0x30] sm:$0x77] }
 0x2b7   :  { %v2440_v61 = vpop.permute.xlu0 %2439 }
 0x2b8   :  { %v2442_v10 = vpop.permute.xlu1 %2441  ;;  %v2455_v9 = vrot.slane %v2440_v61, 4 }
 0x2b9   :  { %v2456_v19 = vrot.slane %v2442_v10, 4 }
 0x2bb   :  { %v2463_v14 = vsel %vm1599_vm1, %v2455_v9, %v2456_v19 }
 0x2bc   :  { %v2465_v0 = vsel %vm2464_vm9, %v2440_v61, %v2463_v14 }
 0x2bd   :  { %v2487_v58 = vadd.f32 %v2465_v0, %v2407_v8 }
 0x2bf   :  { %2495 = vst [vmem:[#allocation2] sm:$0x77] %v2487_v58 }
 0x2c6   :  { %v2505_v62 = vld [vmem:[#allocation2] sm:$0x77] }
 0x2cf   :  { %v2444_v56 = vpop.permute.xlu0 %2443  ;;  %v2446_v16 = vpop.permute.xlu1 %2445 }
 0x2d0   :  { %v2457_v3 = vrot.slane %v2444_v56, 4  ;;  %v2458_v15 = vrot.slane %v2446_v16, 4 }
 0x2d2   :  { %v2466_v18 = vsel %vm1599_vm1, %v2456_v19, %v2457_v3  ;;  %v2468_v5 = vsel %vm1599_vm1, %v2457_v3, %v2458_v15 }
 0x2d3   :  { %v2467_v55 = vsel %vm2464_vm9, %v2442_v10, %v2466_v18  ;;  %v2469_v11 = vsel %vm2464_vm9, %v2444_v56, %v2468_v5 }
 0x2d4   :  { %v2488_v12 = vadd.f32 %v2467_v55, %v2408_v28  ;;  %v2489_v29 = vadd.f32 %v2469_v11, %v2409_v20 }
 0x2d6   :  { %2496 = vst [vmem:[#allocation2 + $0x8] sm:$0x77] %v2488_v12  ;;  %2497 = vst [vmem:[#allocation2 + $0x10] sm:$0x77] %v2489_v29 }
 0x2dd   :  { %v2506_v6 = vld [vmem:[#allocation2 + $0x8] sm:$0x77]  ;;  %v2507_v2 = vld [vmem:[#allocation2 + $0x10] sm:$0x77] }
 0x2e7   :  { %v2448_v30 = vpop.permute.xlu0 %2447  ;;  %v2450_v33 = vpop.permute.xlu1 %2449 }
 0x2e8   :  { %v2459_v1 = vrot.slane %v2448_v30, 4  ;;  %v2460_v24 = vrot.slane %v2450_v33, 4 }
 0x2ea   :  { %v2470_v25 = vsel %vm1599_vm1, %v2458_v15, %v2459_v1  ;;  %v2472_v4 = vsel %vm1599_vm1, %v2459_v1, %v2460_v24 }
 0x2eb   :  { %v2471_v35 = vsel %vm2464_vm9, %v2446_v16, %v2470_v25  ;;  %v2473_v37 = vsel %vm2464_vm9, %v2448_v30, %v2472_v4 }
 0x2ec   :  { %v2490_v39 = vadd.f32 %v2471_v35, %v2410_v34  ;;  %v2491_v41 = vadd.f32 %v2473_v37, %v2411_v52  ;;  %v6258_v52 = vld [vmem:[#allocation19_spill] sm:$0xff] }
 0x2ed   :  { %3711 = vmatprep.subr.bf16.mxu0 %v6258_v52  ;;  %v6259_v37 = vld [vmem:[#allocation35_spill] sm:$0xff] }
 0x2ee   :  { %2498 = vst [vmem:[#allocation2 + $0x18] sm:$0x77] %v2490_v39  ;;  %2499 = vst [vmem:[#allocation2 + $0x20] sm:$0x77] %v2491_v41  ;;  %3733 = vmatprep.subr.bf16.mxu1 %v6259_v37 }
 0x2f5   :  { %v2508_v21 = vld [vmem:[#allocation2 + $0x18] sm:$0x77]  ;;  %v2509_v26 = vld [vmem:[#allocation2 + $0x20] sm:$0x77] }
 0x2ff   :  { %v2452_v42 = vpop.permute.xlu0 %2451  ;;  %v2454_v32 = vpop.permute.xlu1 %2453 }
 0x300   :  { %v2461_v43 = vrot.slane %v2452_v42, 4  ;;  %v2462_v44 = vrot.slane %v2454_v32, 4 }
 0x302   :  { %v2474_v40 = vsel %vm1599_vm1, %v2460_v24, %v2461_v43  ;;  %v2478_v7 = vsel %vm2464_vm9, %v2454_v32, %v2462_v44  ;;  %v2476_v48 = vsel %vm1599_vm1, %v2461_v43, %v2462_v44 }
 0x303   :  { %v2475_v46 = vsel %vm2464_vm9, %v2450_v33, %v2474_v40  ;;  %v2494_v49 = vadd.f32 %v2478_v7, %v2414_v45  ;;  %v2477_v51 = vsel %vm2464_vm9, %v2452_v42, %v2476_v48 }
 0x304   :  { %v2492_v53 = vadd.f32 %v2475_v46, %v2412_v23  ;;  %v2493_v63 = vadd.f32 %v2477_v51, %v2413_v50 }
 0x305   :  { %2504 = vst.msk [vmem:[#allocation2 + $0x38] sm:$0x77] %vm2503_vm11, %v2494_v49 }
 0x306   :  { %2500 = vst [vmem:[#allocation2 + $0x28] sm:$0x77] %v2492_v53  ;;  %2501 = vst [vmem:[#allocation2 + $0x30] sm:$0x77] %v2493_v63 }
 0x30c   :  { %v2512_v31 = vld [vmem:[#allocation2 + $0x38] sm:$0x77] }
 0x30d   :  { %v2510_v57 = vld [vmem:[#allocation2 + $0x28] sm:$0x77]  ;;  %v2511_v17 = vld [vmem:[#allocation2 + $0x30] sm:$0x77] }
 0x310   :  { %v2517_v22 = vpop.permute.xlu0 %2516 }
 0x311   :  { %v2524_v27 = vrot.slane %v2517_v22, %v2523_v59 }
 0x313   :  { %v2526_v13 = vadd.f32 %v2524_v27, %v2505_v62  ;;  %v2527_v61 = vadd.f32 %v2524_v27, %v2506_v6  ;;  %v2528_v10 = vadd.f32 %v2524_v27, %v2507_v2  ;;  %v2529_v9 = vadd.f32 %v2524_v27, %v2508_v21 }
 0x314   :  { %v2530_v19 = vadd.f32 %v2524_v27, %v2509_v26  ;;  %v2531_v14 = vadd.f32 %v2524_v27, %v2510_v57  ;;  %v2532_v8 = vadd.f32 %v2524_v27, %v2511_v17  ;;  %v2533_v0 = vadd.f32 %v2524_v27, %v2512_v31 }
 0x315   :  { %v2534_v58 = vmax.f32 %v2526_v13, 0.0  ;;  %v2535_v56 = vmax.f32 %v2527_v61, 0.0  ;;  %v2536_v16 = vmax.f32 %v2528_v10, 0.0  ;;  %v2537_v3 = vmax.f32 %v2529_v9, 0.0 }
 0x316   :  { %v2538_v15 = vmax.f32 %v2530_v19, 0.0  ;;  %v2539_v18 = vmax.f32 %v2531_v14, 0.0  ;;  %v2540_v28 = vmax.f32 %v2532_v8, 0.0  ;;  %v2541_v55 = vmax.f32 %v2533_v0, 0.0 }
 0x317   :  { %2542 = vst [vmem:[#allocation2] sm:$0x77] %v2534_v58  ;;  %2543 = vst [vmem:[#allocation2 + $0x8] sm:$0x77] %v2535_v56 }
 0x318   :  { %2544 = vst [vmem:[#allocation2 + $0x10] sm:$0x77] %v2536_v16  ;;  %2545 = vst [vmem:[#allocation2 + $0x18] sm:$0x77] %v2537_v3 }
 0x319   :  { %2546 = vst [vmem:[#allocation2 + $0x20] sm:$0x77] %v2538_v15  ;;  %2547 = vst [vmem:[#allocation2 + $0x28] sm:$0x77] %v2539_v18 }
 0x31a   :  { %2548 = vst [vmem:[#allocation2 + $0x30] sm:$0x77] %v2540_v28  ;;  %2549 = vst [vmem:[#allocation2 + $0x38] sm:$0x77] %v2541_v55 }
 0x31e   :  { %v2550_v20 = vld [vmem:[#allocation2] ss:$4 sm:$0xf]  ;;  %v2569_v30 = vld [vmem:[#allocation2 + $0x1] ss:$4 sm:$0xf] }
 0x31f   :  { %v2557_v11 = vld [vmem:[#allocation2 + $0x10] ss:$4 sm:$0xf]  ;;  %2555 = vst.msk [vmem:[#allocation3] ss:$4 sm:$0xf] %vm5633_vm12, %v2550_v20 }
 0x320   :  { %2559 = vst.msk [vmem:[#allocation3 + $0x1] ss:$4 sm:$0xf] %vm5633_vm12, %v2557_v11  ;;  %v2561_v12 = vld [vmem:[#allocation2 + $0x20] ss:$4 sm:$0xf] }
 0x321   :  { %v2565_v29 = vld [vmem:[#allocation2 + $0x30] ss:$4 sm:$0xf]  ;;  %2563 = vst.msk [vmem:[#allocation3 + $0x2] ss:$4 sm:$0xf] %vm5633_vm12, %v2561_v12 }
 0x322   :  { %2567 = vst.msk [vmem:[#allocation3 + $0x3] ss:$4 sm:$0xf] %vm5633_vm12, %v2565_v29  ;;  %v2573_v33 = vld [vmem:[#allocation2 + $0x11] ss:$4 sm:$0xf] }
 0x323   :  { %2571 = vst.msk [vmem:[#allocation3 + $0x10] ss:$4 sm:$0xf] %vm5633_vm12, %v2569_v30  ;;  %2575 = vst.msk [vmem:[#allocation3 + $0x11] ss:$4 sm:$0xf] %vm5633_vm12, %v2573_v33 }
 0x324   :  { %v2577_v1 = vld [vmem:[#allocation2 + $0x21] ss:$4 sm:$0xf]  ;;  %v2581_v24 = vld [vmem:[#allocation2 + $0x31] ss:$4 sm:$0xf] }
 0x325   :  { %2579 = vst.msk [vmem:[#allocation3 + $0x12] ss:$4 sm:$0xf] %vm5633_vm12, %v2577_v1  ;;  %2583 = vst.msk [vmem:[#allocation3 + $0x13] ss:$4 sm:$0xf] %vm5633_vm12, %v2581_v24 }
 0x326   :  { %v2585_v25 = vld [vmem:[#allocation2 + $0x2] ss:$4 sm:$0xf]  ;;  %v2589_v34 = vld [vmem:[#allocation2 + $0x12] ss:$4 sm:$0xf] }
 0x327   :  { %2587 = vst.msk [vmem:[#allocation3 + $0x20] ss:$4 sm:$0xf] %vm5633_vm12, %v2585_v25  ;;  %2591 = vst.msk [vmem:[#allocation3 + $0x21] ss:$4 sm:$0xf] %vm5633_vm12, %v2589_v34 }
 0x328   :  { %v2593_v35 = vld [vmem:[#allocation2 + $0x22] ss:$4 sm:$0xf]  ;;  %v2597_v4 = vld [vmem:[#allocation2 + $0x32] ss:$4 sm:$0xf] }
 0x329   :  { %2595 = vst.msk [vmem:[#allocation3 + $0x22] ss:$4 sm:$0xf] %vm5633_vm12, %v2593_v35  ;;  %2599 = vst.msk [vmem:[#allocation3 + $0x23] ss:$4 sm:$0xf] %vm5633_vm12, %v2597_v4 }
 0x32a   :  { %4029 = dma.done.wait [#allocation5], 12288 }
 0x32b   :  { %4030 = vsyncadd [#allocation5], 4294955008  ;;  %v6260_v39 = vld [vmem:[#allocation11_spill] sm:$0xff]  ;;  %v6262_v42 = vld [vmem:[#allocation20_spill] sm:$0xff]  ;;  %vm4039_vm13 = vmmov 0   ;;  %s4042_s21 = smov 32  }
 0x32c   :  { %3712 = vmatpush3.bf16.msra.mxu0 %v6260_v39  ;;  %v6261_v41 = vld [vmem:[#allocation27_spill] sm:$0xff]  ;;  %v6263_v32 = vld [vmem:[#allocation36_spill] sm:$0xff]  ;;  %v6266_v40 = vld [vmem:[#allocation21_spill] sm:$0xff]  ;;  %vm2991_vm14 = vcmask 261120   ;;  %vm3410_vm15 = vcmask 1040384   ;;  %vm3412_vm0 = vcmask 1041408  }
 0x32d   :  { %3734 = vmatpush3.bf16.msra.mxu1 %v6261_v41  ;;  %3713 = vmatprep.subr.bf16.mxu0 %v6262_v42  ;;  %v6264_v43 = vld [vmem:[#allocation12_spill] sm:$0xff]  ;;  %v6267_v45 = vld [vmem:[#allocation37_spill] sm:$0xff]  ;;  %v6270_v51 = vld [vmem:[#allocation22_spill] sm:$0xff] }
 0x32e   :  { %3735 = vmatprep.subr.bf16.mxu1 %v6263_v32  ;;  %v6265_v44 = vld [vmem:[#allocation28_spill] sm:$0xff]  ;;  %v2605_v23 = vld [vmem:[#allocation3 + $0x8] sm:$0xff]  ;;  %v6274_v36 = vld [vmem:[#allocation23_spill] sm:$0xff] }
 0x32f   :  { %v2604_v7 = vld [vmem:[#allocation3] sm:$0xff]  ;;  %v2617_v48 = vcombine.high %v2605_v23, %v2605_v23  ;;  %v6271_v53 = vld [vmem:[#allocation38_spill] sm:$0xff]  ;;  %v6275_v59 = vld [vmem:[#allocation39_spill] sm:$0xff]  ;;  %v2630_v0 = vpack.c.bf16 %v2605_v23, %v2605_v23 }
 0x330   :  { %3714 = vmatpush3.bf16.msra.mxu0 %v6264_v43  ;;  %v2616_v46 = vcombine.high %v2604_v7, %v2604_v7  ;;  %v6268_v49 = vld [vmem:[#allocation13_spill] sm:$0xff]  ;;  %v6272_v54 = vld [vmem:[#allocation14_spill] sm:$0xff]  ;;  %v6276_v22 = vld [vmem:[#allocation15_spill] sm:$0xff]  ;;  %v2628_v8 = vpack.c.bf16 %v2604_v7, %v2604_v7 }
 0x331   :  { %3736 = vmatpush3.bf16.msra.mxu1 %v6265_v44  ;;  %3715 = vmatprep.subr.bf16.mxu0 %v6266_v40  ;;  %v6269_v50 = vld [vmem:[#allocation29_spill] sm:$0xff]  ;;  %v2631_v38 = vpack.c.bf16 %v2617_v48, %v2617_v48  ;;  %v6273_v47 = vld [vmem:[#allocation30_spill] sm:$0xff]  ;;  %v6277_v62 = vld [vmem:[#allocation31_spill] sm:$0xff] }
 0x332   :  { %3737 = vmatprep.subr.bf16.mxu1 %v6267_v45  ;;  %v2629_v63 = vpack.c.bf16 %v2616_v46, %v2616_v46  ;;  %v6278_v6 = vld [vmem:[#allocation24_spill] sm:$0xff]  ;;  %v6282_v26 = vld [vmem:[#allocation25_spill] sm:$0xff]  ;;  %v2606_v17 = vld [vmem:[#allocation3 + $0x10] sm:$0xff] }
 0x333   :  { %2815 = vmatprep.mubr.bf16.mxu1 %v2631_v38  ;;  %v6279_v27 = vld [vmem:[#allocation40_spill] sm:$0xff]  ;;  %v6283_v57 = vld [vmem:[#allocation41_spill] sm:$0xff]  ;;  %v6286_v10 = vld [vmem:[#allocation26_spill] sm:$0xff]  ;;  %v2618_v19 = vcombine.high %v2606_v17, %v2606_v17 }
 0x334   :  { %3716 = vmatpush3.bf16.msra.mxu0 %v6268_v49  ;;  %2775 = vmatprep.mubr.bf16.mxu0 %v2629_v63  ;;  %v6280_v2 = vld [vmem:[#allocation16_spill] sm:$0xff]  ;;  %v6284_v13 = vld [vmem:[#allocation17_spill] sm:$0xff]  ;;  %v6287_v9 = vld [vmem:[#allocation42_spill] sm:$0xff] }
 0x335   :  { %3738 = vmatpush3.bf16.msra.mxu1 %v6269_v50  ;;  %3717 = vmatprep.subr.bf16.mxu0 %v6270_v51  ;;  %v6281_v21 = vld [vmem:[#allocation32_spill] sm:$0xff]  ;;  %v6285_v61 = vld [vmem:[#allocation33_spill] sm:$0xff]  ;;  %v6288_v58 = vld [vmem:[#allocation18_spill] sm:$0xff]  ;;  %v2633_v15 = vpack.c.bf16 %v2618_v19, %v2618_v19 }
 0x336   :  { %3739 = vmatprep.subr.bf16.mxu1 %v6271_v53  ;;  %v2607_v31 = vld [vmem:[#allocation3 + $0x18] sm:$0xff]  ;;  %v6289_v56 = vld [vmem:[#allocation34_spill] sm:$0xff]  ;;  %v6298_v29 = vld [vmem:[#allocation53_spill] sm:$0xff]  ;;  %v2632_v53 = vpack.c.bf16 %v2606_v17, %v2606_v17 }
 0x337   :  { %v2619_v14 = vcombine.high %v2607_v31, %v2607_v31  ;;  %v6290_v16 = vld [vmem:[#allocation51_spill] sm:$0xff]  ;;  %v6294_v5 = vld [vmem:[#allocation52_spill] sm:$0xff]  ;;  %v6299_v30 = vld [vmem:[#allocation69_spill] sm:$0xff]  ;;  %v2634_v63 = vpack.c.bf16 %v2607_v31, %v2607_v31 }
 0x338   :  { %3718 = vmatpush3.bf16.msra.mxu0 %v6272_v54  ;;  %v6291_v3 = vld [vmem:[#allocation67_spill] sm:$0xff]  ;;  %v6295_v20 = vld [vmem:[#allocation68_spill] sm:$0xff]  ;;  %v6300_v33 = vld [vmem:[#allocation45_spill] sm:$0xff] }
 0x339   :  { %3740 = vmatpush3.bf16.msra.mxu1 %v6273_v47  ;;  %3719 = vmatprep.subr.bf16.mxu0 %v6274_v36  ;;  %v2635_v18 = vpack.c.bf16 %v2619_v14, %v2619_v14  ;;  %v6292_v28 = vld [vmem:[#allocation43_spill] sm:$0xff]  ;;  %v6296_v11 = vld [vmem:[#allocation44_spill] sm:$0xff]  ;;  %v6301_v1 = vld [vmem:[#allocation61_spill] sm:$0xff] }
 0x33a   :  { %3741 = vmatprep.subr.bf16.mxu1 %v6275_v59  ;;  %v6293_v55 = vld [vmem:[#allocation59_spill] sm:$0xff]  ;;  %v6297_v12 = vld [vmem:[#allocation60_spill] sm:$0xff]  ;;  %v6302_v24 = vld [vmem:[#allocation54_spill] sm:$0xff] }
 0x33b   :  { %v6303_v25 = vld [vmem:[#allocation70_spill] sm:$0xff]  ;;  %v6306_v4 = vld [vmem:[#allocation55_spill] sm:$0xff]  ;;  %v6310_v41 = vld [vmem:[#allocation56_spill] sm:$0xff] }
 0x33c   :  { %3720 = vmatpush3.bf16.msra.mxu0 %v6276_v22  ;;  %v6304_v34 = vld [vmem:[#allocation46_spill] sm:$0xff]  ;;  %v6307_v52 = vld [vmem:[#allocation71_spill] sm:$0xff]  ;;  %v6311_v42 = vld [vmem:[#allocation72_spill] sm:$0xff] }
 0x33d   :  { %3742 = vmatpush3.bf16.msra.mxu1 %v6277_v62  ;;  %3721 = vmatprep.subr.bf16.mxu0 %v6278_v6  ;;  %v6305_v35 = vld [vmem:[#allocation62_spill] sm:$0xff]  ;;  %v6308_v37 = vld [vmem:[#allocation47_spill] sm:$0xff]  ;;  %v6312_v32 = vld [vmem:[#allocation48_spill] sm:$0xff] }
 0x33e   :  { %3743 = vmatprep.subr.bf16.mxu1 %v6279_v27  ;;  %v6309_v39 = vld [vmem:[#allocation63_spill] sm:$0xff]  ;;  %v6313_v43 = vld [vmem:[#allocation64_spill] sm:$0xff]  ;;  %v6314_v44 = vld [vmem:[#allocation57_spill] sm:$0xff] }
 0x33f   :  { %v6315_v40 = vld [vmem:[#allocation73_spill] sm:$0xff]  ;;  %v6318_v48 = vld [vmem:[#allocation58_spill] sm:$0xff]  ;;  %v6322_v47 = vld [vmem:[#allocation83_spill] sm:$0xff] }
 0x340   :  { %3722 = vmatpush3.bf16.msra.mxu0 %v6280_v2  ;;  %v2608_v45 = vld [vmem:[#allocation3 + $0x20] sm:$0xff]  ;;  %v2609_v7 = vld [vmem:[#allocation3 + $0x28] sm:$0xff]  ;;  %v6323_v36 = vld [vmem:[#allocation99_spill] sm:$0xff] }
 0x341   :  { %3744 = vmatpush3.bf16.msra.mxu1 %v6281_v21  ;;  %3723 = vmatprep.subr.bf16.mxu0 %v6282_v26  ;;  %v6316_v23 = vld [vmem:[#allocation49_spill] sm:$0xff]  ;;  %v6319_v49 = vld [vmem:[#allocation74_spill] sm:$0xff]  ;;  %v2620_v50 = vcombine.high %v2608_v45, %v2608_v45  ;;  %v2621_v51 = vcombine.high %v2609_v7, %v2609_v7  ;;  %v6324_v62 = vld [vmem:[#allocation75_spill] sm:$0xff] }
 0x342   :  { %3745 = vmatprep.subr.bf16.mxu1 %v6283_v57  ;;  %v6317_v46 = vld [vmem:[#allocation65_spill] sm:$0xff]  ;;  %v6320_v38 = vld [vmem:[#allocation50_spill] sm:$0xff]  ;;  %v6325_v6 = vld [vmem:[#allocation91_spill] sm:$0xff] }
 0x343   :  { %v6321_v54 = vld [vmem:[#allocation66_spill] sm:$0xff]  ;;  %v2637_v59 = vpack.c.bf16 %v2620_v50, %v2620_v50  ;;  %v2639_v22 = vpack.c.bf16 %v2621_v51, %v2621_v51  ;;  %v6326_v27 = vld [vmem:[#allocation84_spill] sm:$0xff]  ;;  %v6330_v57 = vld [vmem:[#allocation85_spill] sm:$0xff] }
 0x344   :  { %3724 = vmatpush3.bf16.msra.mxu0 %v6284_v13  ;;  %v6327_v2 = vld [vmem:[#allocation100_spill] sm:$0xff]  ;;  %v6331_v17 = vld [vmem:[#allocation101_spill] sm:$0xff]  ;;  %v6337_v19 = vld [vmem:[#allocation94_spill] sm:$0xff] }
 0x345   :  { %3746 = vmatpush3.bf16.msra.mxu1 %v6285_v61  ;;  %3725 = vmatprep.subr.bf16.mxu0 %v6286_v10  ;;  %v6328_v21 = vld [vmem:[#allocation76_spill] sm:$0xff]  ;;  %v6332_v31 = vld [vmem:[#allocation77_spill] sm:$0xff]  ;;  %v6334_v61 = vld [vmem:[#allocation86_spill] sm:$0xff] }
 0x346   :  { %3747 = vmatprep.subr.bf16.mxu1 %v6287_v9  ;;  %v6329_v26 = vld [vmem:[#allocation92_spill] sm:$0xff]  ;;  %v6333_v13 = vld [vmem:[#allocation93_spill] sm:$0xff]  ;;  %v6335_v10 = vld [vmem:[#allocation102_spill] sm:$0xff] }
 0x347   :  { %v6336_v9 = vld [vmem:[#allocation78_spill] sm:$0xff]  ;;  %v6338_v14 = vld [vmem:[#allocation87_spill] sm:$0xff] }
 0x348   :  { %3726 = vmatpush3.bf16.msra.mxu0 %v6288_v58  ;;  %v6341_v58 = vld [vmem:[#allocation95_spill] sm:$0xff] }
 0x349   :  { %3748 = vmatpush3.bf16.msra.mxu1 %v6289_v56  ;;  %3755 = vmatprep.subr.bf16.mxu0 %v6290_v16  ;;  %v6342_v56 = vld [vmem:[#allocation88_spill] sm:$0xff] }
 0x34a   :  { %3777 = vmatprep.subr.bf16.mxu1 %v6291_v3  ;;  %v6343_v16 = vld [vmem:[#allocation104_spill] sm:$0xff] }
 0x34b   :  { %2776 = vmatmul.mubr.bf16.vlgmr.msra.gmra.mrb[64].mxu0 %v2628_v8  ;;  %v6339_v8 = vld [vmem:[#allocation103_spill] sm:$0xff]  ;;  %v6344_v3 = vld [vmem:[#allocation80_spill] sm:$0xff] }
 0x34c   :  { %2816 = vmatmul.mubr.bf16.vlgmr.msra.gmra.mrb[64].mxu1 %v2630_v0  ;;  %3756 = vmatpush3.bf16.msra.mxu0 %v6292_v28  ;;  %v6340_v0 = vld [vmem:[#allocation79_spill] sm:$0xff]  ;;  %v6347_v28 = vld [vmem:[#allocation105_spill] sm:$0xff] }
 0x34d   :  { %3778 = vmatpush3.bf16.msra.mxu1 %v6293_v55  ;;  %3757 = vmatprep.subr.bf16.mxu0 %v6294_v5  ;;  %v6348_v55 = vld [vmem:[#allocation81_spill] sm:$0xff] }
 0x34e   :  { %3779 = vmatprep.subr.bf16.mxu1 %v6295_v20  ;;  %2855 = vmatprep.mubr.bf16.mxu0 %v2633_v15  ;;  %v6345_v15 = vld [vmem:[#allocation96_spill] sm:$0xff]  ;;  %v6349_v5 = vld [vmem:[#allocation97_spill] sm:$0xff]  ;;  %v6350_v20 = vld [vmem:[#allocation90_spill] sm:$0xff] }
 0x34f   :  { %2895 = vmatprep.mubr.bf16.mxu1 %v2635_v18  ;;  %v6346_v18 = vld [vmem:[#allocation89_spill] sm:$0xff] }
 0x350   :  { %3758 = vmatpush3.bf16.msra.mxu0 %v6296_v11  ;;  %v6351_v11 = vld [vmem:[#allocation106_spill] sm:$0xff] }
 0x351   :  { %3780 = vmatpush3.bf16.msra.mxu1 %v6297_v12  ;;  %3759 = vmatprep.subr.bf16.mxu0 %v6298_v29  ;;  %v2636_v12 = vpack.c.bf16 %v2608_v45, %v2608_v45  ;;  %v2638_v29 = vpack.c.bf16 %v2609_v7, %v2609_v7 }
 0x352   :  { %3781 = vmatprep.subr.bf16.mxu1 %v6299_v30  ;;  %v6352_v30 = vld [vmem:[#allocation82_spill] sm:$0xff] }
 0x354   :  { %3760 = vmatpush3.bf16.msra.mxu0 %v6300_v33  ;;  %v6353_v33 = vld [vmem:[#allocation98_spill] sm:$0xff] }
 0x355   :  { %3782 = vmatpush3.bf16.msra.mxu1 %v6301_v1  ;;  %3761 = vmatprep.subr.bf16.mxu0 %v6302_v24  ;;  %v4038_v1 = vmov 0.0|0.0   ;;  %v5761_v24 = vld [vmem:[%s5858_s4] sm:$0xff]  }
 0x356   :  { %3783 = vmatprep.subr.bf16.mxu1 %v6303_v25  ;;  %v4040_v25 = vmov 0.0  }
 0x358   :  { %3762 = vmatpush3.bf16.msra.mxu0 %v6304_v34  ;;  %v5771_v34 = vld [vmem:[%s5858_s4 + $0x8] sm:$0xff]  }
 0x359   :  { %3784 = vmatpush3.bf16.msra.mxu1 %v6305_v35  ;;  %3763 = vmatprep.subr.bf16.mxu0 %v6306_v4 }
 0x35a   :  { %3785 = vmatprep.subr.bf16.mxu1 %v6307_v52  ;;  %v3682_v52 = vld [vmem:[%s5859_s5] ss:$0 sm:$0xff]  ;;  %s4041_s5 = smov 64  }
 0x35c   :  { %3764 = vmatpush3.bf16.msra.mxu0 %v6308_v37 }
 0x35d   :  { %3786 = vmatpush3.bf16.msra.mxu1 %v6309_v39  ;;  %3765 = vmatprep.subr.bf16.mxu0 %v6310_v41 }
 0x35e   :  { %3787 = vmatprep.subr.bf16.mxu1 %v6311_v42 }
 0x360   :  { %3766 = vmatpush3.bf16.msra.mxu0 %v6312_v32 }
 0x361   :  { %3788 = vmatpush3.bf16.msra.mxu1 %v6313_v43  ;;  %3767 = vmatprep.subr.bf16.mxu0 %v6314_v44 }
 0x362   :  { %3789 = vmatprep.subr.bf16.mxu1 %v6315_v40 }
 0x364   :  { %3768 = vmatpush3.bf16.msra.mxu0 %v6316_v23 }
 0x365   :  { %3790 = vmatpush3.bf16.msra.mxu1 %v6317_v46  ;;  %3769 = vmatprep.subr.bf16.mxu0 %v6318_v48 }
 0x366   :  { %3791 = vmatprep.subr.bf16.mxu1 %v6319_v49 }
 0x368   :  { %3770 = vmatpush3.bf16.msra.mxu0 %v6320_v38 }
 0x369   :  { %3792 = vmatpush3.bf16.msra.mxu1 %v6321_v54  ;;  %3799 = vmatprep.subr.bf16.mxu0 %v6322_v47 }
 0x36a   :  { %3821 = vmatprep.subr.bf16.mxu1 %v6323_v36 }
 0x36b   :  { %2856 = vmatmul.mubr.bf16.vlgmr.msra.gmra.mrb[68].mxu0 %v2632_v53 }
 0x36c   :  { %2896 = vmatmul.mubr.bf16.vlgmr.msra.gmra.mrb[68].mxu1 %v2634_v63  ;;  %3800 = vmatpush3.bf16.msra.mxu0 %v6324_v62 }
 0x36d   :  { %3822 = vmatpush3.bf16.msra.mxu1 %v6325_v6  ;;  %3801 = vmatprep.subr.bf16.mxu0 %v6326_v27 }
 0x36e   :  { %3823 = vmatprep.subr.bf16.mxu1 %v6327_v2  ;;  %2935 = vmatprep.mubr.bf16.mxu0 %v2637_v59 }
 0x36f   :  { %2975 = vmatprep.mubr.bf16.mxu1 %v2639_v22 }
 0x370   :  { %3802 = vmatpush3.bf16.msra.mxu0 %v6328_v21 }
 0x371   :  { %3824 = vmatpush3.bf16.msra.mxu1 %v6329_v26  ;;  %3803 = vmatprep.subr.bf16.mxu0 %v6330_v57 }
 0x372   :  { %3825 = vmatprep.subr.bf16.mxu1 %v6331_v17 }
 0x374   :  { %3804 = vmatpush3.bf16.msra.mxu0 %v6332_v31 }
 0x375   :  { %3826 = vmatpush3.bf16.msra.mxu1 %v6333_v13  ;;  %3805 = vmatprep.subr.bf16.mxu0 %v6334_v61 }
 0x376   :  { %3827 = vmatprep.subr.bf16.mxu1 %v6335_v10 }
 0x378   :  { %3806 = vmatpush3.bf16.msra.mxu0 %v6336_v9 }
 0x379   :  { %3828 = vmatpush3.bf16.msra.mxu1 %v6337_v19  ;;  %3807 = vmatprep.subr.bf16.mxu0 %v6338_v14 }
 0x37a   :  { %3829 = vmatprep.subr.bf16.mxu1 %v6339_v8 }
 0x37c   :  { %3808 = vmatpush3.bf16.msra.mxu0 %v6340_v0 }
 0x37d   :  { %3830 = vmatpush3.bf16.msra.mxu1 %v6341_v58  ;;  %3809 = vmatprep.subr.bf16.mxu0 %v6342_v56 }
 0x37e   :  { %3831 = vmatprep.subr.bf16.mxu1 %v6343_v16 }
 0x380   :  { %3810 = vmatpush3.bf16.msra.mxu0 %v6344_v3 }
 0x381   :  { %3832 = vmatpush3.bf16.msra.mxu1 %v6345_v15  ;;  %3811 = vmatprep.subr.bf16.mxu0 %v6346_v18 }
 0x382   :  { %3833 = vmatprep.subr.bf16.mxu1 %v6347_v28 }
 0x384   :  { %3812 = vmatpush3.bf16.msra.mxu0 %v6348_v55 }
 0x385   :  { %3834 = vmatpush3.bf16.msra.mxu1 %v6349_v5  ;;  %3813 = vmatprep.subr.bf16.mxu0 %v6350_v20 }
 0x386   :  { %3835 = vmatprep.subr.bf16.mxu1 %v6351_v11 }
 0x388   :  { %3814 = vmatpush3.bf16.msra.mxu0 %v6352_v30 }
 0x389   :  { %3836 = vmatpush3.bf16.msra.mxu1 %v6353_v33  ;;  %3923 = vmatprep.subr.bf16.mxu0 %v4038_v1 }
 0x38a   :  { %3929 = vmatprep.subr.bf16.mxu1 %v4038_v1 }
 0x38b   :  { %2936 = vmatmul.mubr.bf16.vlgmr.msra.gmra.mrb[72].mxu0 %v2636_v12 }
 0x38c   :  { %2976 = vmatmul.mubr.bf16.vlgmr.msra.gmra.mrb[72].mxu1 %v2638_v29  ;;  %3925 = vmatpush3.bf16.msra.mxu0 %v5761_v24 }
 0x38d   :  { %3876 = vmatprep.mubr.msk.f32.mxu0 %vm4039_vm13, %v4040_v25  ;;  %3926 = vmatprep.subr.bf16.mxu0 %v4038_v1 }
 0x38e   :  { %3931 = vmatpush3.bf16.msra.mxu1 %v5761_v24  ;;  %3887 = vmatprep.mubr.msk.f32.mxu1 %vm4039_vm13, %v4040_v25 }
 0x38f   :  { %3932 = vmatprep.subr.bf16.mxu1 %v4038_v1 }
 0x390   :  { %3928 = vmatpush3.bf16.msra.mxu0 %v5771_v34 }
 0x391   :  { %3935 = vmatprep.subr.bf16.mxu0 %v4038_v1 }
 0x392   :  { %3934 = vmatpush3.bf16.msra.mxu1 %v5771_v34 }
 0x393   :  { %3941 = vmatprep.subr.bf16.mxu1 %v4038_v1  ;;  %3877 = vmatmul.mubr.f32.vlgmr.msra.gmra.mrb[76].mxu0 %v4040_v25 }
 0x394   :  { %3937 = vmatpush3.bf16.msra.mxu0 %v5761_v24  ;;  %3898 = vmatprep.mubr.msk.f32.mxu0 %vm4039_vm13, %v4040_v25 }
 0x395   :  { %3938 = vmatprep.subr.bf16.mxu0 %v4038_v1 }
 0x398   :  { %3940 = vmatpush3.bf16.msra.mxu0 %v5771_v34 }
 0x399   :  { %3947 = vmatprep.subr.bf16.mxu0 %v4038_v1 }
 0x41e   :  { %v3727_v35 = vpop.f32.mrb[64].mxu0 }
 0x41f   :  { %v3749_v4 = vpop.f32.mrb[64].mxu1  ;;  %v3728_v37 = vpop.f32.mrb[65].mxu0 }
 0x420   :  { %v3750_v39 = vpop.f32.mrb[65].mxu1  ;;  %v3729_v41 = vadd.f32 %v3728_v37, %v3727_v35  ;;  %v3730_v42 = vpop.f32.mrb[66].mxu0 }
 0x421   :  { %v3751_v32 = vadd.f32 %v3750_v39, %v3749_v4  ;;  %v3752_v43 = vpop.f32.mrb[66].mxu1  ;;  %v3731_v44 = vpop.f32.mrb[67].mxu0 }
 0x422   :  { %v3753_v40 = vpop.f32.mrb[67].mxu1  ;;  %v2778_v45 = vadd.f32 %v3729_v41, %v3682_v52 }
 0x424   :  { %v2818_v7 = vadd.f32 %v3751_v32, %v2778_v45 }
 0x43e   :  { %v3771_v23 = vpop.f32.mrb[68].mxu0 }
 0x43f   :  { %v3793_v46 = vpop.f32.mrb[68].mxu1  ;;  %v3772_v48 = vpop.f32.mrb[69].mxu0 }
 0x440   :  { %v3794_v49 = vpop.f32.mrb[69].mxu1  ;;  %v3773_v50 = vadd.f32 %v3772_v48, %v3771_v23  ;;  %v3774_v51 = vpop.f32.mrb[70].mxu0 }
 0x441   :  { %v3795_v53 = vadd.f32 %v3794_v49, %v3793_v46  ;;  %v3796_v63 = vpop.f32.mrb[70].mxu1  ;;  %v3775_v38 = vpop.f32.mrb[71].mxu0 }
 0x442   :  { %v3797_v54 = vpop.f32.mrb[71].mxu1  ;;  %v2858_v47 = vadd.f32 %v3773_v50, %v2818_v7 }
 0x444   :  { %v2898_v36 = vadd.f32 %v3795_v53, %v2858_v47 }
 0x45e   :  { %v3815_v59 = vpop.f32.mrb[72].mxu0 }
 0x45f   :  { %v3837_v22 = vpop.f32.mrb[72].mxu1  ;;  %v3816_v62 = vpop.f32.mrb[73].mxu0 }
 0x460   :  { %v3838_v6 = vpop.f32.mrb[73].mxu1  ;;  %v3817_v27 = vadd.f32 %v3816_v62, %v3815_v59  ;;  %v3818_v2 = vpop.f32.mrb[74].mxu0 }
 0x461   :  { %v3839_v21 = vadd.f32 %v3838_v6, %v3837_v22  ;;  %v3840_v26 = vpop.f32.mrb[74].mxu1  ;;  %v3819_v57 = vpop.f32.mrb[75].mxu0 }
 0x462   :  { %v3841_v17 = vpop.f32.mrb[75].mxu1  ;;  %v2938_v31 = vadd.f32 %v3817_v27, %v2898_v36 }
 0x464   :  { %v5791_v13 = vadd.f32 %v3839_v21, %v2938_v31 }
 0x466   :  { %v3061_v61 = vpop.f32.mrb[76].mxu0 }
 0x467   :  { %v3065_v10 = vadd.f32 %v3061_v61, %v5791_v13  ;;  %v3878_v9 = vpop.f32.mrb[77].mxu0 }
 0x469   :  { %3971 = vtanh.f32 %v3065_v10  ;;  %v3683_v14 = vmul.f32 -1.442695, %v3065_v10 }
 0x46b   :  { %3973 = vpow2.f32 %v3683_v14 }
 0x473   :  { %v3972_v19 = vpop.eup %3971 }
 0x474   :  { %3075 = vrot.lane.b32.xlu0 %v3972_v19, %s4041_s5 }
 0x475   :  { %v3974_v8 = vpop.eup %3973 }
 0x476   :  { %v3069_v0 = vadd.f32 1.0, %v3974_v8 }
 0x478   :  { %3975 = vrcp.f32 %v3069_v0 }
 0x482   :  { %v3976_v58 = vpop.eup %3975 }
 0x483   :  { %v3073_v3 = vmul.f32 0.0, %v3976_v58 }
 0x4e6   :  { %v3076_v56 = vpop.permute.xlu0 %3075 }
 0x4e7   :  { %v3078_v16 = vmul.f32 %v3976_v58, %v3076_v56 }
 0x4e9   :  { %3080 = vrot.lane.b32.xlu0 %v3078_v16, %s4042_s21 }
 0x55b   :  { %v3081_v15 = vpop.permute.xlu0 %3080 }
 0x55c   :  { %v3083_v18 = vadd.f32 %v3081_v15, %v3073_v3 }
 0x55e   :  { %3977 = vtanh.f32 %v3083_v18 }
 0x568   :  { %v3978_v28 = vpop.eup %3977 }
 0x569   :  { %3086 = vrot.lane.b32.xlu1 %v3978_v28, %s4041_s5  ;;  %v3710_v28 = vld [vmem:[%s5860_s6 + $0x8] sm:$0xff]  }
 0x5db   :  { %v3087_v55 = vpop.permute.xlu1 %3086 }
 0x5dc   :  { %v5797_v5 = vmul.f32 %v3976_v58, %v3087_v55 }
 0x5de   :  { %3091 = vrot.lane.b32.xlu1 %v5797_v5, %s4042_s21 }
 0x650   :  { %v3092_v20 = vpop.permute.xlu1 %3091 }
 0x651   :  { %3888 = vmatmul.mubr.msk.f32.vlgmr.msra.gmra.mrb[76].mxu1 %vm2991_vm14, %v3092_v20 }
 0x652   :  { %3943 = vmatpush3.bf16.msra.mxu1 %v5761_v24  ;;  %3909 = vmatprep.mubr.msk.f32.mxu1 %vm4039_vm13, %v4040_v25 }
 0x653   :  { %3944 = vmatprep.subr.bf16.mxu1 %v4038_v1 }
 0x656   :  { %3946 = vmatpush3.bf16.msra.mxu1 %v5771_v34  ;;  %v3177_v34 = vrot.slane %v3083_v18, 7 }
 0x724   :  { %v3161_v11 = vpop.f32.mrb[76].mxu1 }
 0x725   :  { %v3166_v12 = vrot.slane %v3161_v11, 7  ;;  %v3889_v29 = vpop.f32.mrb[77].mxu1 }
 0x726   :  { %v3506_v29 = vand.u32 127, %v2521_v60 }
 0x727   :  { %v3168_v30 = vadd.f32 %v3166_v12, %v5791_v13 }
 0x728   :  { %vm3507_vm2 = vcmp.lt.s32.totalorder %v3506_v29, 5 }
 0x729   :  { %3979 = vtanh.f32 %v3168_v30  ;;  %v3685_v35 = vmul.f32 -1.442695, %v3168_v30 }
 0x72b   :  { %3981 = vpow2.f32 %v3685_v35 }
 0x733   :  { %v3980_v33 = vpop.eup %3979 }
 0x734   :  { %3181 = vrot.lane.b32.xlu0 %v3980_v33, %s4041_s5 }
 0x735   :  { %v3982_v4 = vpop.eup %3981 }
 0x736   :  { %v3172_v24 = vadd.f32 1.0, %v3982_v4 }
 0x738   :  { %3983 = vrcp.f32 %v3172_v24 }
 0x742   :  { %v3984_v52 = vpop.eup %3983 }
 0x743   :  { %v3179_v41 = vmul.f32 %v3984_v52, %v3177_v34 }
 0x7a6   :  { %v3182_v37 = vpop.permute.xlu0 %3181 }
 0x7a7   :  { %v3184_v39 = vmul.f32 %v3984_v52, %v3182_v37 }
 0x7a9   :  { %3186 = vrot.lane.b32.xlu1 %v3184_v39, %s4042_s21 }
 0x81b   :  { %v3187_v42 = vpop.permute.xlu1 %3186 }
 0x81c   :  { %v3189_v32 = vadd.f32 %v3187_v42, %v3179_v41 }
 0x81e   :  { %3985 = vtanh.f32 %v3189_v32 }
 0x828   :  { %v3986_v43 = vpop.eup %3985 }
 0x829   :  { %3192 = vrot.lane.b32.xlu0 %v3986_v43, %s4041_s5 }
 0x89b   :  { %v3193_v44 = vpop.permute.xlu0 %3192 }
 0x89c   :  { %v3195_v40 = vmul.f32 %v3984_v52, %v3193_v44 }
 0x89e   :  { %v3197_v45 = vrot.slane %v3195_v40, 1  ;;  %v3411_v2 = vsel %vm3410_vm15, %v5797_v5, %v3195_v40 }
 0x8a0   :  { %3198 = vrot.lane.b32.xlu1 %v3197_v45, %s4042_s21 }
 0x912   :  { %v3199_v7 = vpop.permute.xlu1 %3198 }
 0x913   :  { %3899 = vmatmul.mubr.msk.f32.vlgmr.msra.gmra.mrb[78].mxu0 %vm2991_vm14, %v3199_v7 }
 0x914   :  { %3920 = vmatprep.mubr.msk.f32.mxu0 %vm4039_vm13, %v4040_v25  ;;  %v3284_v25 = vrot.slane %v3189_v32, 7 }
 0x9e6   :  { %v3268_v23 = vpop.f32.mrb[78].mxu0 }
 0x9e7   :  { %v3273_v46 = vrot.slane %v3268_v23, 6  ;;  %v3900_v48 = vpop.f32.mrb[79].mxu0 }
 0x9e9   :  { %v3275_v49 = vadd.f32 %v3273_v46, %v5791_v13 }
 0x9eb   :  { %3987 = vtanh.f32 %v3275_v49  ;;  %v3687_v51 = vmul.f32 -1.442695, %v3275_v49 }
 0x9ed   :  { %3989 = vpow2.f32 %v3687_v51 }
 0x9f5   :  { %v3988_v50 = vpop.eup %3987 }
 0x9f6   :  { %3288 = vrot.lane.b32.xlu0 %v3988_v50, %s4041_s5 }
 0x9f7   :  { %v3990_v53 = vpop.eup %3989 }
 0x9f8   :  { %v3279_v63 = vadd.f32 1.0, %v3990_v53 }
 0x9fa   :  { %3991 = vrcp.f32 %v3279_v63 }
 0xa04   :  { %v3992_v38 = vpop.eup %3991 }
 0xa05   :  { %v3286_v36 = vmul.f32 %v3992_v38, %v3284_v25 }
 0xa68   :  { %v3289_v54 = vpop.permute.xlu0 %3288 }
 0xa69   :  { %v3291_v47 = vmul.f32 %v3992_v38, %v3289_v54 }
 0xa6b   :  { %3293 = vrot.lane.b32.xlu1 %v3291_v47, %s4042_s21 }
 0xadd   :  { %v3294_v59 = vpop.permute.xlu1 %3293 }
 0xade   :  { %v3296_v22 = vadd.f32 %v3294_v59, %v3286_v36 }
 0xae0   :  { %3993 = vtanh.f32 %v3296_v22  ;;  %v3391_v16 = vrot.slane %v3296_v22, 7 }
 0xaea   :  { %v3994_v62 = vpop.eup %3993 }
 0xaeb   :  { %3299 = vrot.lane.b32.xlu0 %v3994_v62, %s4041_s5 }
 0xb5d   :  { %v3300_v6 = vpop.permute.xlu0 %3299 }
 0xb5e   :  { %v3302_v27 = vmul.f32 %v3992_v38, %v3300_v6 }
 0xb60   :  { %v3304_v21 = vrot.slane %v3302_v27, 2  ;;  %v3413_v26 = vsel %vm3412_vm0, %v3411_v2, %v3302_v27 }
 0xb62   :  { %3305 = vrot.lane.b32.xlu1 %v3304_v21, %s4042_s21 }
 0xbd4   :  { %v3306_v57 = vpop.permute.xlu1 %3305 }
 0xbd5   :  { %3910 = vmatmul.mubr.msk.f32.vlgmr.msra.gmra.mrb[78].mxu1 %vm2991_vm14, %v3306_v57 }
 0xca8   :  { %v3375_v17 = vpop.f32.mrb[78].mxu1 }
 0xca9   :  { %v3380_v31 = vrot.slane %v3375_v17, 5  ;;  %v3911_v61 = vpop.f32.mrb[79].mxu1 }
 0xcab   :  { %v3382_v10 = vadd.f32 %v3380_v31, %v5791_v13  ;;  %v3702_v13 = vld [vmem:[%s5860_s6] sm:$0xff]   ;;  %s4043_s6 = smov [#allocation6]  }
 0xcac   :  { %3949 = vmatpush3.bf16.msra.mxu0 %v3702_v13 }
 0xcad   :  { %3995 = vtanh.f32 %v3382_v10  ;;  %v3689_v19 = vmul.f32 -1.442695, %v3382_v10  ;;  %3950 = vmatprep.subr.bf16.mxu0 %v4038_v1  ;;  %v3690_v1 = vld [vmem:[%s5861_s7] ss:$0 sm:$0xff]  ;;  %s3529_s7 = sshll.u32 %s4043_s6, 4  ;;  %s3530_s7 = int_to_ptr.vmem [resolvable:$true] %s3529_s7 }
 0xcae   :  { %s4007_s28 = scalar_lea.vmem %s3530_s7, 64  ;;  %p4012_p1 = scmp.lt.s32.totalorder %s3530_s7, %s3530_s7 }
 0xcaf   :  { %3997 = vpow2.f32 %v3689_v19  ;;  %p4008_p0 = scmp.ne.s32.totalorder %s3530_s7, %s4007_s28  ;;  %p4013_p2 = scmp.lt.s32.totalorder %s4007_s28, %s4007_s28 }
 0xcb0   :  { %3952 = vmatpush3.bf16.msra.mxu0 %v3710_v28 }
 0xcb1   :  { %p4014_p3 = por %p4013_p2, %p4012_p1 }
 0xcb3   :  { %p4015_p4 = pnand %p4014_p3, %p4008_p0 }
 0xcb7   :  { %v3996_v9 = vpop.eup %3995 }
 0xcb8   :  { %3395 = vrot.lane.b32.xlu0 %v3996_v9, %s4041_s5 }
 0xcb9   :  { %v3998_v14 = vpop.eup %3997 }
 0xcba   :  { %v3386_v8 = vadd.f32 1.0, %v3998_v14 }
 0xcbc   :  { %3999 = vrcp.f32 %v3386_v8 }
 0xcc6   :  { %v4000_v0 = vpop.eup %3999 }
 0xcc7   :  { %v3393_v3 = vmul.f32 %v4000_v0, %v3391_v16 }
 0xd2a   :  { %v3396_v58 = vpop.permute.xlu0 %3395 }
 0xd2b   :  { %v3398_v56 = vmul.f32 %v4000_v0, %v3396_v58 }
 0xd2d   :  { %3400 = vrot.lane.b32.xlu1 %v3398_v56, %s4042_s21 }
 0xd9f   :  { %v3401_v15 = vpop.permute.xlu1 %3400 }
 0xda0   :  { %v3403_v18 = vadd.f32 %v3401_v15, %v3393_v3 }
 0xda2   :  { %4001 = vtanh.f32 %v3403_v18 }
 0xdac   :  { %v4002_v55 = vpop.eup %4001 }
 0xdad   :  { %3406 = vrot.lane.b32.xlu0 %v4002_v55, %s4041_s5 }
 0xe1f   :  { %v3407_v5 = vpop.permute.xlu0 %3406 }
 0xe20   :  { %v3409_v20 = vmul.f32 %v4000_v0, %v3407_v5 }
 0xe22   :  { %v3414_v11 = vsel %vm1639_vm3, %v3413_v26, %v3409_v20 }
 0xe23   :  { %3431 = vrot.lane.b32.xlu1 %v3414_v11, %s4042_s21 }
 0xe95   :  { %v3432_v12 = vpop.permute.xlu1 %3431 }
 0xe96   :  { %3921 = vmatmul.mubr.msk.f32.vlgmr.msra.gmra.mrb[80].mxu0 %vm2991_vm14, %v3432_v12 }
 0xf69   :  { %v3501_v30 = vpop.f32.mrb[80].mxu0 }
 0xf6a   :  { %v3502_v33 = vadd.f32 %v3690_v1, %v3501_v30  ;;  %v3922_v35 = vpop.f32.mrb[81].mxu0 }
 0xf6c   :  { %v3508_v4 = vsel %vm3507_vm2, %v3502_v33, -inf }
 0xf6d   :  { %v3509_v24 = vsel %vm1599_vm1, %v3508_v4, -inf }
 0xf6e   :  { %3510 = vmax.xlane.f32.xlu0 %v3509_v24 }
 0xffb   :  { %v3511_v52 = vpop.xlane.xlu0 %3510 }
 0xffc   :  { %v3512_v37 = vsub.f32 %v3502_v33, %v3511_v52 }
 0xffe   :  { %v3513_v39 = vmul.f32 1.442695, %v3512_v37 }
0x1000   :  { %4003 = vpow2.f32 %v3513_v39 }
0x100a   :  { %v4004_v34 = vpop.eup %4003 }
0x100b   :  { %v3515_v41 = vsel %vm3507_vm2, %v4004_v34, 0.0 }
0x100c   :  { %v3516_v60 = vsel %vm1599_vm1, %v3515_v41, 0.0 }
0x100d   :  { %3517 = vadd.xlane.f32.xlu1 %v3516_v60 }
0x109a   :  { %v3518_v42 = vpop.xlane.xlu1 %3517 }
0x109b   :  { %4005 = vlog2.f32 %v3518_v42 }
0x10a5   :  { %v4006_v32 = vpop.eup %4005 }
0x10a6   :  { %v3520_v43 = vmul.f32 0.6931472, %v4006_v32 }
0x10a8   :  { %v3521_v44 = vsub.f32 %v3512_v37, %v3520_v43 }
0x10aa   :  { %3522 = vst [vmem:[#allocation6] sm:$0xf] %v3521_v44 }
0x10ab   :  { %4018 = shalt.err (!%p4015_p4)
}
0x10ac   :  { %s4019_s0 = scalar_lea.hbm %s5862_s8, 64 }
0x10ad   :  { %p4020_p5 = scmp.ne.s32.totalorder %s5862_s8, %s4019_s0  ;;  %p4023_p6 = scmp.lt.u32.totalorder %s4019_s0, %s5862_s8 }
0x10af   :  { %p4025_p7 = pnand %p4023_p6, %p4020_p5 }
0x10b1   :  { %4028 = shalt.err (!%p4025_p7)
}
0x10b2   :  { %3532 = dma.vmem_to_hbm [thread:$0]  %s3530_s7, 64, %s5862_s8, [#allocation7]  }
0x10b3   :  { %4031 = dma.done.wait [#allocation7], 64  }
0x10b4   :  { %4032 = vsyncadd [#allocation7], 4294967232 }
0x10b5   :  { %3536 = vsyncpa [#allocation7], 1 }
0x10b6   :  { %3537 = vsyncmov [#allocation5] }
0x10b9   :  { %s3538_s13 = vpop.sfrf %3537 }
0x10ba   :  { %p3692_p8 = scmp.ne.s32.totalorder %s3538_s13, 0 }
0x10bc   :  { %3542 = shalt.err (%p3692_p8)  }

</bundles_post_ra>
